<compile_context>
chip_gen: v7x
topology: tpu7x:2x2x1
jax: 0.10.0
libtpu: 0.0.40
codegen_flags: <defaults>
</compile_context>

<pallas_src>
import functools

import jax
import jax.numpy as jnp
from jax.experimental import pallas as pl
from jax.experimental.pallas import tpu as pltpu

LEAKY_SLOPE = 0.01   # nn.LeakyReLU default
BN_EPS = 1e-5        # nn.BatchNorm3d default
TM_ELEM = 256        # row tile for the elementwise affine + LeakyReLU kernel


# ----------------------- Pallas kernel: fused banded conv -----------------------

def _conv_band_kernel(x_ref, w_ref, b_ref, o_ref, ssum_ref, ssq_ref, *, kt, kh):
    """One (batch, out_time) step of a 3-D conv as kt*kh banded matmuls.

    x_ref:    (Tp, Hp, Wp*Cin)          bf16  whole padded sample (VMEM resident)
    w_ref:    (kt*kh, Wp*Cin, Wo*Cout)  bf16  width-banded weight matrices
    b_ref:    (1, Wo*Cout)              f32   bias (zeros when bias=False)
    o_ref:    (Ho, Wo*Cout)                   conv output slab for this (b, to)
    ssum_ref: (1, Wo*Cout)              f32   partial sum over ho   (for BatchNorm)
    ssq_ref:  (1, Wo*Cout)              f32   partial sum of squares (for BatchNorm)
    """
    to = pl.program_id(1)
    Ho, N = o_ref.shape
    acc = jnp.zeros((Ho, N), jnp.float32)
    for dt in range(kt):                      # short static loops -> fully unrolled
        for dh in range(kh):
            xs = x_ref[pl.ds(to + dt, 1), pl.ds(dh, Ho), :][0]   # (Ho, Wp*Cin) bf16
            wk = w_ref[pl.ds(dt * kh + dh, 1), :, :][0]          # (Wp*Cin, Wo*Cout)
            acc = acc + jnp.dot(xs, wk, preferred_element_type=jnp.float32)
    acc = acc + b_ref[...]
    o_ref[...] = acc.astype(o_ref.dtype)
    ssum_ref[...] = jnp.sum(acc, axis=0, keepdims=True)
    ssq_ref[...] = jnp.sum(acc * acc, axis=0, keepdims=True)


# ------------------ Pallas kernel: BN-affine + LeakyReLU (lane-dense) -----------

def _affine_lrelu_kernel(y_ref, sc_ref, sh_ref, o_ref):
    z = y_ref[...].astype(jnp.float32) * sc_ref[...] + sh_ref[...]
    o_ref[...] = jnp.where(z >= 0, z, LEAKY_SLOPE * z).astype(o_ref.dtype)


# ------------------------------- conv wrappers -----------------------------------

def _band_weights(weight, Wp, Wo):
    """torch weight (Cout, Cin, kt, kh, kw) -> (kt*kh, Wp*Cin, Wo*Cout) bf16 banded:
    band[dt*kh+dh, wi*Cin+ci, wo*Cout+co] = weight[co,ci,dt,dh,wi-wo] if 0<=wi-wo<kw."""
    Cout, Cin, kt, kh, kw = weight.shape
    w = jnp.transpose(weight, (2, 3, 4, 1, 0)).astype(jnp.float32)   # (kt,kh,kw,Cin,Cout)
    sel = (jnp.arange(Wp)[None, :, None] ==
           (jnp.arange(Wo)[None, None, :] + jnp.arange(kw)[:, None, None]))
    sel = sel.astype(jnp.float32)                                    # (kw, Wp, Wo)
    band = jnp.einsum('thkio,kpw->thpiwo', w, sel)                   # (kt,kh,Wp,Cin,Wo,Cout)
    return band.reshape(kt * kh, Wp * Cin, Wo * Cout).astype(jnp.bfloat16)


def conv3d_band(x, weight, padding, bias=None, out_dtype=jnp.float32):
    """3-D conv, stride 1, on channels-last x:(B,T,H,W,Cin); torch weight layout.
    Returns y:(B,To,Ho,Wo*Cout), per-(b,to) partial sums for BN, and dims."""
    B, T, H, W, Cin = x.shape
    Cout, _, kt, kh, kw = weight.shape
    pt, ph, pw = padding
    Tp, Hp, Wp = T + 2 * pt, H + 2 * ph, W + 2 * pw
    To, Ho, Wo = Tp - kt + 1, Hp - kh + 1, Wp - kw + 1
    N = Wo * Cout

    xp = jnp.pad(x.astype(jnp.bfloat16),
                 ((0, 0), (pt, pt), (ph, ph), (pw, pw), (0, 0)))
    xp = xp.reshape(B, Tp, Hp, Wp * Cin)
    band = _band_weights(weight, Wp, Wo)
    if bias is None:
        bflat = jnp.zeros((1, N), jnp.float32)
    else:
        bflat = jnp.tile(bias.astype(jnp.float32), Wo).reshape(1, N)

    # TODO(synk): for large W / hidden_dim, tile the band's N (=Wo*Cout) and
    # K (=Wp*Cin) dims and the per-sample T extent instead of whole-sample VMEM blocks.
    kern = functools.partial(_conv_band_kernel, kt=kt, kh=kh)
    y, ssum, ssq = pl.pallas_call(
        kern,
        out_shape=(jax.ShapeDtypeStruct((B, To, Ho, N), out_dtype),
                   jax.ShapeDtypeStruct((B, To, 1, N), jnp.float32),
                   jax.ShapeDtypeStruct((B, To, 1, N), jnp.float32)),
        grid=(B, To),
        in_specs=[
            pl.BlockSpec((None, Tp, Hp, Wp * Cin), lambda b, t: (b, 0, 0, 0)),
            pl.BlockSpec((kt * kh, Wp * Cin, N), lambda b, t: (0, 0, 0)),
            pl.BlockSpec((1, N), lambda b, t: (0, 0)),
        ],
        out_specs=(
            pl.BlockSpec((None, None, Ho, N), lambda b, t: (b, t, 0, 0)),
            pl.BlockSpec((None, None, 1, N), lambda b, t: (b, t, 0, 0)),
            pl.BlockSpec((None, None, 1, N), lambda b, t: (b, t, 0, 0)),
        ),
        compiler_params=pltpu.CompilerParams(
            dimension_semantics=("parallel", "parallel")),
    )(xp, band, bflat)
    return y, ssum, ssq, (B, To, Ho, Wo, Cout)


# --------------------------- BatchNorm + LeakyReLU glue --------------------------

def _finalize_bn_stats(ssum, ssq, Wo, Cout, count, gamma, beta):
    """Training-mode BatchNorm3d (batch stats, biased variance) -> per-channel affine."""
    s1 = jnp.sum(ssum, axis=(0, 1, 2)).reshape(Wo, Cout).sum(axis=0)    # (Cout,)
    s2 = jnp.sum(ssq, axis=(0, 1, 2)).reshape(Wo, Cout).sum(axis=0)     # (Cout,)
    mean = s1 / count
    var = s2 / count - mean * mean
    scale = gamma * jax.lax.rsqrt(var + BN_EPS)
    shift = beta - mean * scale
    return scale, shift


def apply_affine_lrelu(y, scale, shift, Wo, Cout, out_dtype=jnp.bfloat16):
    """y:(B,To,Ho,Wo*Cout) -> leaky_relu(y*scale+shift) as (B,To,Ho,Wo,Cout)."""
    B, To, Ho, N = y.shape
    M = B * To * Ho
    y2 = y.reshape(M, N)
    sc = jnp.tile(scale.astype(jnp.float32), Wo).reshape(1, N)
    sh = jnp.tile(shift.astype(jnp.float32), Wo).reshape(1, N)
    if M <= TM_ELEM:
        bm, Mp = M, M
    else:
        bm = TM_ELEM
        Mp = pl.cdiv(M, bm) * bm
        if Mp != M:
            y2 = jnp.pad(y2, ((0, Mp - M), (0, 0)))
    out = pl.pallas_call(
        _affine_lrelu_kernel,
        out_shape=jax.ShapeDtypeStruct((Mp, N), out_dtype),
        grid=(Mp // bm,),
        in_specs=[pl.BlockSpec((bm, N), lambda i: (i, 0)),
                  pl.BlockSpec((1, N), lambda i: (0, 0)),
                  pl.BlockSpec((1, N), lambda i: (0, 0))],
        out_specs=pl.BlockSpec((bm, N), lambda i: (i, 0)),
        compiler_params=pltpu.CompilerParams(dimension_semantics=("parallel",)),
    )(y2, sc, sh)
    return out[:M].reshape(B, To, Ho, Wo, Cout)


# ------------------------------- model forward -----------------------------------

def _conv_bn_lrelu(x, w, gamma, beta, padding):
    y, ssum, ssq, (B, To, Ho, Wo, Co) = conv3d_band(x, w, padding,
                                                    out_dtype=jnp.bfloat16)
    count = B * To * Ho * Wo
    scale, shift = _finalize_bn_stats(ssum, ssq, Wo, Co, count, gamma, beta)
    return apply_affine_lrelu(y, scale, shift, Wo, Co)


def rnet_forward(x, p, kt, ks):
    """RNetNotFactorized.forward on channels-last x: (B, T, H, W, Cin) bf16."""
    sp = ks // 2
    if kt == 2:
        return _conv_bn_lrelu(x, p["w_k2"], p["gamma_k2"], p["beta_k2"], (0, 0, 0))
    # main conv branch: temporal padding 0 -> time shrinks to T-kt+1
    y = _conv_bn_lrelu(x, p["w_conv"], p["gamma_conv"], p["beta_conv"], (0, sp, sp))
    # k2 branch on the last kt time steps (kernel (2,1,1), no padding)
    yk = _conv_bn_lrelu(x[:, -kt:], p["w_k2"], p["gamma_k2"], p["beta_k2"], (0, 0, 0))
    # ReplicationPad3d((0,0,0,0,0,1)): replicate last temporal slice -> (B, kt, H, W, C)
    yk = jnp.concatenate([yk, yk[:, -1:]], axis=1)
    part1 = y[:, :-1]                                # (B, T-kt, H, W, C)
    part2 = y[:, -1:] - yk                           # broadcast -> (B, kt, H, W, C)
    return jnp.concatenate([part1, part2], axis=1)   # (B, T, H, W, C)


def model_forward(x_ncdhw, params, *, kt, ks):
    """AblationSTConvS2S_R_NotFactorized.forward: (B,C,T,H,W) -> (B,C,T,H,W)."""
    x = jnp.transpose(x_ncdhw, (0, 2, 3, 4, 1)).astype(jnp.bfloat16)   # (B,T,H,W,C)
    x = jnp.flip(x, axis=1)                           # torch.flip(x, [2])
    for layer in params["layers"]:
        x = rnet_forward(x, layer, kt, ks)
    x = jnp.flip(x, axis=1)                           # torch.flip(x, [2])
    y, _, _, (B, To, Ho, Wo, Co) = conv3d_band(
        x, params["w_final"], (kt // 2, ks // 2, ks // 2),
        bias=params["b_final"], out_dtype=jnp.float32)
    out = y.reshape(B, To, Ho, Wo, Co)
    return jnp.transpose(out, (0, 4, 1, 2, 3))        # back to NCDHW (f32)


# ------------------------------- parameter init ----------------------------------

def init_params(key, in_channels, hidden_dim, num_layers, kernel_size):
    kt, kh, kw = kernel_size
    layers = []
    cin = in_channels
    for _ in range(num_layers):
        key, k1, k2, k3, k4, k5, k6 = jax.random.split(key, 7)
        layers.append(dict(
            w_conv=0.1 * jax.random.normal(k1, (hidden_dim, cin, kt, kh, kw), jnp.float32),
            w_k2=0.1 * jax.random.normal(k2, (hidden_dim, cin, 2, 1, 1), jnp.float32),
            gamma_conv=1.0 + 0.1 * jax.random.normal(k3, (hidden_dim,), jnp.float32),
            beta_conv=0.1 * jax.random.normal(k4, (hidden_dim,), jnp.float32),
            gamma_k2=1.0 + 0.1 * jax.random.normal(k5, (hidden_dim,), jnp.float32),
            beta_k2=0.1 * jax.random.normal(k6, (hidden_dim,), jnp.float32),
        ))
        cin = hidden_dim
    key, kwf, kbf = jax.random.split(key, 3)
    return dict(
        layers=layers,
        w_final=0.1 * jax.random.normal(kwf, (in_channels, hidden_dim, kt, kh, kw), jnp.float32),
        b_final=0.1 * jax.random.normal(kbf, (in_channels,), jnp.float32),
    )


if __name__ == "__main__":
    # Small shapes consistent with the module: input_size = (B, C, T, H, W)
    B, C, T, H, W = 2, 2, 5, 8, 8
    hidden_dim = 16
    num_layers = 2
    kernel_size = (3, 3, 3)

    key = jax.random.PRNGKey(0)
    key, kx = jax.random.split(key)
    x = jax.random.normal(kx, (B, C, T, H, W), jnp.float32)
    params = init_params(key, C, hidden_dim, num_layers, kernel_size)

    fwd = jax.jit(functools.partial(model_forward, kt=kernel_size[0], ks=kernel_size[1]))
    out = fwd(x, params)
    jax.block_until_ready(out)
    assert out.shape == (B, C, T, H, W), out.shape
    assert bool(jnp.all(jnp.isfinite(out))), "non-finite output"
    print("KERNEL_OK")
</pallas_src>

<mosaic_0001>
module attributes {stable_mosaic.version = 11 : i64} {
  func.func @_conv_band_kernel(%arg0: i32, %arg1: i32, %arg2: memref<1x5x10x20xbf16, #tpu.memory_space<vmem>>, %arg3: memref<9x20x128xbf16, #tpu.memory_space<vmem>>, %arg4: memref<1x128xf32, #tpu.memory_space<vmem>>, %arg5: memref<1x1x8x128xbf16, #tpu.memory_space<vmem>>, %arg6: memref<1x1x1x128xf32, #tpu.memory_space<vmem>>, %arg7: memref<1x1x1x128xf32, #tpu.memory_space<vmem>>) attributes {dimension_semantics = [#tpu.dimension_semantics<parallel>, #tpu.dimension_semantics<parallel>], iteration_bounds = array<i64: 2, 3>, scalar_prefetch = 0 : i64, scratch_operands = 0 : i64, tpu.core_type = #tpu.core_type<tc>, window_params = [{transform_indices = @transform_0, window_bounds = array<i64: 1, 5, 10, 20>}, {pipeline_mode = #tpu.pipeline_mode<synchronous>, transform_indices = @transform_1, window_bounds = array<i64: 9, 20, 128>}, {pipeline_mode = #tpu.pipeline_mode<synchronous>, transform_indices = @transform_2, window_bounds = array<i64: 1, 128>}, {transform_indices = @transform_3, window_bounds = array<i64: 1, 1, 8, 128>}, {transform_indices = @transform_4, window_bounds = array<i64: 1, 1, 1, 128>}, {transform_indices = @transform_5, window_bounds = array<i64: 1, 1, 1, 128>}]} {
    %cst = arith.constant 0.000000e+00 : f32
    %0 = vector.broadcast %cst : f32 to vector<8x128xf32>
    %c0_i32 = arith.constant 0 : i32
    %1 = arith.addi %arg1, %c0_i32 : i32
    %c0 = arith.constant 0 : index
    %2 = arith.index_cast %1 : i32 to index
    %c0_0 = arith.constant 0 : index
    %c0_1 = arith.constant 0 : index
    %3 = vector.load %arg2[%c0, %2, %c0_0, %c0_1] : memref<1x5x10x20xbf16, #tpu.memory_space<vmem>>, vector<1x1x8x20xbf16>
    %4 = vector.shape_cast %3 : vector<1x1x8x20xbf16> to vector<1x8x20xbf16>
    %5 = vector.shape_cast %4 : vector<1x8x20xbf16> to vector<8x20xbf16>
    %c0_2 = arith.constant 0 : index
    %c0_3 = arith.constant 0 : index
    %c0_4 = arith.constant 0 : index
    %6 = vector.load %arg3[%c0_2, %c0_3, %c0_4] : memref<9x20x128xbf16, #tpu.memory_space<vmem>>, vector<1x20x128xbf16>
    %7 = vector.shape_cast %6 : vector<1x20x128xbf16> to vector<20x128xbf16>
    %cst_5 = arith.constant dense<0.000000e+00> : vector<8x128xf32>
    %8 = tpu.matmul %5, %7, %cst_5 {dimension_numbers = #tpu.dot_dimension_numbers<[1], [0], [0], [1], [0, 0, 1, 1], [], []>} : vector<8x20xbf16>, vector<20x128xbf16>, vector<8x128xf32> -> vector<8x128xf32>
    %9 = arith.addf %0, %8 : vector<8x128xf32>
    %c0_i32_6 = arith.constant 0 : i32
    %10 = arith.addi %arg1, %c0_i32_6 : i32
    %c0_7 = arith.constant 0 : index
    %11 = arith.index_cast %10 : i32 to index
    %c1 = arith.constant 1 : index
    %c0_8 = arith.constant 0 : index
    %12 = vector.load %arg2[%c0_7, %11, %c1, %c0_8] : memref<1x5x10x20xbf16, #tpu.memory_space<vmem>>, vector<1x1x8x20xbf16>
    %13 = vector.shape_cast %12 : vector<1x1x8x20xbf16> to vector<1x8x20xbf16>
    %14 = vector.shape_cast %13 : vector<1x8x20xbf16> to vector<8x20xbf16>
    %c1_9 = arith.constant 1 : index
    %c0_10 = arith.constant 0 : index
    %c0_11 = arith.constant 0 : index
    %15 = vector.load %arg3[%c1_9, %c0_10, %c0_11] : memref<9x20x128xbf16, #tpu.memory_space<vmem>>, vector<1x20x128xbf16>
    %16 = vector.shape_cast %15 : vector<1x20x128xbf16> to vector<20x128xbf16>
    %cst_12 = arith.constant dense<0.000000e+00> : vector<8x128xf32>
    %17 = tpu.matmul %14, %16, %cst_12 {dimension_numbers = #tpu.dot_dimension_numbers<[1], [0], [0], [1], [0, 0, 1, 1], [], []>} : vector<8x20xbf16>, vector<20x128xbf16>, vector<8x128xf32> -> vector<8x128xf32>
    %18 = arith.addf %9, %17 : vector<8x128xf32>
    %c0_i32_13 = arith.constant 0 : i32
    %19 = arith.addi %arg1, %c0_i32_13 : i32
    %c0_14 = arith.constant 0 : index
    %20 = arith.index_cast %19 : i32 to index
    %c2 = arith.constant 2 : index
    %c0_15 = arith.constant 0 : index
    %21 = vector.load %arg2[%c0_14, %20, %c2, %c0_15] : memref<1x5x10x20xbf16, #tpu.memory_space<vmem>>, vector<1x1x8x20xbf16>
    %22 = vector.shape_cast %21 : vector<1x1x8x20xbf16> to vector<1x8x20xbf16>
    %23 = vector.shape_cast %22 : vector<1x8x20xbf16> to vector<8x20xbf16>
    %c2_16 = arith.constant 2 : index
    %c0_17 = arith.constant 0 : index
    %c0_18 = arith.constant 0 : index
    %24 = vector.load %arg3[%c2_16, %c0_17, %c0_18] : memref<9x20x128xbf16, #tpu.memory_space<vmem>>, vector<1x20x128xbf16>
    %25 = vector.shape_cast %24 : vector<1x20x128xbf16> to vector<20x128xbf16>
    %cst_19 = arith.constant dense<0.000000e+00> : vector<8x128xf32>
    %26 = tpu.matmul %23, %25, %cst_19 {dimension_numbers = #tpu.dot_dimension_numbers<[1], [0], [0], [1], [0, 0, 1, 1], [], []>} : vector<8x20xbf16>, vector<20x128xbf16>, vector<8x128xf32> -> vector<8x128xf32>
    %27 = arith.addf %18, %26 : vector<8x128xf32>
    %c1_i32 = arith.constant 1 : i32
    %28 = arith.addi %arg1, %c1_i32 : i32
    %c0_20 = arith.constant 0 : index
    %29 = arith.index_cast %28 : i32 to index
    %c0_21 = arith.constant 0 : index
    %c0_22 = arith.constant 0 : index
    %30 = vector.load %arg2[%c0_20, %29, %c0_21, %c0_22] : memref<1x5x10x20xbf16, #tpu.memory_space<vmem>>, vector<1x1x8x20xbf16>
    %31 = vector.shape_cast %30 : vector<1x1x8x20xbf16> to vector<1x8x20xbf16>
    %32 = vector.shape_cast %31 : vector<1x8x20xbf16> to vector<8x20xbf16>
    %c3 = arith.constant 3 : index
    %c0_23 = arith.constant 0 : index
    %c0_24 = arith.constant 0 : index
    %33 = vector.load %arg3[%c3, %c0_23, %c0_24] : memref<9x20x128xbf16, #tpu.memory_space<vmem>>, vector<1x20x128xbf16>
    %34 = vector.shape_cast %33 : vector<1x20x128xbf16> to vector<20x128xbf16>
    %cst_25 = arith.constant dense<0.000000e+00> : vector<8x128xf32>
    %35 = tpu.matmul %32, %34, %cst_25 {dimension_numbers = #tpu.dot_dimension_numbers<[1], [0], [0], [1], [0, 0, 1, 1], [], []>} : vector<8x20xbf16>, vector<20x128xbf16>, vector<8x128xf32> -> vector<8x128xf32>
    %36 = arith.addf %27, %35 : vector<8x128xf32>
    %c1_i32_26 = arith.constant 1 : i32
    %37 = arith.addi %arg1, %c1_i32_26 : i32
    %c0_27 = arith.constant 0 : index
    %38 = arith.index_cast %37 : i32 to index
    %c1_28 = arith.constant 1 : index
    %c0_29 = arith.constant 0 : index
    %39 = vector.load %arg2[%c0_27, %38, %c1_28, %c0_29] : memref<1x5x10x20xbf16, #tpu.memory_space<vmem>>, vector<1x1x8x20xbf16>
    %40 = vector.shape_cast %39 : vector<1x1x8x20xbf16> to vector<1x8x20xbf16>
    %41 = vector.shape_cast %40 : vector<1x8x20xbf16> to vector<8x20xbf16>
    %c4 = arith.constant 4 : index
    %c0_30 = arith.constant 0 : index
    %c0_31 = arith.constant 0 : index
    %42 = vector.load %arg3[%c4, %c0_30, %c0_31] : memref<9x20x128xbf16, #tpu.memory_space<vmem>>, vector<1x20x128xbf16>
    %43 = vector.shape_cast %42 : vector<1x20x128xbf16> to vector<20x128xbf16>
    %cst_32 = arith.constant dense<0.000000e+00> : vector<8x128xf32>
    %44 = tpu.matmul %41, %43, %cst_32 {dimension_numbers = #tpu.dot_dimension_numbers<[1], [0], [0], [1], [0, 0, 1, 1], [], []>} : vector<8x20xbf16>, vector<20x128xbf16>, vector<8x128xf32> -> vector<8x128xf32>
    %45 = arith.addf %36, %44 : vector<8x128xf32>
    %c1_i32_33 = arith.constant 1 : i32
    %46 = arith.addi %arg1, %c1_i32_33 : i32
    %c0_34 = arith.constant 0 : index
    %47 = arith.index_cast %46 : i32 to index
    %c2_35 = arith.constant 2 : index
    %c0_36 = arith.constant 0 : index
    %48 = vector.load %arg2[%c0_34, %47, %c2_35, %c0_36] : memref<1x5x10x20xbf16, #tpu.memory_space<vmem>>, vector<1x1x8x20xbf16>
    %49 = vector.shape_cast %48 : vector<1x1x8x20xbf16> to vector<1x8x20xbf16>
    %50 = vector.shape_cast %49 : vector<1x8x20xbf16> to vector<8x20xbf16>
    %c5 = arith.constant 5 : index
    %c0_37 = arith.constant 0 : index
    %c0_38 = arith.constant 0 : index
    %51 = vector.load %arg3[%c5, %c0_37, %c0_38] : memref<9x20x128xbf16, #tpu.memory_space<vmem>>, vector<1x20x128xbf16>
    %52 = vector.shape_cast %51 : vector<1x20x128xbf16> to vector<20x128xbf16>
    %cst_39 = arith.constant dense<0.000000e+00> : vector<8x128xf32>
    %53 = tpu.matmul %50, %52, %cst_39 {dimension_numbers = #tpu.dot_dimension_numbers<[1], [0], [0], [1], [0, 0, 1, 1], [], []>} : vector<8x20xbf16>, vector<20x128xbf16>, vector<8x128xf32> -> vector<8x128xf32>
    %54 = arith.addf %45, %53 : vector<8x128xf32>
    %c2_i32 = arith.constant 2 : i32
    %55 = arith.addi %arg1, %c2_i32 : i32
    %c0_40 = arith.constant 0 : index
    %56 = arith.index_cast %55 : i32 to index
    %c0_41 = arith.constant 0 : index
    %c0_42 = arith.constant 0 : index
    %57 = vector.load %arg2[%c0_40, %56, %c0_41, %c0_42] : memref<1x5x10x20xbf16, #tpu.memory_space<vmem>>, vector<1x1x8x20xbf16>
    %58 = vector.shape_cast %57 : vector<1x1x8x20xbf16> to vector<1x8x20xbf16>
    %59 = vector.shape_cast %58 : vector<1x8x20xbf16> to vector<8x20xbf16>
    %c6 = arith.constant 6 : index
    %c0_43 = arith.constant 0 : index
    %c0_44 = arith.constant 0 : index
    %60 = vector.load %arg3[%c6, %c0_43, %c0_44] : memref<9x20x128xbf16, #tpu.memory_space<vmem>>, vector<1x20x128xbf16>
    %61 = vector.shape_cast %60 : vector<1x20x128xbf16> to vector<20x128xbf16>
    %cst_45 = arith.constant dense<0.000000e+00> : vector<8x128xf32>
    %62 = tpu.matmul %59, %61, %cst_45 {dimension_numbers = #tpu.dot_dimension_numbers<[1], [0], [0], [1], [0, 0, 1, 1], [], []>} : vector<8x20xbf16>, vector<20x128xbf16>, vector<8x128xf32> -> vector<8x128xf32>
    %63 = arith.addf %54, %62 : vector<8x128xf32>
    %c2_i32_46 = arith.constant 2 : i32
    %64 = arith.addi %arg1, %c2_i32_46 : i32
    %c0_47 = arith.constant 0 : index
    %65 = arith.index_cast %64 : i32 to index
    %c1_48 = arith.constant 1 : index
    %c0_49 = arith.constant 0 : index
    %66 = vector.load %arg2[%c0_47, %65, %c1_48, %c0_49] : memref<1x5x10x20xbf16, #tpu.memory_space<vmem>>, vector<1x1x8x20xbf16>
    %67 = vector.shape_cast %66 : vector<1x1x8x20xbf16> to vector<1x8x20xbf16>
    %68 = vector.shape_cast %67 : vector<1x8x20xbf16> to vector<8x20xbf16>
    %c7 = arith.constant 7 : index
    %c0_50 = arith.constant 0 : index
    %c0_51 = arith.constant 0 : index
    %69 = vector.load %arg3[%c7, %c0_50, %c0_51] : memref<9x20x128xbf16, #tpu.memory_space<vmem>>, vector<1x20x128xbf16>
    %70 = vector.shape_cast %69 : vector<1x20x128xbf16> to vector<20x128xbf16>
    %cst_52 = arith.constant dense<0.000000e+00> : vector<8x128xf32>
    %71 = tpu.matmul %68, %70, %cst_52 {dimension_numbers = #tpu.dot_dimension_numbers<[1], [0], [0], [1], [0, 0, 1, 1], [], []>} : vector<8x20xbf16>, vector<20x128xbf16>, vector<8x128xf32> -> vector<8x128xf32>
    %72 = arith.addf %63, %71 : vector<8x128xf32>
    %c2_i32_53 = arith.constant 2 : i32
    %73 = arith.addi %arg1, %c2_i32_53 : i32
    %c0_54 = arith.constant 0 : index
    %74 = arith.index_cast %73 : i32 to index
    %c2_55 = arith.constant 2 : index
    %c0_56 = arith.constant 0 : index
    %75 = vector.load %arg2[%c0_54, %74, %c2_55, %c0_56] : memref<1x5x10x20xbf16, #tpu.memory_space<vmem>>, vector<1x1x8x20xbf16>
    %76 = vector.shape_cast %75 : vector<1x1x8x20xbf16> to vector<1x8x20xbf16>
    %77 = vector.shape_cast %76 : vector<1x8x20xbf16> to vector<8x20xbf16>
    %c8 = arith.constant 8 : index
    %c0_57 = arith.constant 0 : index
    %c0_58 = arith.constant 0 : index
    %78 = vector.load %arg3[%c8, %c0_57, %c0_58] : memref<9x20x128xbf16, #tpu.memory_space<vmem>>, vector<1x20x128xbf16>
    %79 = vector.shape_cast %78 : vector<1x20x128xbf16> to vector<20x128xbf16>
    %cst_59 = arith.constant dense<0.000000e+00> : vector<8x128xf32>
    %80 = tpu.matmul %77, %79, %cst_59 {dimension_numbers = #tpu.dot_dimension_numbers<[1], [0], [0], [1], [0, 0, 1, 1], [], []>} : vector<8x20xbf16>, vector<20x128xbf16>, vector<8x128xf32> -> vector<8x128xf32>
    %81 = arith.addf %72, %80 : vector<8x128xf32>
    %c0_60 = arith.constant 0 : index
    %c0_61 = arith.constant 0 : index
    %82 = vector.load %arg4[%c0_60, %c0_61] : memref<1x128xf32, #tpu.memory_space<vmem>>, vector<1x128xf32>
    %83 = vector.broadcast %82 : vector<1x128xf32> to vector<8x128xf32>
    %84 = arith.addf %81, %83 : vector<8x128xf32>
    %85 = arith.truncf %84 : vector<8x128xf32> to vector<8x128xbf16>
    %c0_62 = arith.constant 0 : index
    %c0_63 = arith.constant 0 : index
    %c0_64 = arith.constant 0 : index
    %c0_65 = arith.constant 0 : index
    %86 = vector.load %arg5[%c0_62, %c0_63, %c0_64, %c0_65] : memref<1x1x8x128xbf16, #tpu.memory_space<vmem>>, vector<1x1x8x128xbf16>
    %87 = vector.shape_cast %86 : vector<1x1x8x128xbf16> to vector<8x128xbf16>
    %88 = vector.shape_cast %85 : vector<8x128xbf16> to vector<1x1x8x128xbf16>
    tpu.vector_store %arg5[%c0_62, %c0_63, %c0_64, %c0_65], %88 {strides = array<i32>} : memref<1x1x8x128xbf16, #tpu.memory_space<vmem>>, vector<1x1x8x128xbf16>,
    %cst_66 = arith.constant dense<0.000000e+00> : vector<128xf32>
    %89 = vector.multi_reduction <add>, %84, %cst_66 [0] : vector<8x128xf32> to vector<128xf32>
    %90 = vector.shape_cast %89 : vector<128xf32> to vector<1x128xf32>
    %c0_67 = arith.constant 0 : index
    %c0_68 = arith.constant 0 : index
    %c0_69 = arith.constant 0 : index
    %c0_70 = arith.constant 0 : index
    %91 = vector.load %arg6[%c0_67, %c0_68, %c0_69, %c0_70] : memref<1x1x1x128xf32, #tpu.memory_space<vmem>>, vector<1x1x1x128xf32>
    %92 = vector.shape_cast %91 : vector<1x1x1x128xf32> to vector<1x128xf32>
    %93 = vector.shape_cast %90 : vector<1x128xf32> to vector<1x1x1x128xf32>
    tpu.vector_store %arg6[%c0_67, %c0_68, %c0_69, %c0_70], %93 {strides = array<i32>} : memref<1x1x1x128xf32, #tpu.memory_space<vmem>>, vector<1x1x1x128xf32>,
    %94 = arith.mulf %84, %84 : vector<8x128xf32>
    %cst_71 = arith.constant dense<0.000000e+00> : vector<128xf32>
    %95 = vector.multi_reduction <add>, %94, %cst_71 [0] : vector<8x128xf32> to vector<128xf32>
    %96 = vector.shape_cast %95 : vector<128xf32> to vector<1x128xf32>
    %c0_72 = arith.constant 0 : index
    %c0_73 = arith.constant 0 : index
    %c0_74 = arith.constant 0 : index
    %c0_75 = arith.constant 0 : index
    %97 = vector.load %arg7[%c0_72, %c0_73, %c0_74, %c0_75] : memref<1x1x1x128xf32, #tpu.memory_space<vmem>>, vector<1x1x1x128xf32>
    %98 = vector.shape_cast %97 : vector<1x1x1x128xf32> to vector<1x128xf32>
    %99 = vector.shape_cast %96 : vector<1x128xf32> to vector<1x1x1x128xf32>
    tpu.vector_store %arg7[%c0_72, %c0_73, %c0_74, %c0_75], %99 {strides = array<i32>} : memref<1x1x1x128xf32, #tpu.memory_space<vmem>>, vector<1x1x1x128xf32>,
    return
  }
  func.func @transform_0(%arg0: i32, %arg1: i32) -> (i32, i32, i32, i32) {
    %c0_i32 = arith.constant 0 : i32
    %c0_i32_0 = arith.constant 0 : i32
    %c0_i32_1 = arith.constant 0 : i32
    %c0_i32_2 = arith.constant 0 : i32
    return %arg0, %c0_i32, %c0_i32_0, %c0_i32_1 : i32, i32, i32, i32
  }
  func.func @transform_1(%arg0: i32, %arg1: i32) -> (i32, i32, i32) {
    %c0_i32 = arith.constant 0 : i32
    %c0_i32_0 = arith.constant 0 : i32
    %c0_i32_1 = arith.constant 0 : i32
    %c0_i32_2 = arith.constant 0 : i32
    return %c0_i32, %c0_i32_0, %c0_i32_1 : i32, i32, i32
  }
  func.func @transform_2(%arg0: i32, %arg1: i32) -> (i32, i32) {
    %c0_i32 = arith.constant 0 : i32
    %c0_i32_0 = arith.constant 0 : i32
    %c0_i32_1 = arith.constant 0 : i32
    return %c0_i32, %c0_i32_0 : i32, i32
  }
  func.func @transform_3(%arg0: i32, %arg1: i32) -> (i32, i32, i32, i32) {
    %c0_i32 = arith.constant 0 : i32
    %c0_i32_0 = arith.constant 0 : i32
    %c0_i32_1 = arith.constant 0 : i32
    return %arg0, %arg1, %c0_i32, %c0_i32_0 : i32, i32, i32, i32
  }
  func.func @transform_4(%arg0: i32, %arg1: i32) -> (i32, i32, i32, i32) {
    %c0_i32 = arith.constant 0 : i32
    %c0_i32_0 = arith.constant 0 : i32
    %c0_i32_1 = arith.constant 0 : i32
    return %arg0, %arg1, %c0_i32, %c0_i32_0 : i32, i32, i32, i32
  }
  func.func @transform_5(%arg0: i32, %arg1: i32) -> (i32, i32, i32, i32) {
    %c0_i32 = arith.constant 0 : i32
    %c0_i32_0 = arith.constant 0 : i32
    %c0_i32_1 = arith.constant 0 : i32
    return %arg0, %arg1, %c0_i32, %c0_i32_0 : i32, i32, i32, i32
  }
}

module attributes {stable_mosaic.version = 11 : i64} {
  func.func @_affine_lrelu_kernel(%arg0: i32, %arg1: memref<48x128xbf16, #tpu.memory_space<vmem>>, %arg2: memref<1x128xf32, #tpu.memory_space<vmem>>, %arg3: memref<1x128xf32, #tpu.memory_space<vmem>>, %arg4: memref<48x128xbf16, #tpu.memory_space<vmem>>) attributes {dimension_semantics = [#tpu.dimension_semantics<parallel>], iteration_bounds = array<i64: 1>, scalar_prefetch = 0 : i64, scratch_operands = 0 : i64, tpu.core_type = #tpu.core_type<tc>, window_params = [{transform_indices = @transform_0, window_bounds = array<i64: 48, 128>}, {pipeline_mode = #tpu.pipeline_mode<synchronous>, transform_indices = @transform_1, window_bounds = array<i64: 1, 128>}, {pipeline_mode = #tpu.pipeline_mode<synchronous>, transform_indices = @transform_2, window_bounds = array<i64: 1, 128>}, {transform_indices = @transform_3, window_bounds = array<i64: 48, 128>}]} {
    %c0 = arith.constant 0 : index
    %c0_0 = arith.constant 0 : index
    %0 = vector.load %arg1[%c0, %c0_0] : memref<48x128xbf16, #tpu.memory_space<vmem>>, vector<48x128xbf16>
    %1 = arith.extf %0 : vector<48x128xbf16> to vector<48x128xf32>
    %c0_1 = arith.constant 0 : index
    %c0_2 = arith.constant 0 : index
    %2 = vector.load %arg2[%c0_1, %c0_2] : memref<1x128xf32, #tpu.memory_space<vmem>>, vector<1x128xf32>
    %3 = vector.broadcast %2 : vector<1x128xf32> to vector<48x128xf32>
    %4 = arith.mulf %1, %3 : vector<48x128xf32>
    %c0_3 = arith.constant 0 : index
    %c0_4 = arith.constant 0 : index
    %5 = vector.load %arg3[%c0_3, %c0_4] : memref<1x128xf32, #tpu.memory_space<vmem>>, vector<1x128xf32>
    %6 = vector.broadcast %5 : vector<1x128xf32> to vector<48x128xf32>
    %7 = arith.addf %4, %6 : vector<48x128xf32>
    %cst = arith.constant 0.000000e+00 : f32
    %8 = vector.broadcast %cst : f32 to vector<48x128xf32>
    %9 = arith.cmpf oge, %7, %8 : vector<48x128xf32>
    %cst_5 = arith.constant 0.00999999977 : f32
    %10 = vector.broadcast %cst_5 : f32 to vector<48x128xf32>
    %11 = arith.mulf %10, %7 : vector<48x128xf32>
    %12 = arith.select %9, %7, %11 : vector<48x128xi1>, vector<48x128xf32>
    %13 = arith.truncf %12 : vector<48x128xf32> to vector<48x128xbf16>
    %c0_6 = arith.constant 0 : index
    %c0_7 = arith.constant 0 : index
    %14 = vector.load %arg4[%c0_6, %c0_7] : memref<48x128xbf16, #tpu.memory_space<vmem>>, vector<48x128xbf16>
    tpu.vector_store %arg4[%c0_6, %c0_7], %13 {strides = array<i32>} : memref<48x128xbf16, #tpu.memory_space<vmem>>, vector<48x128xbf16>,
    return
  }
  func.func @transform_0(%arg0: i32) -> (i32, i32) {
    %c0_i32 = arith.constant 0 : i32
    %c0_i32_0 = arith.constant 0 : i32
    return %arg0, %c0_i32 : i32, i32
  }
  func.func @transform_1(%arg0: i32) -> (i32, i32) {
    %c0_i32 = arith.constant 0 : i32
    %c0_i32_0 = arith.constant 0 : i32
    %c0_i32_1 = arith.constant 0 : i32
    return %c0_i32, %c0_i32_0 : i32, i32
  }
  func.func @transform_2(%arg0: i32) -> (i32, i32) {
    %c0_i32 = arith.constant 0 : i32
    %c0_i32_0 = arith.constant 0 : i32
    %c0_i32_1 = arith.constant 0 : i32
    return %c0_i32, %c0_i32_0 : i32, i32
  }
  func.func @transform_3(%arg0: i32) -> (i32, i32) {
    %c0_i32 = arith.constant 0 : i32
    %c0_i32_0 = arith.constant 0 : i32
    return %arg0, %c0_i32 : i32, i32
  }
}

module attributes {stable_mosaic.version = 11 : i64} {
  func.func @_conv_band_kernel(%arg0: i32, %arg1: i32, %arg2: memref<1x3x8x16xbf16, #tpu.memory_space<vmem>>, %arg3: memref<2x16x128xbf16, #tpu.memory_space<vmem>>, %arg4: memref<1x128xf32, #tpu.memory_space<vmem>>, %arg5: memref<1x1x8x128xbf16, #tpu.memory_space<vmem>>, %arg6: memref<1x1x1x128xf32, #tpu.memory_space<vmem>>, %arg7: memref<1x1x1x128xf32, #tpu.memory_space<vmem>>) attributes {dimension_semantics = [#tpu.dimension_semantics<parallel>, #tpu.dimension_semantics<parallel>], iteration_bounds = array<i64: 2, 2>, scalar_prefetch = 0 : i64, scratch_operands = 0 : i64, tpu.core_type = #tpu.core_type<tc>, window_params = [{transform_indices = @transform_0, window_bounds = array<i64: 1, 3, 8, 16>}, {pipeline_mode = #tpu.pipeline_mode<synchronous>, transform_indices = @transform_1, window_bounds = array<i64: 2, 16, 128>}, {pipeline_mode = #tpu.pipeline_mode<synchronous>, transform_indices = @transform_2, window_bounds = array<i64: 1, 128>}, {transform_indices = @transform_3, window_bounds = array<i64: 1, 1, 8, 128>}, {transform_indices = @transform_4, window_bounds = array<i64: 1, 1, 1, 128>}, {transform_indices = @transform_5, window_bounds = array<i64: 1, 1, 1, 128>}]} {
    %cst = arith.constant 0.000000e+00 : f32
    %0 = vector.broadcast %cst : f32 to vector<8x128xf32>
    %c0_i32 = arith.constant 0 : i32
    %1 = arith.addi %arg1, %c0_i32 : i32
    %c0 = arith.constant 0 : index
    %2 = arith.index_cast %1 : i32 to index
    %c0_0 = arith.constant 0 : index
    %c0_1 = arith.constant 0 : index
    %3 = vector.load %arg2[%c0, %2, %c0_0, %c0_1] : memref<1x3x8x16xbf16, #tpu.memory_space<vmem>>, vector<1x1x8x16xbf16>
    %4 = vector.shape_cast %3 : vector<1x1x8x16xbf16> to vector<1x8x16xbf16>
    %5 = vector.shape_cast %4 : vector<1x8x16xbf16> to vector<8x16xbf16>
    %c0_2 = arith.constant 0 : index
    %c0_3 = arith.constant 0 : index
    %c0_4 = arith.constant 0 : index
    %6 = vector.load %arg3[%c0_2, %c0_3, %c0_4] : memref<2x16x128xbf16, #tpu.memory_space<vmem>>, vector<1x16x128xbf16>
    %7 = vector.shape_cast %6 : vector<1x16x128xbf16> to vector<16x128xbf16>
    %cst_5 = arith.constant dense<0.000000e+00> : vector<8x128xf32>
    %8 = tpu.matmul %5, %7, %cst_5 {dimension_numbers = #tpu.dot_dimension_numbers<[1], [0], [0], [1], [0, 0, 1, 1], [], []>} : vector<8x16xbf16>, vector<16x128xbf16>, vector<8x128xf32> -> vector<8x128xf32>
    %9 = arith.addf %0, %8 : vector<8x128xf32>
    %c1_i32 = arith.constant 1 : i32
    %10 = arith.addi %arg1, %c1_i32 : i32
    %c0_6 = arith.constant 0 : index
    %11 = arith.index_cast %10 : i32 to index
    %c0_7 = arith.constant 0 : index
    %c0_8 = arith.constant 0 : index
    %12 = vector.load %arg2[%c0_6, %11, %c0_7, %c0_8] : memref<1x3x8x16xbf16, #tpu.memory_space<vmem>>, vector<1x1x8x16xbf16>
    %13 = vector.shape_cast %12 : vector<1x1x8x16xbf16> to vector<1x8x16xbf16>
    %14 = vector.shape_cast %13 : vector<1x8x16xbf16> to vector<8x16xbf16>
    %c1 = arith.constant 1 : index
    %c0_9 = arith.constant 0 : index
    %c0_10 = arith.constant 0 : index
    %15 = vector.load %arg3[%c1, %c0_9, %c0_10] : memref<2x16x128xbf16, #tpu.memory_space<vmem>>, vector<1x16x128xbf16>
    %16 = vector.shape_cast %15 : vector<1x16x128xbf16> to vector<16x128xbf16>
    %cst_11 = arith.constant dense<0.000000e+00> : vector<8x128xf32>
    %17 = tpu.matmul %14, %16, %cst_11 {dimension_numbers = #tpu.dot_dimension_numbers<[1], [0], [0], [1], [0, 0, 1, 1], [], []>} : vector<8x16xbf16>, vector<16x128xbf16>, vector<8x128xf32> -> vector<8x128xf32>
    %18 = arith.addf %9, %17 : vector<8x128xf32>
    %c0_12 = arith.constant 0 : index
    %c0_13 = arith.constant 0 : index
    %19 = vector.load %arg4[%c0_12, %c0_13] : memref<1x128xf32, #tpu.memory_space<vmem>>, vector<1x128xf32>
    %20 = vector.broadcast %19 : vector<1x128xf32> to vector<8x128xf32>
    %21 = arith.addf %18, %20 : vector<8x128xf32>
    %22 = arith.truncf %21 : vector<8x128xf32> to vector<8x128xbf16>
    %c0_14 = arith.constant 0 : index
    %c0_15 = arith.constant 0 : index
    %c0_16 = arith.constant 0 : index
    %c0_17 = arith.constant 0 : index
    %23 = vector.load %arg5[%c0_14, %c0_15, %c0_16, %c0_17] : memref<1x1x8x128xbf16, #tpu.memory_space<vmem>>, vector<1x1x8x128xbf16>
    %24 = vector.shape_cast %23 : vector<1x1x8x128xbf16> to vector<8x128xbf16>
    %25 = vector.shape_cast %22 : vector<8x128xbf16> to vector<1x1x8x128xbf16>
    tpu.vector_store %arg5[%c0_14, %c0_15, %c0_16, %c0_17], %25 {strides = array<i32>} : memref<1x1x8x128xbf16, #tpu.memory_space<vmem>>, vector<1x1x8x128xbf16>,
    %cst_18 = arith.constant dense<0.000000e+00> : vector<128xf32>
    %26 = vector.multi_reduction <add>, %21, %cst_18 [0] : vector<8x128xf32> to vector<128xf32>
    %27 = vector.shape_cast %26 : vector<128xf32> to vector<1x128xf32>
    %c0_19 = arith.constant 0 : index
    %c0_20 = arith.constant 0 : index
    %c0_21 = arith.constant 0 : index
    %c0_22 = arith.constant 0 : index
    %28 = vector.load %arg6[%c0_19, %c0_20, %c0_21, %c0_22] : memref<1x1x1x128xf32, #tpu.memory_space<vmem>>, vector<1x1x1x128xf32>
    %29 = vector.shape_cast %28 : vector<1x1x1x128xf32> to vector<1x128xf32>
    %30 = vector.shape_cast %27 : vector<1x128xf32> to vector<1x1x1x128xf32>
    tpu.vector_store %arg6[%c0_19, %c0_20, %c0_21, %c0_22], %30 {strides = array<i32>} : memref<1x1x1x128xf32, #tpu.memory_space<vmem>>, vector<1x1x1x128xf32>,
    %31 = arith.mulf %21, %21 : vector<8x128xf32>
    %cst_23 = arith.constant dense<0.000000e+00> : vector<128xf32>
    %32 = vector.multi_reduction <add>, %31, %cst_23 [0] : vector<8x128xf32> to vector<128xf32>
    %33 = vector.shape_cast %32 : vector<128xf32> to vector<1x128xf32>
    %c0_24 = arith.constant 0 : index
    %c0_25 = arith.constant 0 : index
    %c0_26 = arith.constant 0 : index
    %c0_27 = arith.constant 0 : index
    %34 = vector.load %arg7[%c0_24, %c0_25, %c0_26, %c0_27] : memref<1x1x1x128xf32, #tpu.memory_space<vmem>>, vector<1x1x1x128xf32>
    %35 = vector.shape_cast %34 : vector<1x1x1x128xf32> to vector<1x128xf32>
    %36 = vector.shape_cast %33 : vector<1x128xf32> to vector<1x1x1x128xf32>
    tpu.vector_store %arg7[%c0_24, %c0_25, %c0_26, %c0_27], %36 {strides = array<i32>} : memref<1x1x1x128xf32, #tpu.memory_space<vmem>>, vector<1x1x1x128xf32>,
    return
  }
  func.func @transform_0(%arg0: i32, %arg1: i32) -> (i32, i32, i32, i32) {
    %c0_i32 = arith.constant 0 : i32
    %c0_i32_0 = arith.constant 0 : i32
    %c0_i32_1 = arith.constant 0 : i32
    %c0_i32_2 = arith.constant 0 : i32
    return %arg0, %c0_i32, %c0_i32_0, %c0_i32_1 : i32, i32, i32, i32
  }
  func.func @transform_1(%arg0: i32, %arg1: i32) -> (i32, i32, i32) {
    %c0_i32 = arith.constant 0 : i32
    %c0_i32_0 = arith.constant 0 : i32
    %c0_i32_1 = arith.constant 0 : i32
    %c0_i32_2 = arith.constant 0 : i32
    return %c0_i32, %c0_i32_0, %c0_i32_1 : i32, i32, i32
  }
  func.func @transform_2(%arg0: i32, %arg1: i32) -> (i32, i32) {
    %c0_i32 = arith.constant 0 : i32
    %c0_i32_0 = arith.constant 0 : i32
    %c0_i32_1 = arith.constant 0 : i32
    return %c0_i32, %c0_i32_0 : i32, i32
  }
  func.func @transform_3(%arg0: i32, %arg1: i32) -> (i32, i32, i32, i32) {
    %c0_i32 = arith.constant 0 : i32
    %c0_i32_0 = arith.constant 0 : i32
    %c0_i32_1 = arith.constant 0 : i32
    return %arg0, %arg1, %c0_i32, %c0_i32_0 : i32, i32, i32, i32
  }
  func.func @transform_4(%arg0: i32, %arg1: i32) -> (i32, i32, i32, i32) {
    %c0_i32 = arith.constant 0 : i32
    %c0_i32_0 = arith.constant 0 : i32
    %c0_i32_1 = arith.constant 0 : i32
    return %arg0, %arg1, %c0_i32, %c0_i32_0 : i32, i32, i32, i32
  }
  func.func @transform_5(%arg0: i32, %arg1: i32) -> (i32, i32, i32, i32) {
    %c0_i32 = arith.constant 0 : i32
    %c0_i32_0 = arith.constant 0 : i32
    %c0_i32_1 = arith.constant 0 : i32
    return %arg0, %arg1, %c0_i32, %c0_i32_0 : i32, i32, i32, i32
  }
}

module attributes {stable_mosaic.version = 11 : i64} {
  func.func @_affine_lrelu_kernel(%arg0: i32, %arg1: memref<32x128xbf16, #tpu.memory_space<vmem>>, %arg2: memref<1x128xf32, #tpu.memory_space<vmem>>, %arg3: memref<1x128xf32, #tpu.memory_space<vmem>>, %arg4: memref<32x128xbf16, #tpu.memory_space<vmem>>) attributes {dimension_semantics = [#tpu.dimension_semantics<parallel>], iteration_bounds = array<i64: 1>, scalar_prefetch = 0 : i64, scratch_operands = 0 : i64, tpu.core_type = #tpu.core_type<tc>, window_params = [{transform_indices = @transform_0, window_bounds = array<i64: 32, 128>}, {pipeline_mode = #tpu.pipeline_mode<synchronous>, transform_indices = @transform_1, window_bounds = array<i64: 1, 128>}, {pipeline_mode = #tpu.pipeline_mode<synchronous>, transform_indices = @transform_2, window_bounds = array<i64: 1, 128>}, {transform_indices = @transform_3, window_bounds = array<i64: 32, 128>}]} {
    %c0 = arith.constant 0 : index
    %c0_0 = arith.constant 0 : index
    %0 = vector.load %arg1[%c0, %c0_0] : memref<32x128xbf16, #tpu.memory_space<vmem>>, vector<32x128xbf16>
    %1 = arith.extf %0 : vector<32x128xbf16> to vector<32x128xf32>
    %c0_1 = arith.constant 0 : index
    %c0_2 = arith.constant 0 : index
    %2 = vector.load %arg2[%c0_1, %c0_2] : memref<1x128xf32, #tpu.memory_space<vmem>>, vector<1x128xf32>
    %3 = vector.broadcast %2 : vector<1x128xf32> to vector<32x128xf32>
    %4 = arith.mulf %1, %3 : vector<32x128xf32>
    %c0_3 = arith.constant 0 : index
    %c0_4 = arith.constant 0 : index
    %5 = vector.load %arg3[%c0_3, %c0_4] : memref<1x128xf32, #tpu.memory_space<vmem>>, vector<1x128xf32>
    %6 = vector.broadcast %5 : vector<1x128xf32> to vector<32x128xf32>
    %7 = arith.addf %4, %6 : vector<32x128xf32>
    %cst = arith.constant 0.000000e+00 : f32
    %8 = vector.broadcast %cst : f32 to vector<32x128xf32>
    %9 = arith.cmpf oge, %7, %8 : vector<32x128xf32>
    %cst_5 = arith.constant 0.00999999977 : f32
    %10 = vector.broadcast %cst_5 : f32 to vector<32x128xf32>
    %11 = arith.mulf %10, %7 : vector<32x128xf32>
    %12 = arith.select %9, %7, %11 : vector<32x128xi1>, vector<32x128xf32>
    %13 = arith.truncf %12 : vector<32x128xf32> to vector<32x128xbf16>
    %c0_6 = arith.constant 0 : index
    %c0_7 = arith.constant 0 : index
    %14 = vector.load %arg4[%c0_6, %c0_7] : memref<32x128xbf16, #tpu.memory_space<vmem>>, vector<32x128xbf16>
    tpu.vector_store %arg4[%c0_6, %c0_7], %13 {strides = array<i32>} : memref<32x128xbf16, #tpu.memory_space<vmem>>, vector<32x128xbf16>,
    return
  }
  func.func @transform_0(%arg0: i32) -> (i32, i32) {
    %c0_i32 = arith.constant 0 : i32
    %c0_i32_0 = arith.constant 0 : i32
    return %arg0, %c0_i32 : i32, i32
  }
  func.func @transform_1(%arg0: i32) -> (i32, i32) {
    %c0_i32 = arith.constant 0 : i32
    %c0_i32_0 = arith.constant 0 : i32
    %c0_i32_1 = arith.constant 0 : i32
    return %c0_i32, %c0_i32_0 : i32, i32
  }
  func.func @transform_2(%arg0: i32) -> (i32, i32) {
    %c0_i32 = arith.constant 0 : i32
    %c0_i32_0 = arith.constant 0 : i32
    %c0_i32_1 = arith.constant 0 : i32
    return %c0_i32, %c0_i32_0 : i32, i32
  }
  func.func @transform_3(%arg0: i32) -> (i32, i32) {
    %c0_i32 = arith.constant 0 : i32
    %c0_i32_0 = arith.constant 0 : i32
    return %arg0, %c0_i32 : i32, i32
  }
}

module attributes {stable_mosaic.version = 11 : i64} {
  func.func @_conv_band_kernel(%arg0: i32, %arg1: i32, %arg2: memref<1x5x10x160xbf16, #tpu.memory_space<vmem>>, %arg3: memref<9x160x128xbf16, #tpu.memory_space<vmem>>, %arg4: memref<1x128xf32, #tpu.memory_space<vmem>>, %arg5: memref<1x1x8x128xbf16, #tpu.memory_space<vmem>>, %arg6: memref<1x1x1x128xf32, #tpu.memory_space<vmem>>, %arg7: memref<1x1x1x128xf32, #tpu.memory_space<vmem>>) attributes {dimension_semantics = [#tpu.dimension_semantics<parallel>, #tpu.dimension_semantics<parallel>], iteration_bounds = array<i64: 2, 3>, scalar_prefetch = 0 : i64, scratch_operands = 0 : i64, tpu.core_type = #tpu.core_type<tc>, window_params = [{transform_indices = @transform_0, window_bounds = array<i64: 1, 5, 10, 160>}, {pipeline_mode = #tpu.pipeline_mode<synchronous>, transform_indices = @transform_1, window_bounds = array<i64: 9, 160, 128>}, {pipeline_mode = #tpu.pipeline_mode<synchronous>, transform_indices = @transform_2, window_bounds = array<i64: 1, 128>}, {transform_indices = @transform_3, window_bounds = array<i64: 1, 1, 8, 128>}, {transform_indices = @transform_4, window_bounds = array<i64: 1, 1, 1, 128>}, {transform_indices = @transform_5, window_bounds = array<i64: 1, 1, 1, 128>}]} {
    %cst = arith.constant 0.000000e+00 : f32
    %0 = vector.broadcast %cst : f32 to vector<8x128xf32>
    %c0_i32 = arith.constant 0 : i32
    %1 = arith.addi %arg1, %c0_i32 : i32
    %c0 = arith.constant 0 : index
    %2 = arith.index_cast %1 : i32 to index
    %c0_0 = arith.constant 0 : index
    %c0_1 = arith.constant 0 : index
    %3 = vector.load %arg2[%c0, %2, %c0_0, %c0_1] : memref<1x5x10x160xbf16, #tpu.memory_space<vmem>>, vector<1x1x8x160xbf16>
    %4 = vector.shape_cast %3 : vector<1x1x8x160xbf16> to vector<1x8x160xbf16>
    %5 = vector.shape_cast %4 : vector<1x8x160xbf16> to vector<8x160xbf16>
    %c0_2 = arith.constant 0 : index
    %c0_3 = arith.constant 0 : index
    %c0_4 = arith.constant 0 : index
    %6 = vector.load %arg3[%c0_2, %c0_3, %c0_4] : memref<9x160x128xbf16, #tpu.memory_space<vmem>>, vector<1x160x128xbf16>
    %7 = vector.shape_cast %6 : vector<1x160x128xbf16> to vector<160x128xbf16>
    %cst_5 = arith.constant dense<0.000000e+00> : vector<8x128xf32>
    %8 = tpu.matmul %5, %7, %cst_5 {dimension_numbers = #tpu.dot_dimension_numbers<[1], [0], [0], [1], [0, 0, 1, 1], [], []>} : vector<8x160xbf16>, vector<160x128xbf16>, vector<8x128xf32> -> vector<8x128xf32>
    %9 = arith.addf %0, %8 : vector<8x128xf32>
    %c0_i32_6 = arith.constant 0 : i32
    %10 = arith.addi %arg1, %c0_i32_6 : i32
    %c0_7 = arith.constant 0 : index
    %11 = arith.index_cast %10 : i32 to index
    %c1 = arith.constant 1 : index
    %c0_8 = arith.constant 0 : index
    %12 = vector.load %arg2[%c0_7, %11, %c1, %c0_8] : memref<1x5x10x160xbf16, #tpu.memory_space<vmem>>, vector<1x1x8x160xbf16>
    %13 = vector.shape_cast %12 : vector<1x1x8x160xbf16> to vector<1x8x160xbf16>
    %14 = vector.shape_cast %13 : vector<1x8x160xbf16> to vector<8x160xbf16>
    %c1_9 = arith.constant 1 : index
    %c0_10 = arith.constant 0 : index
    %c0_11 = arith.constant 0 : index
    %15 = vector.load %arg3[%c1_9, %c0_10, %c0_11] : memref<9x160x128xbf16, #tpu.memory_space<vmem>>, vector<1x160x128xbf16>
    %16 = vector.shape_cast %15 : vector<1x160x128xbf16> to vector<160x128xbf16>
    %cst_12 = arith.constant dense<0.000000e+00> : vector<8x128xf32>
    %17 = tpu.matmul %14, %16, %cst_12 {dimension_numbers = #tpu.dot_dimension_numbers<[1], [0], [0], [1], [0, 0, 1, 1], [], []>} : vector<8x160xbf16>, vector<160x128xbf16>, vector<8x128xf32> -> vector<8x128xf32>
    %18 = arith.addf %9, %17 : vector<8x128xf32>
    %c0_i32_13 = arith.constant 0 : i32
    %19 = arith.addi %arg1, %c0_i32_13 : i32
    %c0_14 = arith.constant 0 : index
    %20 = arith.index_cast %19 : i32 to index
    %c2 = arith.constant 2 : index
    %c0_15 = arith.constant 0 : index
    %21 = vector.load %arg2[%c0_14, %20, %c2, %c0_15] : memref<1x5x10x160xbf16, #tpu.memory_space<vmem>>, vector<1x1x8x160xbf16>
    %22 = vector.shape_cast %21 : vector<1x1x8x160xbf16> to vector<1x8x160xbf16>
    %23 = vector.shape_cast %22 : vector<1x8x160xbf16> to vector<8x160xbf16>
    %c2_16 = arith.constant 2 : index
    %c0_17 = arith.constant 0 : index
    %c0_18 = arith.constant 0 : index
    %24 = vector.load %arg3[%c2_16, %c0_17, %c0_18] : memref<9x160x128xbf16, #tpu.memory_space<vmem>>, vector<1x160x128xbf16>
    %25 = vector.shape_cast %24 : vector<1x160x128xbf16> to vector<160x128xbf16>
    %cst_19 = arith.constant dense<0.000000e+00> : vector<8x128xf32>
    %26 = tpu.matmul %23, %25, %cst_19 {dimension_numbers = #tpu.dot_dimension_numbers<[1], [0], [0], [1], [0, 0, 1, 1], [], []>} : vector<8x160xbf16>, vector<160x128xbf16>, vector<8x128xf32> -> vector<8x128xf32>
    %27 = arith.addf %18, %26 : vector<8x128xf32>
    %c1_i32 = arith.constant 1 : i32
    %28 = arith.addi %arg1, %c1_i32 : i32
    %c0_20 = arith.constant 0 : index
    %29 = arith.index_cast %28 : i32 to index
    %c0_21 = arith.constant 0 : index
    %c0_22 = arith.constant 0 : index
    %30 = vector.load %arg2[%c0_20, %29, %c0_21, %c0_22] : memref<1x5x10x160xbf16, #tpu.memory_space<vmem>>, vector<1x1x8x160xbf16>
    %31 = vector.shape_cast %30 : vector<1x1x8x160xbf16> to vector<1x8x160xbf16>
    %32 = vector.shape_cast %31 : vector<1x8x160xbf16> to vector<8x160xbf16>
    %c3 = arith.constant 3 : index
    %c0_23 = arith.constant 0 : index
    %c0_24 = arith.constant 0 : index
    %33 = vector.load %arg3[%c3, %c0_23, %c0_24] : memref<9x160x128xbf16, #tpu.memory_space<vmem>>, vector<1x160x128xbf16>
    %34 = vector.shape_cast %33 : vector<1x160x128xbf16> to vector<160x128xbf16>
    %cst_25 = arith.constant dense<0.000000e+00> : vector<8x128xf32>
    %35 = tpu.matmul %32, %34, %cst_25 {dimension_numbers = #tpu.dot_dimension_numbers<[1], [0], [0], [1], [0, 0, 1, 1], [], []>} : vector<8x160xbf16>, vector<160x128xbf16>, vector<8x128xf32> -> vector<8x128xf32>
    %36 = arith.addf %27, %35 : vector<8x128xf32>
    %c1_i32_26 = arith.constant 1 : i32
    %37 = arith.addi %arg1, %c1_i32_26 : i32
    %c0_27 = arith.constant 0 : index
    %38 = arith.index_cast %37 : i32 to index
    %c1_28 = arith.constant 1 : index
    %c0_29 = arith.constant 0 : index
    %39 = vector.load %arg2[%c0_27, %38, %c1_28, %c0_29] : memref<1x5x10x160xbf16, #tpu.memory_space<vmem>>, vector<1x1x8x160xbf16>
    %40 = vector.shape_cast %39 : vector<1x1x8x160xbf16> to vector<1x8x160xbf16>
    %41 = vector.shape_cast %40 : vector<1x8x160xbf16> to vector<8x160xbf16>
    %c4 = arith.constant 4 : index
    %c0_30 = arith.constant 0 : index
    %c0_31 = arith.constant 0 : index
    %42 = vector.load %arg3[%c4, %c0_30, %c0_31] : memref<9x160x128xbf16, #tpu.memory_space<vmem>>, vector<1x160x128xbf16>
    %43 = vector.shape_cast %42 : vector<1x160x128xbf16> to vector<160x128xbf16>
    %cst_32 = arith.constant dense<0.000000e+00> : vector<8x128xf32>
    %44 = tpu.matmul %41, %43, %cst_32 {dimension_numbers = #tpu.dot_dimension_numbers<[1], [0], [0], [1], [0, 0, 1, 1], [], []>} : vector<8x160xbf16>, vector<160x128xbf16>, vector<8x128xf32> -> vector<8x128xf32>
    %45 = arith.addf %36, %44 : vector<8x128xf32>
    %c1_i32_33 = arith.constant 1 : i32
    %46 = arith.addi %arg1, %c1_i32_33 : i32
    %c0_34 = arith.constant 0 : index
    %47 = arith.index_cast %46 : i32 to index
    %c2_35 = arith.constant 2 : index
    %c0_36 = arith.constant 0 : index
    %48 = vector.load %arg2[%c0_34, %47, %c2_35, %c0_36] : memref<1x5x10x160xbf16, #tpu.memory_space<vmem>>, vector<1x1x8x160xbf16>
    %49 = vector.shape_cast %48 : vector<1x1x8x160xbf16> to vector<1x8x160xbf16>
    %50 = vector.shape_cast %49 : vector<1x8x160xbf16> to vector<8x160xbf16>
    %c5 = arith.constant 5 : index
    %c0_37 = arith.constant 0 : index
    %c0_38 = arith.constant 0 : index
    %51 = vector.load %arg3[%c5, %c0_37, %c0_38] : memref<9x160x128xbf16, #tpu.memory_space<vmem>>, vector<1x160x128xbf16>
    %52 = vector.shape_cast %51 : vector<1x160x128xbf16> to vector<160x128xbf16>
    %cst_39 = arith.constant dense<0.000000e+00> : vector<8x128xf32>
    %53 = tpu.matmul %50, %52, %cst_39 {dimension_numbers = #tpu.dot_dimension_numbers<[1], [0], [0], [1], [0, 0, 1, 1], [], []>} : vector<8x160xbf16>, vector<160x128xbf16>, vector<8x128xf32> -> vector<8x128xf32>
    %54 = arith.addf %45, %53 : vector<8x128xf32>
    %c2_i32 = arith.constant 2 : i32
    %55 = arith.addi %arg1, %c2_i32 : i32
    %c0_40 = arith.constant 0 : index
    %56 = arith.index_cast %55 : i32 to index
    %c0_41 = arith.constant 0 : index
    %c0_42 = arith.constant 0 : index
    %57 = vector.load %arg2[%c0_40, %56, %c0_41, %c0_42] : memref<1x5x10x160xbf16, #tpu.memory_space<vmem>>, vector<1x1x8x160xbf16>
    %58 = vector.shape_cast %57 : vector<1x1x8x160xbf16> to vector<1x8x160xbf16>
    %59 = vector.shape_cast %58 : vector<1x8x160xbf16> to vector<8x160xbf16>
    %c6 = arith.constant 6 : index
    %c0_43 = arith.constant 0 : index
    %c0_44 = arith.constant 0 : index
    %60 = vector.load %arg3[%c6, %c0_43, %c0_44] : memref<9x160x128xbf16, #tpu.memory_space<vmem>>, vector<1x160x128xbf16>
    %61 = vector.shape_cast %60 : vector<1x160x128xbf16> to vector<160x128xbf16>
    %cst_45 = arith.constant dense<0.000000e+00> : vector<8x128xf32>
    %62 = tpu.matmul %59, %61, %cst_45 {dimension_numbers = #tpu.dot_dimension_numbers<[1], [0], [0], [1], [0, 0, 1, 1], [], []>} : vector<8x160xbf16>, vector<160x128xbf16>, vector<8x128xf32> -> vector<8x128xf32>
    %63 = arith.addf %54, %62 : vector<8x128xf32>
    %c2_i32_46 = arith.constant 2 : i32
    %64 = arith.addi %arg1, %c2_i32_46 : i32
    %c0_47 = arith.constant 0 : index
    %65 = arith.index_cast %64 : i32 to index
    %c1_48 = arith.constant 1 : index
    %c0_49 = arith.constant 0 : index
    %66 = vector.load %arg2[%c0_47, %65, %c1_48, %c0_49] : memref<1x5x10x160xbf16, #tpu.memory_space<vmem>>, vector<1x1x8x160xbf16>
    %67 = vector.shape_cast %66 : vector<1x1x8x160xbf16> to vector<1x8x160xbf16>
    %68 = vector.shape_cast %67 : vector<1x8x160xbf16> to vector<8x160xbf16>
    %c7 = arith.constant 7 : index
    %c0_50 = arith.constant 0 : index
    %c0_51 = arith.constant 0 : index
    %69 = vector.load %arg3[%c7, %c0_50, %c0_51] : memref<9x160x128xbf16, #tpu.memory_space<vmem>>, vector<1x160x128xbf16>
    %70 = vector.shape_cast %69 : vector<1x160x128xbf16> to vector<160x128xbf16>
    %cst_52 = arith.constant dense<0.000000e+00> : vector<8x128xf32>
    %71 = tpu.matmul %68, %70, %cst_52 {dimension_numbers = #tpu.dot_dimension_numbers<[1], [0], [0], [1], [0, 0, 1, 1], [], []>} : vector<8x160xbf16>, vector<160x128xbf16>, vector<8x128xf32> -> vector<8x128xf32>
    %72 = arith.addf %63, %71 : vector<8x128xf32>
    %c2_i32_53 = arith.constant 2 : i32
    %73 = arith.addi %arg1, %c2_i32_53 : i32
    %c0_54 = arith.constant 0 : index
    %74 = arith.index_cast %73 : i32 to index
    %c2_55 = arith.constant 2 : index
    %c0_56 = arith.constant 0 : index
    %75 = vector.load %arg2[%c0_54, %74, %c2_55, %c0_56] : memref<1x5x10x160xbf16, #tpu.memory_space<vmem>>, vector<1x1x8x160xbf16>
    %76 = vector.shape_cast %75 : vector<1x1x8x160xbf16> to vector<1x8x160xbf16>
    %77 = vector.shape_cast %76 : vector<1x8x160xbf16> to vector<8x160xbf16>
    %c8 = arith.constant 8 : index
    %c0_57 = arith.constant 0 : index
    %c0_58 = arith.constant 0 : index
    %78 = vector.load %arg3[%c8, %c0_57, %c0_58] : memref<9x160x128xbf16, #tpu.memory_space<vmem>>, vector<1x160x128xbf16>
    %79 = vector.shape_cast %78 : vector<1x160x128xbf16> to vector<160x128xbf16>
    %cst_59 = arith.constant dense<0.000000e+00> : vector<8x128xf32>
    %80 = tpu.matmul %77, %79, %cst_59 {dimension_numbers = #tpu.dot_dimension_numbers<[1], [0], [0], [1], [0, 0, 1, 1], [], []>} : vector<8x160xbf16>, vector<160x128xbf16>, vector<8x128xf32> -> vector<8x128xf32>
    %81 = arith.addf %72, %80 : vector<8x128xf32>
    %c0_60 = arith.constant 0 : index
    %c0_61 = arith.constant 0 : index
    %82 = vector.load %arg4[%c0_60, %c0_61] : memref<1x128xf32, #tpu.memory_space<vmem>>, vector<1x128xf32>
    %83 = vector.broadcast %82 : vector<1x128xf32> to vector<8x128xf32>
    %84 = arith.addf %81, %83 : vector<8x128xf32>
    %85 = arith.truncf %84 : vector<8x128xf32> to vector<8x128xbf16>
    %c0_62 = arith.constant 0 : index
    %c0_63 = arith.constant 0 : index
    %c0_64 = arith.constant 0 : index
    %c0_65 = arith.constant 0 : index
    %86 = vector.load %arg5[%c0_62, %c0_63, %c0_64, %c0_65] : memref<1x1x8x128xbf16, #tpu.memory_space<vmem>>, vector<1x1x8x128xbf16>
    %87 = vector.shape_cast %86 : vector<1x1x8x128xbf16> to vector<8x128xbf16>
    %88 = vector.shape_cast %85 : vector<8x128xbf16> to vector<1x1x8x128xbf16>
    tpu.vector_store %arg5[%c0_62, %c0_63, %c0_64, %c0_65], %88 {strides = array<i32>} : memref<1x1x8x128xbf16, #tpu.memory_space<vmem>>, vector<1x1x8x128xbf16>,
    %cst_66 = arith.constant dense<0.000000e+00> : vector<128xf32>
    %89 = vector.multi_reduction <add>, %84, %cst_66 [0] : vector<8x128xf32> to vector<128xf32>
    %90 = vector.shape_cast %89 : vector<128xf32> to vector<1x128xf32>
    %c0_67 = arith.constant 0 : index
    %c0_68 = arith.constant 0 : index
    %c0_69 = arith.constant 0 : index
    %c0_70 = arith.constant 0 : index
    %91 = vector.load %arg6[%c0_67, %c0_68, %c0_69, %c0_70] : memref<1x1x1x128xf32, #tpu.memory_space<vmem>>, vector<1x1x1x128xf32>
    %92 = vector.shape_cast %91 : vector<1x1x1x128xf32> to vector<1x128xf32>
    %93 = vector.shape_cast %90 : vector<1x128xf32> to vector<1x1x1x128xf32>
    tpu.vector_store %arg6[%c0_67, %c0_68, %c0_69, %c0_70], %93 {strides = array<i32>} : memref<1x1x1x128xf32, #tpu.memory_space<vmem>>, vector<1x1x1x128xf32>,
    %94 = arith.mulf %84, %84 : vector<8x128xf32>
    %cst_71 = arith.constant dense<0.000000e+00> : vector<128xf32>
    %95 = vector.multi_reduction <add>, %94, %cst_71 [0] : vector<8x128xf32> to vector<128xf32>
    %96 = vector.shape_cast %95 : vector<128xf32> to vector<1x128xf32>
    %c0_72 = arith.constant 0 : index
    %c0_73 = arith.constant 0 : index
    %c0_74 = arith.constant 0 : index
    %c0_75 = arith.constant 0 : index
    %97 = vector.load %arg7[%c0_72, %c0_73, %c0_74, %c0_75] : memref<1x1x1x128xf32, #tpu.memory_space<vmem>>, vector<1x1x1x128xf32>
    %98 = vector.shape_cast %97 : vector<1x1x1x128xf32> to vector<1x128xf32>
    %99 = vector.shape_cast %96 : vector<1x128xf32> to vector<1x1x1x128xf32>
    tpu.vector_store %arg7[%c0_72, %c0_73, %c0_74, %c0_75], %99 {strides = array<i32>} : memref<1x1x1x128xf32, #tpu.memory_space<vmem>>, vector<1x1x1x128xf32>,
    return
  }
  func.func @transform_0(%arg0: i32, %arg1: i32) -> (i32, i32, i32, i32) {
    %c0_i32 = arith.constant 0 : i32
    %c0_i32_0 = arith.constant 0 : i32
    %c0_i32_1 = arith.constant 0 : i32
    %c0_i32_2 = arith.constant 0 : i32
    return %arg0, %c0_i32, %c0_i32_0, %c0_i32_1 : i32, i32, i32, i32
  }
  func.func @transform_1(%arg0: i32, %arg1: i32) -> (i32, i32, i32) {
    %c0_i32 = arith.constant 0 : i32
    %c0_i32_0 = arith.constant 0 : i32
    %c0_i32_1 = arith.constant 0 : i32
    %c0_i32_2 = arith.constant 0 : i32
    return %c0_i32, %c0_i32_0, %c0_i32_1 : i32, i32, i32
  }
  func.func @transform_2(%arg0: i32, %arg1: i32) -> (i32, i32) {
    %c0_i32 = arith.constant 0 : i32
    %c0_i32_0 = arith.constant 0 : i32
    %c0_i32_1 = arith.constant 0 : i32
    return %c0_i32, %c0_i32_0 : i32, i32
  }
  func.func @transform_3(%arg0: i32, %arg1: i32) -> (i32, i32, i32, i32) {
    %c0_i32 = arith.constant 0 : i32
    %c0_i32_0 = arith.constant 0 : i32
    %c0_i32_1 = arith.constant 0 : i32
    return %arg0, %arg1, %c0_i32, %c0_i32_0 : i32, i32, i32, i32
  }
  func.func @transform_4(%arg0: i32, %arg1: i32) -> (i32, i32, i32, i32) {
    %c0_i32 = arith.constant 0 : i32
    %c0_i32_0 = arith.constant 0 : i32
    %c0_i32_1 = arith.constant 0 : i32
    return %arg0, %arg1, %c0_i32, %c0_i32_0 : i32, i32, i32, i32
  }
  func.func @transform_5(%arg0: i32, %arg1: i32) -> (i32, i32, i32, i32) {
    %c0_i32 = arith.constant 0 : i32
    %c0_i32_0 = arith.constant 0 : i32
    %c0_i32_1 = arith.constant 0 : i32
    return %arg0, %arg1, %c0_i32, %c0_i32_0 : i32, i32, i32, i32
  }
}

module attributes {stable_mosaic.version = 11 : i64} {
  func.func @_conv_band_kernel(%arg0: i32, %arg1: i32, %arg2: memref<1x3x8x128xbf16, #tpu.memory_space<vmem>>, %arg3: memref<2x128x128xbf16, #tpu.memory_space<vmem>>, %arg4: memref<1x128xf32, #tpu.memory_space<vmem>>, %arg5: memref<1x1x8x128xbf16, #tpu.memory_space<vmem>>, %arg6: memref<1x1x1x128xf32, #tpu.memory_space<vmem>>, %arg7: memref<1x1x1x128xf32, #tpu.memory_space<vmem>>) attributes {dimension_semantics = [#tpu.dimension_semantics<parallel>, #tpu.dimension_semantics<parallel>], iteration_bounds = array<i64: 2, 2>, scalar_prefetch = 0 : i64, scratch_operands = 0 : i64, tpu.core_type = #tpu.core_type<tc>, window_params = [{transform_indices = @transform_0, window_bounds = array<i64: 1, 3, 8, 128>}, {pipeline_mode = #tpu.pipeline_mode<synchronous>, transform_indices = @transform_1, window_bounds = array<i64: 2, 128, 128>}, {pipeline_mode = #tpu.pipeline_mode<synchronous>, transform_indices = @transform_2, window_bounds = array<i64: 1, 128>}, {transform_indices = @transform_3, window_bounds = array<i64: 1, 1, 8, 128>}, {transform_indices = @transform_4, window_bounds = array<i64: 1, 1, 1, 128>}, {transform_indices = @transform_5, window_bounds = array<i64: 1, 1, 1, 128>}]} {
    %cst = arith.constant 0.000000e+00 : f32
    %0 = vector.broadcast %cst : f32 to vector<8x128xf32>
    %c0_i32 = arith.constant 0 : i32
    %1 = arith.addi %arg1, %c0_i32 : i32
    %c0 = arith.constant 0 : index
    %2 = arith.index_cast %1 : i32 to index
    %c0_0 = arith.constant 0 : index
    %c0_1 = arith.constant 0 : index
    %3 = vector.load %arg2[%c0, %2, %c0_0, %c0_1] : memref<1x3x8x128xbf16, #tpu.memory_space<vmem>>, vector<1x1x8x128xbf16>
    %4 = vector.shape_cast %3 : vector<1x1x8x128xbf16> to vector<1x8x128xbf16>
    %5 = vector.shape_cast %4 : vector<1x8x128xbf16> to vector<8x128xbf16>
    %c0_2 = arith.constant 0 : index
    %c0_3 = arith.constant 0 : index
    %c0_4 = arith.constant 0 : index
    %6 = vector.load %arg3[%c0_2, %c0_3, %c0_4] : memref<2x128x128xbf16, #tpu.memory_space<vmem>>, vector<1x128x128xbf16>
    %7 = vector.shape_cast %6 : vector<1x128x128xbf16> to vector<128x128xbf16>
    %cst_5 = arith.constant dense<0.000000e+00> : vector<8x128xf32>
    %8 = tpu.matmul %5, %7, %cst_5 {dimension_numbers = #tpu.dot_dimension_numbers<[1], [0], [0], [1], [0, 0, 1, 1], [], []>} : vector<8x128xbf16>, vector<128x128xbf16>, vector<8x128xf32> -> vector<8x128xf32>
    %9 = arith.addf %0, %8 : vector<8x128xf32>
    %c1_i32 = arith.constant 1 : i32
    %10 = arith.addi %arg1, %c1_i32 : i32
    %c0_6 = arith.constant 0 : index
    %11 = arith.index_cast %10 : i32 to index
    %c0_7 = arith.constant 0 : index
    %c0_8 = arith.constant 0 : index
    %12 = vector.load %arg2[%c0_6, %11, %c0_7, %c0_8] : memref<1x3x8x128xbf16, #tpu.memory_space<vmem>>, vector<1x1x8x128xbf16>
    %13 = vector.shape_cast %12 : vector<1x1x8x128xbf16> to vector<1x8x128xbf16>
    %14 = vector.shape_cast %13 : vector<1x8x128xbf16> to vector<8x128xbf16>
    %c1 = arith.constant 1 : index
    %c0_9 = arith.constant 0 : index
    %c0_10 = arith.constant 0 : index
    %15 = vector.load %arg3[%c1, %c0_9, %c0_10] : memref<2x128x128xbf16, #tpu.memory_space<vmem>>, vector<1x128x128xbf16>
    %16 = vector.shape_cast %15 : vector<1x128x128xbf16> to vector<128x128xbf16>
    %cst_11 = arith.constant dense<0.000000e+00> : vector<8x128xf32>
    %17 = tpu.matmul %14, %16, %cst_11 {dimension_numbers = #tpu.dot_dimension_numbers<[1], [0], [0], [1], [0, 0, 1, 1], [], []>} : vector<8x128xbf16>, vector<128x128xbf16>, vector<8x128xf32> -> vector<8x128xf32>
    %18 = arith.addf %9, %17 : vector<8x128xf32>
    %c0_12 = arith.constant 0 : index
    %c0_13 = arith.constant 0 : index
    %19 = vector.load %arg4[%c0_12, %c0_13] : memref<1x128xf32, #tpu.memory_space<vmem>>, vector<1x128xf32>
    %20 = vector.broadcast %19 : vector<1x128xf32> to vector<8x128xf32>
    %21 = arith.addf %18, %20 : vector<8x128xf32>
    %22 = arith.truncf %21 : vector<8x128xf32> to vector<8x128xbf16>
    %c0_14 = arith.constant 0 : index
    %c0_15 = arith.constant 0 : index
    %c0_16 = arith.constant 0 : index
    %c0_17 = arith.constant 0 : index
    %23 = vector.load %arg5[%c0_14, %c0_15, %c0_16, %c0_17] : memref<1x1x8x128xbf16, #tpu.memory_space<vmem>>, vector<1x1x8x128xbf16>
    %24 = vector.shape_cast %23 : vector<1x1x8x128xbf16> to vector<8x128xbf16>
    %25 = vector.shape_cast %22 : vector<8x128xbf16> to vector<1x1x8x128xbf16>
    tpu.vector_store %arg5[%c0_14, %c0_15, %c0_16, %c0_17], %25 {strides = array<i32>} : memref<1x1x8x128xbf16, #tpu.memory_space<vmem>>, vector<1x1x8x128xbf16>,
    %cst_18 = arith.constant dense<0.000000e+00> : vector<128xf32>
    %26 = vector.multi_reduction <add>, %21, %cst_18 [0] : vector<8x128xf32> to vector<128xf32>
    %27 = vector.shape_cast %26 : vector<128xf32> to vector<1x128xf32>
    %c0_19 = arith.constant 0 : index
    %c0_20 = arith.constant 0 : index
    %c0_21 = arith.constant 0 : index
    %c0_22 = arith.constant 0 : index
    %28 = vector.load %arg6[%c0_19, %c0_20, %c0_21, %c0_22] : memref<1x1x1x128xf32, #tpu.memory_space<vmem>>, vector<1x1x1x128xf32>
    %29 = vector.shape_cast %28 : vector<1x1x1x128xf32> to vector<1x128xf32>
    %30 = vector.shape_cast %27 : vector<1x128xf32> to vector<1x1x1x128xf32>
    tpu.vector_store %arg6[%c0_19, %c0_20, %c0_21, %c0_22], %30 {strides = array<i32>} : memref<1x1x1x128xf32, #tpu.memory_space<vmem>>, vector<1x1x1x128xf32>,
    %31 = arith.mulf %21, %21 : vector<8x128xf32>
    %cst_23 = arith.constant dense<0.000000e+00> : vector<128xf32>
    %32 = vector.multi_reduction <add>, %31, %cst_23 [0] : vector<8x128xf32> to vector<128xf32>
    %33 = vector.shape_cast %32 : vector<128xf32> to vector<1x128xf32>
    %c0_24 = arith.constant 0 : index
    %c0_25 = arith.constant 0 : index
    %c0_26 = arith.constant 0 : index
    %c0_27 = arith.constant 0 : index
    %34 = vector.load %arg7[%c0_24, %c0_25, %c0_26, %c0_27] : memref<1x1x1x128xf32, #tpu.memory_space<vmem>>, vector<1x1x1x128xf32>
    %35 = vector.shape_cast %34 : vector<1x1x1x128xf32> to vector<1x128xf32>
    %36 = vector.shape_cast %33 : vector<1x128xf32> to vector<1x1x1x128xf32>
    tpu.vector_store %arg7[%c0_24, %c0_25, %c0_26, %c0_27], %36 {strides = array<i32>} : memref<1x1x1x128xf32, #tpu.memory_space<vmem>>, vector<1x1x1x128xf32>,
    return
  }
  func.func @transform_0(%arg0: i32, %arg1: i32) -> (i32, i32, i32, i32) {
    %c0_i32 = arith.constant 0 : i32
    %c0_i32_0 = arith.constant 0 : i32
    %c0_i32_1 = arith.constant 0 : i32
    %c0_i32_2 = arith.constant 0 : i32
    return %arg0, %c0_i32, %c0_i32_0, %c0_i32_1 : i32, i32, i32, i32
  }
  func.func @transform_1(%arg0: i32, %arg1: i32) -> (i32, i32, i32) {
    %c0_i32 = arith.constant 0 : i32
    %c0_i32_0 = arith.constant 0 : i32
    %c0_i32_1 = arith.constant 0 : i32
    %c0_i32_2 = arith.constant 0 : i32
    return %c0_i32, %c0_i32_0, %c0_i32_1 : i32, i32, i32
  }
  func.func @transform_2(%arg0: i32, %arg1: i32) -> (i32, i32) {
    %c0_i32 = arith.constant 0 : i32
    %c0_i32_0 = arith.constant 0 : i32
    %c0_i32_1 = arith.constant 0 : i32
    return %c0_i32, %c0_i32_0 : i32, i32
  }
  func.func @transform_3(%arg0: i32, %arg1: i32) -> (i32, i32, i32, i32) {
    %c0_i32 = arith.constant 0 : i32
    %c0_i32_0 = arith.constant 0 : i32
    %c0_i32_1 = arith.constant 0 : i32
    return %arg0, %arg1, %c0_i32, %c0_i32_0 : i32, i32, i32, i32
  }
  func.func @transform_4(%arg0: i32, %arg1: i32) -> (i32, i32, i32, i32) {
    %c0_i32 = arith.constant 0 : i32
    %c0_i32_0 = arith.constant 0 : i32
    %c0_i32_1 = arith.constant 0 : i32
    return %arg0, %arg1, %c0_i32, %c0_i32_0 : i32, i32, i32, i32
  }
  func.func @transform_5(%arg0: i32, %arg1: i32) -> (i32, i32, i32, i32) {
    %c0_i32 = arith.constant 0 : i32
    %c0_i32_0 = arith.constant 0 : i32
    %c0_i32_1 = arith.constant 0 : i32
    return %arg0, %arg1, %c0_i32, %c0_i32_0 : i32, i32, i32, i32
  }
}

module attributes {stable_mosaic.version = 11 : i64} {
  func.func @_conv_band_kernel(%arg0: i32, %arg1: i32, %arg2: memref<1x7x10x160xbf16, #tpu.memory_space<vmem>>, %arg3: memref<9x160x16xbf16, #tpu.memory_space<vmem>>, %arg4: memref<1x16xf32, #tpu.memory_space<vmem>>, %arg5: memref<1x1x8x16xf32, #tpu.memory_space<vmem>>, %arg6: memref<1x1x1x16xf32, #tpu.memory_space<vmem>>, %arg7: memref<1x1x1x16xf32, #tpu.memory_space<vmem>>) attributes {dimension_semantics = [#tpu.dimension_semantics<parallel>, #tpu.dimension_semantics<parallel>], iteration_bounds = array<i64: 2, 5>, scalar_prefetch = 0 : i64, scratch_operands = 0 : i64, tpu.core_type = #tpu.core_type<tc>, window_params = [{transform_indices = @transform_0, window_bounds = array<i64: 1, 7, 10, 160>}, {pipeline_mode = #tpu.pipeline_mode<synchronous>, transform_indices = @transform_1, window_bounds = array<i64: 9, 160, 16>}, {pipeline_mode = #tpu.pipeline_mode<synchronous>, transform_indices = @transform_2, window_bounds = array<i64: 1, 16>}, {transform_indices = @transform_3, window_bounds = array<i64: 1, 1, 8, 16>}, {transform_indices = @transform_4, window_bounds = array<i64: 1, 1, 1, 16>}, {transform_indices = @transform_5, window_bounds = array<i64: 1, 1, 1, 16>}]} {
    %cst = arith.constant 0.000000e+00 : f32
    %0 = vector.broadcast %cst : f32 to vector<8x16xf32>
    %c0_i32 = arith.constant 0 : i32
    %1 = arith.addi %arg1, %c0_i32 : i32
    %c0 = arith.constant 0 : index
    %2 = arith.index_cast %1 : i32 to index
    %c0_0 = arith.constant 0 : index
    %c0_1 = arith.constant 0 : index
    %3 = vector.load %arg2[%c0, %2, %c0_0, %c0_1] : memref<1x7x10x160xbf16, #tpu.memory_space<vmem>>, vector<1x1x8x160xbf16>
    %4 = vector.shape_cast %3 : vector<1x1x8x160xbf16> to vector<1x8x160xbf16>
    %5 = vector.shape_cast %4 : vector<1x8x160xbf16> to vector<8x160xbf16>
    %c0_2 = arith.constant 0 : index
    %c0_3 = arith.constant 0 : index
    %c0_4 = arith.constant 0 : index
    %6 = vector.load %arg3[%c0_2, %c0_3, %c0_4] : memref<9x160x16xbf16, #tpu.memory_space<vmem>>, vector<1x160x16xbf16>
    %7 = vector.shape_cast %6 : vector<1x160x16xbf16> to vector<160x16xbf16>
    %cst_5 = arith.constant dense<0.000000e+00> : vector<8x16xf32>
    %8 = tpu.matmul %5, %7, %cst_5 {dimension_numbers = #tpu.dot_dimension_numbers<[1], [0], [0], [1], [0, 0, 1, 1], [], []>} : vector<8x160xbf16>, vector<160x16xbf16>, vector<8x16xf32> -> vector<8x16xf32>
    %9 = arith.addf %0, %8 : vector<8x16xf32>
    %c0_i32_6 = arith.constant 0 : i32
    %10 = arith.addi %arg1, %c0_i32_6 : i32
    %c0_7 = arith.constant 0 : index
    %11 = arith.index_cast %10 : i32 to index
    %c1 = arith.constant 1 : index
    %c0_8 = arith.constant 0 : index
    %12 = vector.load %arg2[%c0_7, %11, %c1, %c0_8] : memref<1x7x10x160xbf16, #tpu.memory_space<vmem>>, vector<1x1x8x160xbf16>
    %13 = vector.shape_cast %12 : vector<1x1x8x160xbf16> to vector<1x8x160xbf16>
    %14 = vector.shape_cast %13 : vector<1x8x160xbf16> to vector<8x160xbf16>
    %c1_9 = arith.constant 1 : index
    %c0_10 = arith.constant 0 : index
    %c0_11 = arith.constant 0 : index
    %15 = vector.load %arg3[%c1_9, %c0_10, %c0_11] : memref<9x160x16xbf16, #tpu.memory_space<vmem>>, vector<1x160x16xbf16>
    %16 = vector.shape_cast %15 : vector<1x160x16xbf16> to vector<160x16xbf16>
    %cst_12 = arith.constant dense<0.000000e+00> : vector<8x16xf32>
    %17 = tpu.matmul %14, %16, %cst_12 {dimension_numbers = #tpu.dot_dimension_numbers<[1], [0], [0], [1], [0, 0, 1, 1], [], []>} : vector<8x160xbf16>, vector<160x16xbf16>, vector<8x16xf32> -> vector<8x16xf32>
    %18 = arith.addf %9, %17 : vector<8x16xf32>
    %c0_i32_13 = arith.constant 0 : i32
    %19 = arith.addi %arg1, %c0_i32_13 : i32
    %c0_14 = arith.constant 0 : index
    %20 = arith.index_cast %19 : i32 to index
    %c2 = arith.constant 2 : index
    %c0_15 = arith.constant 0 : index
    %21 = vector.load %arg2[%c0_14, %20, %c2, %c0_15] : memref<1x7x10x160xbf16, #tpu.memory_space<vmem>>, vector<1x1x8x160xbf16>
    %22 = vector.shape_cast %21 : vector<1x1x8x160xbf16> to vector<1x8x160xbf16>
    %23 = vector.shape_cast %22 : vector<1x8x160xbf16> to vector<8x160xbf16>
    %c2_16 = arith.constant 2 : index
    %c0_17 = arith.constant 0 : index
    %c0_18 = arith.constant 0 : index
    %24 = vector.load %arg3[%c2_16, %c0_17, %c0_18] : memref<9x160x16xbf16, #tpu.memory_space<vmem>>, vector<1x160x16xbf16>
    %25 = vector.shape_cast %24 : vector<1x160x16xbf16> to vector<160x16xbf16>
    %cst_19 = arith.constant dense<0.000000e+00> : vector<8x16xf32>
    %26 = tpu.matmul %23, %25, %cst_19 {dimension_numbers = #tpu.dot_dimension_numbers<[1], [0], [0], [1], [0, 0, 1, 1], [], []>} : vector<8x160xbf16>, vector<160x16xbf16>, vector<8x16xf32> -> vector<8x16xf32>
    %27 = arith.addf %18, %26 : vector<8x16xf32>
    %c1_i32 = arith.constant 1 : i32
    %28 = arith.addi %arg1, %c1_i32 : i32
    %c0_20 = arith.constant 0 : index
    %29 = arith.index_cast %28 : i32 to index
    %c0_21 = arith.constant 0 : index
    %c0_22 = arith.constant 0 : index
    %30 = vector.load %arg2[%c0_20, %29, %c0_21, %c0_22] : memref<1x7x10x160xbf16, #tpu.memory_space<vmem>>, vector<1x1x8x160xbf16>
    %31 = vector.shape_cast %30 : vector<1x1x8x160xbf16> to vector<1x8x160xbf16>
    %32 = vector.shape_cast %31 : vector<1x8x160xbf16> to vector<8x160xbf16>
    %c3 = arith.constant 3 : index
    %c0_23 = arith.constant 0 : index
    %c0_24 = arith.constant 0 : index
    %33 = vector.load %arg3[%c3, %c0_23, %c0_24] : memref<9x160x16xbf16, #tpu.memory_space<vmem>>, vector<1x160x16xbf16>
    %34 = vector.shape_cast %33 : vector<1x160x16xbf16> to vector<160x16xbf16>
    %cst_25 = arith.constant dense<0.000000e+00> : vector<8x16xf32>
    %35 = tpu.matmul %32, %34, %cst_25 {dimension_numbers = #tpu.dot_dimension_numbers<[1], [0], [0], [1], [0, 0, 1, 1], [], []>} : vector<8x160xbf16>, vector<160x16xbf16>, vector<8x16xf32> -> vector<8x16xf32>
    %36 = arith.addf %27, %35 : vector<8x16xf32>
    %c1_i32_26 = arith.constant 1 : i32
    %37 = arith.addi %arg1, %c1_i32_26 : i32
    %c0_27 = arith.constant 0 : index
    %38 = arith.index_cast %37 : i32 to index
    %c1_28 = arith.constant 1 : index
    %c0_29 = arith.constant 0 : index
    %39 = vector.load %arg2[%c0_27, %38, %c1_28, %c0_29] : memref<1x7x10x160xbf16, #tpu.memory_space<vmem>>, vector<1x1x8x160xbf16>
    %40 = vector.shape_cast %39 : vector<1x1x8x160xbf16> to vector<1x8x160xbf16>
    %41 = vector.shape_cast %40 : vector<1x8x160xbf16> to vector<8x160xbf16>
    %c4 = arith.constant 4 : index
    %c0_30 = arith.constant 0 : index
    %c0_31 = arith.constant 0 : index
    %42 = vector.load %arg3[%c4, %c0_30, %c0_31] : memref<9x160x16xbf16, #tpu.memory_space<vmem>>, vector<1x160x16xbf16>
    %43 = vector.shape_cast %42 : vector<1x160x16xbf16> to vector<160x16xbf16>
    %cst_32 = arith.constant dense<0.000000e+00> : vector<8x16xf32>
    %44 = tpu.matmul %41, %43, %cst_32 {dimension_numbers = #tpu.dot_dimension_numbers<[1], [0], [0], [1], [0, 0, 1, 1], [], []>} : vector<8x160xbf16>, vector<160x16xbf16>, vector<8x16xf32> -> vector<8x16xf32>
    %45 = arith.addf %36, %44 : vector<8x16xf32>
    %c1_i32_33 = arith.constant 1 : i32
    %46 = arith.addi %arg1, %c1_i32_33 : i32
    %c0_34 = arith.constant 0 : index
    %47 = arith.index_cast %46 : i32 to index
    %c2_35 = arith.constant 2 : index
    %c0_36 = arith.constant 0 : index
    %48 = vector.load %arg2[%c0_34, %47, %c2_35, %c0_36] : memref<1x7x10x160xbf16, #tpu.memory_space<vmem>>, vector<1x1x8x160xbf16>
    %49 = vector.shape_cast %48 : vector<1x1x8x160xbf16> to vector<1x8x160xbf16>
    %50 = vector.shape_cast %49 : vector<1x8x160xbf16> to vector<8x160xbf16>
    %c5 = arith.constant 5 : index
    %c0_37 = arith.constant 0 : index
    %c0_38 = arith.constant 0 : index
    %51 = vector.load %arg3[%c5, %c0_37, %c0_38] : memref<9x160x16xbf16, #tpu.memory_space<vmem>>, vector<1x160x16xbf16>
    %52 = vector.shape_cast %51 : vector<1x160x16xbf16> to vector<160x16xbf16>
    %cst_39 = arith.constant dense<0.000000e+00> : vector<8x16xf32>
    %53 = tpu.matmul %50, %52, %cst_39 {dimension_numbers = #tpu.dot_dimension_numbers<[1], [0], [0], [1], [0, 0, 1, 1], [], []>} : vector<8x160xbf16>, vector<160x16xbf16>, vector<8x16xf32> -> vector<8x16xf32>
    %54 = arith.addf %45, %53 : vector<8x16xf32>
    %c2_i32 = arith.constant 2 : i32
    %55 = arith.addi %arg1, %c2_i32 : i32
    %c0_40 = arith.constant 0 : index
    %56 = arith.index_cast %55 : i32 to index
    %c0_41 = arith.constant 0 : index
    %c0_42 = arith.constant 0 : index
    %57 = vector.load %arg2[%c0_40, %56, %c0_41, %c0_42] : memref<1x7x10x160xbf16, #tpu.memory_space<vmem>>, vector<1x1x8x160xbf16>
    %58 = vector.shape_cast %57 : vector<1x1x8x160xbf16> to vector<1x8x160xbf16>
    %59 = vector.shape_cast %58 : vector<1x8x160xbf16> to vector<8x160xbf16>
    %c6 = arith.constant 6 : index
    %c0_43 = arith.constant 0 : index
    %c0_44 = arith.constant 0 : index
    %60 = vector.load %arg3[%c6, %c0_43, %c0_44] : memref<9x160x16xbf16, #tpu.memory_space<vmem>>, vector<1x160x16xbf16>
    %61 = vector.shape_cast %60 : vector<1x160x16xbf16> to vector<160x16xbf16>
    %cst_45 = arith.constant dense<0.000000e+00> : vector<8x16xf32>
    %62 = tpu.matmul %59, %61, %cst_45 {dimension_numbers = #tpu.dot_dimension_numbers<[1], [0], [0], [1], [0, 0, 1, 1], [], []>} : vector<8x160xbf16>, vector<160x16xbf16>, vector<8x16xf32> -> vector<8x16xf32>
    %63 = arith.addf %54, %62 : vector<8x16xf32>
    %c2_i32_46 = arith.constant 2 : i32
    %64 = arith.addi %arg1, %c2_i32_46 : i32
    %c0_47 = arith.constant 0 : index
    %65 = arith.index_cast %64 : i32 to index
    %c1_48 = arith.constant 1 : index
    %c0_49 = arith.constant 0 : index
    %66 = vector.load %arg2[%c0_47, %65, %c1_48, %c0_49] : memref<1x7x10x160xbf16, #tpu.memory_space<vmem>>, vector<1x1x8x160xbf16>
    %67 = vector.shape_cast %66 : vector<1x1x8x160xbf16> to vector<1x8x160xbf16>
    %68 = vector.shape_cast %67 : vector<1x8x160xbf16> to vector<8x160xbf16>
    %c7 = arith.constant 7 : index
    %c0_50 = arith.constant 0 : index
    %c0_51 = arith.constant 0 : index
    %69 = vector.load %arg3[%c7, %c0_50, %c0_51] : memref<9x160x16xbf16, #tpu.memory_space<vmem>>, vector<1x160x16xbf16>
    %70 = vector.shape_cast %69 : vector<1x160x16xbf16> to vector<160x16xbf16>
    %cst_52 = arith.constant dense<0.000000e+00> : vector<8x16xf32>
    %71 = tpu.matmul %68, %70, %cst_52 {dimension_numbers = #tpu.dot_dimension_numbers<[1], [0], [0], [1], [0, 0, 1, 1], [], []>} : vector<8x160xbf16>, vector<160x16xbf16>, vector<8x16xf32> -> vector<8x16xf32>
    %72 = arith.addf %63, %71 : vector<8x16xf32>
    %c2_i32_53 = arith.constant 2 : i32
    %73 = arith.addi %arg1, %c2_i32_53 : i32
    %c0_54 = arith.constant 0 : index
    %74 = arith.index_cast %73 : i32 to index
    %c2_55 = arith.constant 2 : index
    %c0_56 = arith.constant 0 : index
    %75 = vector.load %arg2[%c0_54, %74, %c2_55, %c0_56] : memref<1x7x10x160xbf16, #tpu.memory_space<vmem>>, vector<1x1x8x160xbf16>
    %76 = vector.shape_cast %75 : vector<1x1x8x160xbf16> to vector<1x8x160xbf16>
    %77 = vector.shape_cast %76 : vector<1x8x160xbf16> to vector<8x160xbf16>
    %c8 = arith.constant 8 : index
    %c0_57 = arith.constant 0 : index
    %c0_58 = arith.constant 0 : index
    %78 = vector.load %arg3[%c8, %c0_57, %c0_58] : memref<9x160x16xbf16, #tpu.memory_space<vmem>>, vector<1x160x16xbf16>
    %79 = vector.shape_cast %78 : vector<1x160x16xbf16> to vector<160x16xbf16>
    %cst_59 = arith.constant dense<0.000000e+00> : vector<8x16xf32>
    %80 = tpu.matmul %77, %79, %cst_59 {dimension_numbers = #tpu.dot_dimension_numbers<[1], [0], [0], [1], [0, 0, 1, 1], [], []>} : vector<8x160xbf16>, vector<160x16xbf16>, vector<8x16xf32> -> vector<8x16xf32>
    %81 = arith.addf %72, %80 : vector<8x16xf32>
    %c0_60 = arith.constant 0 : index
    %c0_61 = arith.constant 0 : index
    %82 = vector.load %arg4[%c0_60, %c0_61] : memref<1x16xf32, #tpu.memory_space<vmem>>, vector<1x16xf32>
    %83 = vector.broadcast %82 : vector<1x16xf32> to vector<8x16xf32>
    %84 = arith.addf %81, %83 : vector<8x16xf32>
    %c0_62 = arith.constant 0 : index
    %c0_63 = arith.constant 0 : index
    %c0_64 = arith.constant 0 : index
    %c0_65 = arith.constant 0 : index
    %85 = vector.load %arg5[%c0_62, %c0_63, %c0_64, %c0_65] : memref<1x1x8x16xf32, #tpu.memory_space<vmem>>, vector<1x1x8x16xf32>
    %86 = vector.shape_cast %85 : vector<1x1x8x16xf32> to vector<8x16xf32>
    %87 = vector.shape_cast %84 : vector<8x16xf32> to vector<1x1x8x16xf32>
    tpu.vector_store %arg5[%c0_62, %c0_63, %c0_64, %c0_65], %87 {strides = array<i32>} : memref<1x1x8x16xf32, #tpu.memory_space<vmem>>, vector<1x1x8x16xf32>,
    %cst_66 = arith.constant dense<0.000000e+00> : vector<16xf32>
    %88 = vector.multi_reduction <add>, %84, %cst_66 [0] : vector<8x16xf32> to vector<16xf32>
    %89 = vector.shape_cast %88 : vector<16xf32> to vector<1x16xf32>
    %c0_67 = arith.constant 0 : index
    %c0_68 = arith.constant 0 : index
    %c0_69 = arith.constant 0 : index
    %c0_70 = arith.constant 0 : index
    %90 = vector.load %arg6[%c0_67, %c0_68, %c0_69, %c0_70] : memref<1x1x1x16xf32, #tpu.memory_space<vmem>>, vector<1x1x1x16xf32>
    %91 = vector.shape_cast %90 : vector<1x1x1x16xf32> to vector<1x16xf32>
    %92 = vector.shape_cast %89 : vector<1x16xf32> to vector<1x1x1x16xf32>
    tpu.vector_store %arg6[%c0_67, %c0_68, %c0_69, %c0_70], %92 {strides = array<i32>} : memref<1x1x1x16xf32, #tpu.memory_space<vmem>>, vector<1x1x1x16xf32>,
    %93 = arith.mulf %84, %84 : vector<8x16xf32>
    %cst_71 = arith.constant dense<0.000000e+00> : vector<16xf32>
    %94 = vector.multi_reduction <add>, %93, %cst_71 [0] : vector<8x16xf32> to vector<16xf32>
    %95 = vector.shape_cast %94 : vector<16xf32> to vector<1x16xf32>
    %c0_72 = arith.constant 0 : index
    %c0_73 = arith.constant 0 : index
    %c0_74 = arith.constant 0 : index
    %c0_75 = arith.constant 0 : index
    %96 = vector.load %arg7[%c0_72, %c0_73, %c0_74, %c0_75] : memref<1x1x1x16xf32, #tpu.memory_space<vmem>>, vector<1x1x1x16xf32>
    %97 = vector.shape_cast %96 : vector<1x1x1x16xf32> to vector<1x16xf32>
    %98 = vector.shape_cast %95 : vector<1x16xf32> to vector<1x1x1x16xf32>
    tpu.vector_store %arg7[%c0_72, %c0_73, %c0_74, %c0_75], %98 {strides = array<i32>} : memref<1x1x1x16xf32, #tpu.memory_space<vmem>>, vector<1x1x1x16xf32>,
    return
  }
  func.func @transform_0(%arg0: i32, %arg1: i32) -> (i32, i32, i32, i32) {
    %c0_i32 = arith.constant 0 : i32
    %c0_i32_0 = arith.constant 0 : i32
    %c0_i32_1 = arith.constant 0 : i32
    %c0_i32_2 = arith.constant 0 : i32
    return %arg0, %c0_i32, %c0_i32_0, %c0_i32_1 : i32, i32, i32, i32
  }
  func.func @transform_1(%arg0: i32, %arg1: i32) -> (i32, i32, i32) {
    %c0_i32 = arith.constant 0 : i32
    %c0_i32_0 = arith.constant 0 : i32
    %c0_i32_1 = arith.constant 0 : i32
    %c0_i32_2 = arith.constant 0 : i32
    return %c0_i32, %c0_i32_0, %c0_i32_1 : i32, i32, i32
  }
  func.func @transform_2(%arg0: i32, %arg1: i32) -> (i32, i32) {
    %c0_i32 = arith.constant 0 : i32
    %c0_i32_0 = arith.constant 0 : i32
    %c0_i32_1 = arith.constant 0 : i32
    return %c0_i32, %c0_i32_0 : i32, i32
  }
  func.func @transform_3(%arg0: i32, %arg1: i32) -> (i32, i32, i32, i32) {
    %c0_i32 = arith.constant 0 : i32
    %c0_i32_0 = arith.constant 0 : i32
    %c0_i32_1 = arith.constant 0 : i32
    return %arg0, %arg1, %c0_i32, %c0_i32_0 : i32, i32, i32, i32
  }
  func.func @transform_4(%arg0: i32, %arg1: i32) -> (i32, i32, i32, i32) {
    %c0_i32 = arith.constant 0 : i32
    %c0_i32_0 = arith.constant 0 : i32
    %c0_i32_1 = arith.constant 0 : i32
    return %arg0, %arg1, %c0_i32, %c0_i32_0 : i32, i32, i32, i32
  }
  func.func @transform_5(%arg0: i32, %arg1: i32) -> (i32, i32, i32, i32) {
    %c0_i32 = arith.constant 0 : i32
    %c0_i32_0 = arith.constant 0 : i32
    %c0_i32_1 = arith.constant 0 : i32
    return %arg0, %arg1, %c0_i32, %c0_i32_0 : i32, i32, i32, i32
  }
}

</mosaic_0001>

<bundles_post_ra>
// kernel: tile.48
= control target key start
LH: loop header
LB: loop body
LE: loop exit
PB: predicated region body
PF: predicated region fallthrough
CT: control target
= control target key end

     0   :  { %s22_s0 = inlined_call_operand.vmem [shape: f32[16], index: 0, kind: input, shape index: {}]   ;;  %s23_s1 = inlined_call_operand.vmem [shape: f32[8,16], index: 1, kind: output, shape index: {}]  }
   0x1   :  { %v4_v0 = vld [vmem:[%s22_s0] ss:$0 sm:$0xff] }
   0x2   :  { %5 = vst [vmem:[%s23_s1] sm:$0xff] %v4_v0 }

// kernel: tile.49
= control target key start
LH: loop header
LB: loop body
LE: loop exit
PB: predicated region body
PF: predicated region fallthrough
CT: control target
= control target key end

     0   :  { %s67_s10 = smov 112   ;;  %s68_s11 = smov 80   ;;  %vm3_vm0 = vcmask 130048   ;;  %vm9_vm1 = vcmask 1048448   ;;  %vm15_vm2 = vcmask 917248   ;;  %vm21_vm3 = vcmask 786048   ;;  %s111_s0 = inlined_call_operand.vmem [shape: f32[8,16], index: 0, kind: input, shape index: {}]   ;;  %s112_s1 = inlined_call_operand.vmem [shape: f32[1,128], index: 1, kind: output, shape index: {}]  }
   0x1   :  { %v53_v0 = vld [vmem:[%s111_s0 + $0x7] sm:$0x1]   ;;  %v55_v1 = vld [vmem:[%s111_s0 + $0x5] sm:$0x1]   ;;  %v54_v2 = vld [vmem:[%s111_s0 + $0x6] sm:$0x1]  }
   0x2   :  { %7 = vrot.lane.b32.xlu0 %v53_v0, %s67_s10  ;;  %19 = vrot.lane.b32.xlu1 %v55_v1, %s68_s11  ;;  %v56_v3 = vld [vmem:[%s111_s0 + $0x4] sm:$0x1]   ;;  %v2_v4 = vld [vmem:[%s111_s0] sm:$0x1]   ;;  %s69_s18 = smov 96   ;;  %s70_s19 = smov 64  }
   0x3   :  { %4 = vst.msk [vmem:[#allocation0] sm:$0x1] %vm3_vm0, %v2_v4   ;;  %v57_v5 = vld [vmem:[%s111_s0 + $0x3] sm:$0x1]   ;;  %v58_v6 = vld [vmem:[%s111_s0 + $0x2] sm:$0x1]  }
   0x4   :  { %s71_s24 = smov 48   ;;  %s72_s25 = smov 32   ;;  %v59_v7 = vld [vmem:[%s111_s0 + $0x1] sm:$0x1]   ;;  %vm27_vm4 = vcmask 654848   ;;  %vm33_vm5 = vcmask 523648  }
   0x5   :  { %s73_s0 = smov 16   ;;  %vm39_vm6 = vcmask 392448   ;;  %vm45_vm7 = vcmask 261248  }
   0x6   :  { %13 = vrot.lane.b32.xlu0 %v54_v2, %s69_s18  ;;  %25 = vrot.lane.b32.xlu1 %v56_v3, %s70_s19 }
   0xa   :  { %31 = vrot.lane.b32.xlu0 %v57_v5, %s71_s24  ;;  %37 = vrot.lane.b32.xlu1 %v58_v6, %s72_s25 }
   0xe   :  { %43 = vrot.lane.b32.xlu0 %v59_v7, %s73_s0 }
  0x74   :  { %v8_v8 = vpop.permute.xlu0 %7   ;;  %v20_v9 = vpop.permute.xlu1 %19  }
  0x75   :  { %10 = vst.msk [vmem:[#allocation0] sm:$0x1] %vm9_vm1, %v8_v8  }
  0x78   :  { %v14_v10 = vpop.permute.xlu0 %13   ;;  %v26_v11 = vpop.permute.xlu1 %25  }
  0x79   :  { %16 = vst.msk [vmem:[#allocation0] sm:$0x1] %vm15_vm2, %v14_v10  }
  0x7a   :  { %22 = vst.msk [vmem:[#allocation0] sm:$0x1] %vm21_vm3, %v20_v9  }
  0x7b   :  { %28 = vst.msk [vmem:[#allocation0] sm:$0x1] %vm27_vm4, %v26_v11  }
  0x7c   :  { %v32_v12 = vpop.permute.xlu0 %31   ;;  %v38_v13 = vpop.permute.xlu1 %37  }
  0x7d   :  { %34 = vst.msk [vmem:[#allocation0] sm:$0x1] %vm33_vm5, %v32_v12  }
  0x7e   :  { %40 = vst.msk [vmem:[#allocation0] sm:$0x1] %vm39_vm6, %v38_v13  }
  0x80   :  { %v44_v14 = vpop.permute.xlu0 %43  }
  0x81   :  { %46 = vst.msk [vmem:[#allocation0] sm:$0x1] %vm45_vm7, %v44_v14  }
  0x88   :  { %v50_v15 = vld [vmem:[#allocation0] sm:$0x1] }
  0x89   :  { %52 = vst [vmem:[%s112_s1] sm:$0x1] %v50_v15 }

// kernel: reverse
= control target key start
LH: loop header
LB: loop body
LE: loop exit
PB: predicated region body
PF: predicated region fallthrough
CT: control target
= control target key end

     0   :  { %s188_s0 = inlined_call_operand.vmem [shape: bf16[2,3,8,8,2], index: 0, kind: input, shape index: {}]   ;;  %s189_s1 = inlined_call_operand.vmem [shape: bf16[2,3,8,8,2], index: 1, kind: output, shape index: {}]  }
   0x1   :  { %v84_v0 = vld [vmem:[%s188_s0 + $0x8] sm:$0xf]  ;;  %v85_v1 = vld [vmem:[%s188_s0 + $0x20] sm:$0xf]  ;;  %v87_v2 = vld [vmem:[%s188_s0 + $0x14] sm:$0xf] }
   0x2   :  { %7 = vst [vmem:[%s189_s1] sm:$0xf] %v84_v0  ;;  %86 = vst [vmem:[%s189_s1 + $0x18] sm:$0xf] %v85_v1  ;;  %v89_v3 = vld [vmem:[%s188_s0 + $0x2c] sm:$0xf] }
   0x3   :  { %88 = vst [vmem:[%s189_s1 + $0xc] sm:$0xf] %v87_v2  ;;  %v91_v4 = vld [vmem:[%s188_s0 + $0x4] sm:$0xf]  ;;  %v93_v5 = vld [vmem:[%s188_s0 + $0x1c] sm:$0xf] }
   0x4   :  { %90 = vst [vmem:[%s189_s1 + $0x24] sm:$0xf] %v89_v3  ;;  %92 = vst [vmem:[%s189_s1 + $0x4] sm:$0xf] %v91_v4  ;;  %v95_v6 = vld [vmem:[%s188_s0 + $0x10] sm:$0xf] }
   0x5   :  { %94 = vst [vmem:[%s189_s1 + $0x1c] sm:$0xf] %v93_v5  ;;  %v97_v7 = vld [vmem:[%s188_s0 + $0x28] sm:$0xf]  ;;  %v57_v8 = vld [vmem:[%s188_s0] sm:$0xf] }
   0x6   :  { %96 = vst [vmem:[%s189_s1 + $0x10] sm:$0xf] %v95_v6  ;;  %98 = vst [vmem:[%s189_s1 + $0x28] sm:$0xf] %v97_v7  ;;  %v100_v9 = vld [vmem:[%s188_s0 + $0x18] sm:$0xf] }
   0x7   :  { %99 = vst [vmem:[%s189_s1 + $0x8] sm:$0xf] %v57_v8  ;;  %v102_v10 = vld [vmem:[%s188_s0 + $0xc] sm:$0xf]  ;;  %v104_v11 = vld [vmem:[%s188_s0 + $0x24] sm:$0xf] }
   0x8   :  { %101 = vst [vmem:[%s189_s1 + $0x20] sm:$0xf] %v100_v9  ;;  %103 = vst [vmem:[%s189_s1 + $0x14] sm:$0xf] %v102_v10 }
   0x9   :  { %105 = vst [vmem:[%s189_s1 + $0x2c] sm:$0xf] %v104_v11 }

// kernel: model_forward.10
= control target key start
LH: loop header
LB: loop body
LE: loop exit
PB: predicated region body
PF: predicated region fallthrough
CT: control target
= control target key end

     0   :  { %s193_s0 = inlined_call_operand.vmem [shape: bf16[48,128], index: 0, kind: input, shape index: {}]   ;;  %s194_s1 = inlined_call_operand.vmem [shape: f32[1,128], index: 1, kind: input, shape index: {}]   ;;  %s195_s2 = inlined_call_operand.vmem [shape: f32[1,128], index: 2, kind: input, shape index: {}]   ;;  %s196_s3 = inlined_call_operand.vmem [shape: bf16[48,128], index: 3, kind: output, shape index: {}]  }
   0x1   :  { %v119_v0 = vld [vmem:[%s193_s0] sm:$0xff]   ;;  %v145_v4 = vld [vmem:[%s193_s0 + $0x8] sm:$0xff]   ;;  %v146_v5 = vld [vmem:[%s193_s0 + $0x10] sm:$0xff]  }
   0x2   :  { %v104_v1 = vld [vmem:[%s194_s1] ss:$0 sm:$0xff]  ;;  %v120_v2 = vunpack.c.l.bf16 %v119_v0  ;;  %v121_v3 = vunpack.c.h.bf16 %v119_v0  ;;  %v124_v7 = vunpack.c.l.bf16 %v145_v4  ;;  %v125_v8 = vunpack.c.h.bf16 %v145_v4 }
   0x3   :  { %v105_v6 = vld [vmem:[%s195_s2] ss:$0 sm:$0xff]  ;;  %v128_v9 = vunpack.c.l.bf16 %v146_v5  ;;  %v129_v10 = vunpack.c.h.bf16 %v146_v5 }
   0x4   :  { %v33_v11 = vmul.f32 %v120_v2, %v104_v1  ;;  %v34_v12 = vmul.f32 %v121_v3, %v104_v1  ;;  %v35_v13 = vmul.f32 %v124_v7, %v104_v1  ;;  %v36_v14 = vmul.f32 %v125_v8, %v104_v1 }
   0x5   :  { %v37_v15 = vmul.f32 %v128_v9, %v104_v1  ;;  %v38_v16 = vmul.f32 %v129_v10, %v104_v1 }
   0x6   :  { %v46_v17 = vadd.f32 %v105_v6, %v33_v11  ;;  %v47_v18 = vadd.f32 %v105_v6, %v34_v12  ;;  %v48_v19 = vadd.f32 %v105_v6, %v35_v13  ;;  %v49_v20 = vadd.f32 %v105_v6, %v36_v14 }
   0x7   :  { %v50_v21 = vadd.f32 %v105_v6, %v37_v15  ;;  %v51_v22 = vadd.f32 %v105_v6, %v38_v16 }
   0x8   :  { %vm52_vm0 = vcmp.ge.f32.partialorder %v46_v17, 0.0  ;;  %vm53_vm1 = vcmp.ge.f32.partialorder %v47_v18, 0.0  ;;  %v58_v23 = vmul.f32 0.01, %v46_v17  ;;  %v59_v24 = vmul.f32 0.01, %v47_v18 }
   0x9   :  { %vm54_vm2 = vcmp.ge.f32.partialorder %v48_v19, 0.0  ;;  %vm55_vm3 = vcmp.ge.f32.partialorder %v49_v20, 0.0  ;;  %v60_v25 = vmul.f32 0.01, %v48_v19  ;;  %v61_v26 = vmul.f32 0.01, %v49_v20 }
   0xa   :  { %v64_v27 = vsel %vm52_vm0, %v46_v17, %v58_v23  ;;  %v65_v28 = vsel %vm53_vm1, %v47_v18, %v59_v24  ;;  %vm56_vm4 = vcmp.ge.f32.partialorder %v50_v21, 0.0  ;;  %vm57_vm5 = vcmp.ge.f32.partialorder %v51_v22, 0.0 }
   0xb   :  { %v133_v29 = vpack.c.bf16 %v65_v28, %v64_v27  ;;  %v66_v30 = vsel %vm54_vm2, %v48_v19, %v60_v25  ;;  %v67_v31 = vsel %vm55_vm3, %v49_v20, %v61_v26  ;;  %v62_v32 = vmul.f32 0.01, %v50_v21 }
   0xc   :  { %v138_v33 = vpack.c.bf16 %v67_v31, %v66_v30  ;;  %v63_v34 = vmul.f32 0.01, %v51_v22 }
   0xd   :  { %134 = vst [vmem:[%s196_s3] sm:$0xff] %v133_v29   ;;  %v68_v35 = vsel %vm56_vm4, %v50_v21, %v62_v32 }
   0xe   :  { %147 = vst [vmem:[%s196_s3 + $0x8] sm:$0xff] %v138_v33   ;;  %v69_v36 = vsel %vm57_vm5, %v51_v22, %v63_v34 }
   0xf   :  { %v143_v37 = vpack.c.bf16 %v69_v36, %v68_v35 }
  0x11   :  { %148 = vst [vmem:[%s196_s3 + $0x10] sm:$0xff] %v143_v37  }

// kernel: model_forward.9
= control target key start
LH: loop header
LB: loop body
LE: loop exit
PB: predicated region body
PF: predicated region fallthrough
CT: control target
= control target key end

     0   :  { %s1406_s18 = smov 0   ;;  %s1408_s19 = smov 0   ;;  %s1600_s0 = inlined_call_operand.vmem [shape: bf16[2,5,10,20], index: 0, kind: input, shape index: {}]   ;;  %s1601_s1 = inlined_call_operand.vmem [shape: bf16[9,20,128], index: 1, kind: input, shape index: {}]   ;;  %s1602_s2 = inlined_call_operand.vmem [shape: f32[1,128], index: 2, kind: input, shape index: {}]   ;;  %s1603_s3 = inlined_call_operand.vmem [shape: bf16[2,3,8,128], index: 3, kind: output, shape index: {0}]   ;;  %s1604_s4 = inlined_call_operand.vmem [shape: f32[2,3,1,128], index: 4, kind: output, shape index: {1}]   ;;  %s1605_s5 = inlined_call_operand.vmem [shape: f32[2,3,1,128], index: 5, kind: output, shape index: {2}]  }
   0x1   :  { %s1410_s20 = smov 0   ;;  %s1412_s21 = smov 0  }
   0x2   :  { %s1414_s22 = smov 0  }
   0x3 LB: > { %s25_s23 = sadd.s32 1, %s1364_s20  ;;  %s28_s24 = sadd.s32 1, %s1368_s21  ;;  %s1372_s22 = sphi %s1414_s22, %s16_s22   ;;  %s1368_s21 = sphi %s1412_s21, %s1609_s21   ;;  %s1364_s20 = sphi %s1410_s20, %s1608_s20   ;;  %s1360_s19 = sphi %s1408_s19, %s1607_s19   ;;  %s1356_s18 = sphi %s1406_s18, %s1606_s18  }
   0x4   : > { %p26_p0 = scmp.ge.s32.totalorder %s25_s23, 3  ;;  %p1091_p1 = scmp.ge.s32.totalorder %s1372_s22, 1 }
   0x5   : > { %p210_p2 = scmp.lt.s32.totalorder %s1372_s22, 7 }
   0x6   : > { %s1611_s23 = smov (%p26_p0, %s25_s23), 0  ;;  %s1613_s24 = smov (!%p26_p0, %s28_s24), %s1368_s21 }
   0x7   : > { %p211_p3 = pnand %p1091_p1, %p210_p2  ;;  %p30_p4 = scmp.ge.s32.totalorder %s1613_s24, 2 }
   0x8   : > { %v1310_v0 = vld [vmem:[%s1601_s1 + $0xc] sm:$0xff] (!%p211_p3)   ;;  %v1374_v1 = vmov (!%p211_p3), 0.0   ;;  %v1311_v2 = vld [vmem:[%s1601_s1] sm:$0xff] (!%p211_p3)   ;;  %vm320_vm0 = vcmask (!%p211_p3), 1041408   ;;  %p255_p5 = scmp.lt.s32.totalorder (!%p211_p3), %s1360_s19, 1  ;;  %vm1375_vm1 = vmmov (!%p211_p3), 0  }
   0x9   : > { %s1615_s24 = smov (%p30_p4, %s1613_s24), 0  ;;  %214 = sbr.rel (%p211_p3) target bundleno = 293 (0x125), region = 32 }
   0xa   : > { %1194 = vmatprep.subr.bf16.mxu0 (!%p211_p3), %v1374_v1  ;;  %1202 = vmatprep.subr.bf16.mxu1 (!%p211_p3), %v1374_v1  ;;  %v1312_v3 = vld [vmem:[%s1601_s1 + $0x14] ss:$0 sps:$4 sm:$0x33] (!%p211_p3)   ;;  %v1313_v4 = vld [vmem:[%s1601_s1 + $0x8] ss:$0 sps:$4 sm:$0x33] (!%p211_p3)  }
   0xb   : > { %1195 = vmatpush3.bf16.msra.mxu0 (!%p211_p3), %v1310_v0  ;;  %1203 = vmatpush3.bf16.msra.mxu1 (!%p211_p3), %v1311_v2  ;;  %v322_v5 = vsel (!%p211_p3), %vm320_vm0, %v1312_v3, 0  ;;  %v377_v6 = vsel (!%p211_p3), %vm320_vm0, %v1313_v4, 0  ;;  %s1166_s9 = sshll.u32 (!%p211_p3), %s1356_s18, 3  ;;  %v1318_v7 = vld [vmem:[%s1601_s1 + $0x2c] ss:$0 sps:$4 sm:$0x33] (!%p211_p3)  }
   0xc   : > { %1196 = vmatprep.subr.bf16.mxu0 (!%p211_p3), %v1374_v1  ;;  %1204 = vmatprep.subr.bf16.mxu1 (!%p211_p3), %v1374_v1  ;;  %vm316_vm2 = vcmask (!%p211_p3), 162816   ;;  %v1316_v8 = vld [vmem:[%s1601_s1 + $0x24] sm:$0xff] (!%p211_p3)   ;;  %v506_v14 = vsel (!%p211_p3), %vm320_vm0, %v1318_v7, 0  ;;  %v1315_v19 = vld [vmem:[%s1601_s1 + $0x18] sm:$0xff] (!%p211_p3)   ;;  %v1320_v36 = vld [vmem:[%s1601_s1 + $0x30] sm:$0xff] (!%p211_p3)   ;;  %p262_p6 = scmp.lt.s32.totalorder (!%p211_p3), %s1356_s18, 2 }
   0xd   : > { %1198 = vmatprep.mubr.msk.bf16.mxu0 (!%p211_p3), %vm1375_vm1, %v1374_v1  ;;  %1206 = vmatprep.mubr.msk.bf16.mxu1 (!%p211_p3), %vm1375_vm1, %v1374_v1  ;;  %v1317_v20 = vld [vmem:[%s1601_s1 + $0x20] ss:$0 sps:$4 sm:$0x33] (!%p211_p3)   ;;  %v1323_v24 = vld [vmem:[%s1601_s1 + $0x44] ss:$0 sps:$4 sm:$0x33] (!%p211_p3)  }
   0xe   : > { %v1321_v23 = vld [vmem:[%s1601_s1 + $0x3c] sm:$0xff] (!%p211_p3)   ;;  %v441_v29 = vsel (!%p211_p3), %vm320_vm0, %v1317_v20, 0  ;;  %v645_v32 = vsel (!%p211_p3), %vm320_vm0, %v1323_v24, 0  ;;  %v1322_v37 = vld [vmem:[%s1601_s1 + $0x38] ss:$0 sps:$4 sm:$0x33] (!%p211_p3)  }
   0xf   : > { %1197 = vmatpush3.bf16.msra.mxu0 (!%p211_p3), %v322_v5  ;;  %1205 = vmatpush3.bf16.msra.mxu1 (!%p211_p3), %v377_v6  ;;  %v1327_v40 = vld [vmem:[%s1601_s1 + $0x54] sm:$0xff] (!%p211_p3)   ;;  %v1329_v43 = vld [vmem:[%s1601_s1 + $0x5c] ss:$0 sps:$4 sm:$0x33] (!%p211_p3)   ;;  %v580_v44 = vsel (!%p211_p3), %vm320_vm0, %v1322_v37, 0  ;;  %v1325_v49 = vld [vmem:[%s1601_s1 + $0x48] sm:$0xff] (!%p211_p3)  }
  0x10   : > { %s1617_s19 = smov (!%p255_p5, %s1360_s19), 1  ;;  %1210 = vmatprep.subr.bf16.mxu0 %v1374_v1  ;;  %1218 = vmatprep.subr.bf16.mxu1 %v1374_v1  ;;  %v784_v48 = vsel %vm320_vm0, %v1329_v43, 0  ;;  %v1328_v50 = vld [vmem:[%s1601_s1 + $0x50] ss:$0 sps:$4 sm:$0x33]   ;;  %v1330_v54 = vld [vmem:[%s1601_s1 + $0x60] sm:$0xff]  }
  0x11   : > { %s1266_s8 = smul.u32 40, %s1617_s19  ;;  %v710_v52 = vsel %vm320_vm0, %v1328_v50, 0  ;;  %v1332_v56 = vld [vmem:[%s1601_s1 + $0x68] ss:$0 sps:$4 sm:$0x33]   ;;  %s1619_s18 = smov (!%p262_p6, %s1356_s18), 2 }
  0x12   : > { %v849_v58 = vsel %vm320_vm0, %v1332_v56, 0 }
  0x13   : > { %s259_s14 = scalar_lea.vmem %s1600_s0, %s1266_s8 }
  0x14   : > { %s1479_s17 = scalar_lea.vmem %s259_s14, %s1166_s9 }
  0x15   : > { %v286_v9 = vld [vmem:[%s1479_s17] sm:$0xf]  ;;  %v290_v10 = vld [vmem:[%s1479_s17 + $0x4] sm:$0x1]  ;;  %v1114_v16 = vld [vmem:[%s1479_s17 + $0x8] sm:$0xf] }
  0x16   : > { %v1099_v11 = vcombine.low %v286_v9, %v290_v10  ;;  %1207 = vmatmul.mubr.msk.bf16.vlgmr.msra.gmra.mrb[0].mxu1 %vm316_vm2, %v286_v9  ;;  %v419_v15 = vld [vmem:[%s1479_s17] sm:$0xe]  ;;  %v1121_v17 = vld [vmem:[%s1479_s17 + $0x8] sm:$0xf]  ;;  %v1122_v21 = vld [vmem:[%s1479_s17 + $0xc] sm:$0x1] }
  0x17   : > { %1219 = vmatpush3.bf16.msra.mxu1 %v1316_v8  ;;  %1222 = vmatprep.mubr.msk.bf16.mxu1 %vm1375_vm1, %v1374_v1  ;;  %v1130_v25 = vld [vmem:[%s1479_s17 + $0x8] sm:$0xe]  ;;  %v1109_v26 = vcombine.low %v419_v15, %v290_v10  ;;  %v1126_v27 = vcombine.low %v1121_v17, %v1122_v21  ;;  %v1146_v28 = vld [vmem:[%s1479_s17 + $0x10] sm:$0xf]  ;;  %v1147_v31 = vld [vmem:[%s1479_s17 + $0x14] sm:$0x1] }
  0x18   : > { %v301_v12 = vshrl.u32 %v1099_v11, 16  ;;  %v303_v13 = vshll.u32 %v1099_v11, 16  ;;  %1220 = vmatprep.subr.bf16.mxu1 %v1374_v1  ;;  %v1134_v30 = vcombine.low %v1130_v25, %v1122_v21  ;;  %v1151_v33 = vcombine.low %v1146_v28, %v1147_v31  ;;  %v1139_v53 = vld [vmem:[%s1479_s17 + $0x10] sm:$0xf] }
  0x19   : > { %v427_v34 = vrot.slane %v1109_v26, 1  ;;  %v563_v35 = vshll.u32 %v1126_v27, 16  ;;  %v561_v41 = vshrl.u32 %v1126_v27, 16  ;;  %v1155_v55 = vld [vmem:[%s1479_s17 + $0x10] sm:$0xe]  ;;  %s1267_s17 = smul.u32 3, %s1617_s19 }
  0x1a   : > { %v305_v18 = vrot.slane %v303_v13, 1  ;;  %v631_v38 = vrot.slane %v1134_v30, 1  ;;  %v767_v39 = vshll.u32 %v1151_v33, 16  ;;  %v765_v45 = vshrl.u32 %v1151_v33, 16 }
  0x1b   : > { %1221 = vmatpush3.bf16.msra.mxu1 %v506_v14  ;;  %v565_v42 = vrot.slane %v563_v35, 1  ;;  %v1159_v57 = vcombine.low %v1155_v55, %v1147_v31  ;;  %s265_s7 = sadd.s32 %s1267_s17, %s1619_s18 }
  0x1c   : > { %v306_v22 = vor.u32 %v305_v18, %v301_v12  ;;  %1234 = vmatprep.subr.bf16.mxu1 %v1374_v1  ;;  %v769_v46 = vrot.slane %v767_v39, 1  ;;  %s1093_s10 = sshll.u32 %s265_s7, 2  ;;  %s274_s14 = scalar_lea.vmem %s1604_s4, %s265_s7 }
  0x1d   : > { %v566_v47 = vor.u32 %v565_v42, %v561_v41  ;;  %v835_v59 = vrot.slane %v1159_v57, 1  ;;  %s267_s19 = scalar_lea.vmem %s1603_s3, %s1093_s10  ;;  %s281_s25 = scalar_lea.vmem %s1605_s5, %s265_s7 }
  0x1e   : > { %1199 = vmatmul.mubr.msk.bf16.vlgmr.msra.gmra.mrb[0].mxu0 %vm316_vm2, %v306_v22  ;;  %1223 = vmatmul.mubr.msk.bf16.vlgmr.msra.gmra.mrb[4].mxu1 %vm316_vm2, %v1114_v16  ;;  %v770_v51 = vor.u32 %v769_v46, %v765_v45 }
  0x1f   : > { %1211 = vmatpush3.bf16.msra.mxu0 %v1315_v19  ;;  %1214 = vmatprep.mubr.msk.bf16.mxu0 %vm1375_vm1, %v1374_v1 }
  0x20   : > { %1212 = vmatprep.subr.bf16.mxu0 %v1374_v1  ;;  %1235 = vmatpush3.bf16.msra.mxu1 %v1321_v23 }
  0x21   : > { %1236 = vmatprep.subr.bf16.mxu1 %v1374_v1  ;;  %1238 = vmatprep.mubr.msk.bf16.mxu1 %vm1375_vm1, %v1374_v1 }
  0x23   : > { %1213 = vmatpush3.bf16.msra.mxu0 %v441_v29 }
  0x24   : > { %1226 = vmatprep.subr.bf16.mxu0 %v1374_v1  ;;  %1237 = vmatpush3.bf16.msra.mxu1 %v645_v32 }
  0x25   : > { %1250 = vmatprep.subr.bf16.mxu1 %v1374_v1 }
  0x26   : > { %1215 = vmatmul.mubr.msk.bf16.vlgmr.msra.gmra.mrb[4].mxu0 %vm316_vm2, %v427_v34 }
  0x27   : > { %1227 = vmatpush3.bf16.msra.mxu0 %v1320_v36  ;;  %1230 = vmatprep.mubr.msk.bf16.mxu0 %vm1375_vm1, %v1374_v1  ;;  %v1163_v36 = vld [vmem:[%s1602_s2] ss:$0 sm:$0xff] }
  0x28   : > { %1228 = vmatprep.subr.bf16.mxu0 %v1374_v1  ;;  %1239 = vmatmul.mubr.msk.bf16.vlgmr.msra.gmra.mrb[8].mxu1 %vm316_vm2, %v631_v38 }
  0x29   : > { %1251 = vmatpush3.bf16.msra.mxu1 %v1327_v40  ;;  %1254 = vmatprep.mubr.msk.bf16.mxu1 %vm1375_vm1, %v1374_v1 }
  0x2a   : > { %1252 = vmatprep.subr.bf16.mxu1 %v1374_v1 }
  0x2b   : > { %1229 = vmatpush3.bf16.msra.mxu0 %v580_v44 }
  0x2c   : > { %1242 = vmatprep.subr.bf16.mxu0 %v1374_v1 }
  0x2d   : > { %1253 = vmatpush3.bf16.msra.mxu1 %v784_v48 }
  0x2e   : > { %1231 = vmatmul.mubr.msk.bf16.vlgmr.msra.gmra.mrb[8].mxu0 %vm316_vm2, %v566_v47 }
  0x2f   : > { %1243 = vmatpush3.bf16.msra.mxu0 %v1325_v49  ;;  %1246 = vmatprep.mubr.msk.bf16.mxu0 %vm1375_vm1, %v1374_v1 }
  0x30   : > { %1244 = vmatprep.subr.bf16.mxu0 %v1374_v1  ;;  %1255 = vmatmul.mubr.msk.bf16.vlgmr.msra.gmra.mrb[12].mxu1 %vm316_vm2, %v770_v51 }
  0x33   : > { %1245 = vmatpush3.bf16.msra.mxu0 %v710_v52 }
  0x34   : > { %1258 = vmatprep.subr.bf16.mxu0 %v1374_v1 }
  0x36   : > { %1247 = vmatmul.mubr.msk.bf16.vlgmr.msra.gmra.mrb[12].mxu0 %vm316_vm2, %v1139_v53 }
  0x37   : > { %1259 = vmatpush3.bf16.msra.mxu0 %v1330_v54  ;;  %1262 = vmatprep.mubr.msk.bf16.mxu0 %vm1375_vm1, %v1374_v1 }
  0x38   : > { %1260 = vmatprep.subr.bf16.mxu0 %v1374_v1 }
  0x3b   : > { %1261 = vmatpush3.bf16.msra.mxu0 %v849_v58 }
  0x3e   : > { %1263 = vmatmul.mubr.msk.bf16.vlgmr.msra.gmra.mrb[16].mxu0 %vm316_vm2, %v835_v59 }
  0xe9   : > { %v413_v60 = vpop.f32.mrb[0].mxu1 }
  0xea   : > { %v1208_v61 = vpop.f32.mrb[1].mxu1 }
  0xeb   : > { %v416_v62 = vpop.f32.mrb[2].mxu1 }
  0xec   : > { %v1209_v63 = vpop.f32.mrb[3].mxu1 }
  0xf1   : > { %v358_v0 = vpop.f32.mrb[0].mxu0  ;;  %v542_v2 = vpop.f32.mrb[4].mxu1 }
  0xf2   : > { %v414_v3 = vadd.f32 %v413_v60, %v358_v0  ;;  %v1200_v4 = vpop.f32.mrb[1].mxu0  ;;  %v1224_v5 = vpop.f32.mrb[5].mxu1 }
  0xf3   : > { %v361_v6 = vpop.f32.mrb[2].mxu0  ;;  %v545_v7 = vpop.f32.mrb[6].mxu1 }
  0xf4   : > { %v1201_v8 = vpop.f32.mrb[3].mxu0  ;;  %v1225_v9 = vpop.f32.mrb[7].mxu1 }
  0xf9   : > { %v477_v1 = vpop.f32.mrb[4].mxu0 }
  0xfa   : > { %v483_v10 = vadd.f32 %v477_v1, %v414_v3  ;;  %v1216_v11 = vpop.f32.mrb[5].mxu0 }
  0xfb   : > { %v480_v12 = vpop.f32.mrb[6].mxu0  ;;  %v681_v13 = vpop.f32.mrb[8].mxu1 }
  0xfc   : > { %v548_v14 = vadd.f32 %v542_v2, %v483_v10  ;;  %v1217_v15 = vpop.f32.mrb[7].mxu0  ;;  %v1240_v16 = vpop.f32.mrb[9].mxu1 }
  0xfd   : > { %v684_v17 = vpop.f32.mrb[10].mxu1 }
  0xfe   : > { %v1241_v18 = vpop.f32.mrb[11].mxu1 }
 0x101   : > { %v616_v19 = vpop.f32.mrb[8].mxu0 }
 0x102   : > { %v622_v20 = vadd.f32 %v616_v19, %v548_v14  ;;  %v1232_v21 = vpop.f32.mrb[9].mxu0 }
 0x103   : > { %v619_v22 = vpop.f32.mrb[10].mxu0  ;;  %v820_v23 = vpop.f32.mrb[12].mxu1 }
 0x104   : > { %v687_v24 = vadd.f32 %v681_v13, %v622_v20  ;;  %v1233_v25 = vpop.f32.mrb[11].mxu0  ;;  %v1256_v26 = vpop.f32.mrb[13].mxu1 }
 0x105   : > { %v823_v27 = vpop.f32.mrb[14].mxu1 }
 0x106   : > { %v1257_v28 = vpop.f32.mrb[15].mxu1 }
 0x109   : > { %v746_v29 = vpop.f32.mrb[12].mxu0 }
 0x10a   : > { %v752_v30 = vadd.f32 %v746_v29, %v687_v24  ;;  %v1248_v31 = vpop.f32.mrb[13].mxu0 }
 0x10b   : > { %v749_v32 = vpop.f32.mrb[14].mxu0 }
 0x10c   : > { %v826_v33 = vadd.f32 %v820_v23, %v752_v30  ;;  %v1249_v34 = vpop.f32.mrb[15].mxu0 }
 0x111   : > { %v885_v35 = vpop.f32.mrb[16].mxu0 }
 0x112   : > { %v891_v37 = vadd.f32 %v885_v35, %v826_v33  ;;  %v1264_v38 = vpop.f32.mrb[17].mxu0 }
 0x113   : > { %v888_v39 = vpop.f32.mrb[18].mxu0 }
 0x114   : > { %v899_v40 = vadd.f32 %v1163_v36, %v891_v37  ;;  %v1265_v41 = vpop.f32.mrb[19].mxu0 }
 0x116   : > { %v900_v42 = vpack.c.bf16 %v899_v40, %v899_v40  ;;  %v902_v43 = vrot.slane %v899_v40, 4  ;;  %v909_v44 = vmul.f32 %v899_v40, %v899_v40 }
 0x118   : > { %901 = vst [vmem:[%s267_s19] sm:$0xf] %v900_v42  ;;  %v903_v45 = vadd.f32 %v902_v43, %v899_v40  ;;  %v910_v46 = vrot.slane %v909_v44, 4 }
 0x11a   : > { %v904_v47 = vrot.slane %v903_v45, 2  ;;  %v911_v48 = vadd.f32 %v910_v46, %v909_v44 }
 0x11c   : > { %v905_v49 = vadd.f32 %v904_v47, %v903_v45  ;;  %v912_v50 = vrot.slane %v911_v48, 2 }
 0x11e   : > { %v906_v51 = vrot.slane %v905_v49, 1  ;;  %v913_v52 = vadd.f32 %v912_v50, %v911_v48 }
 0x120   : > { %v907_v53 = vadd.f32 %v906_v51, %v905_v49  ;;  %v914_v54 = vrot.slane %v913_v52, 1 }
 0x122   : > { %908 = vst [vmem:[%s274_s14] sm:$0x1] %v907_v53  ;;  %v915_v55 = vadd.f32 %v914_v54, %v913_v52 }
 0x124   : > { %916 = vst [vmem:[%s281_s25] sm:$0x1] %v915_v55 }
 0x125 PF: > { %s16_s22 = sadd.s32 1, %s1372_s22   ;;  %s1606_s18 = smov %s1364_s20 }
 0x126   : > { %p13_p7 = scmp.ge.s32.totalorder %s16_s22, 8   ;;  %s1607_s19 = smov %s1368_s21 }
 0x127   : > { %s1608_s20 = smov %s1611_s23  ;;  %s1609_s21 = smov %s1615_s24 }
 0x128   :  { %15 = sbr.rel (!%p13_p7) target bundleno = 3 (0x3), region = 97 }

// kernel: model_forward.11
= control target key start
LH: loop header
LB: loop body
LE: loop exit
PB: predicated region body
PF: predicated region fallthrough
CT: control target
= control target key end

     0   :  { %s741_s18 = smov 0   ;;  %s743_s19 = smov 0   ;;  %s817_s0 = inlined_call_operand.vmem [shape: bf16[2,3,8,16], index: 0, kind: input, shape index: {}]   ;;  %s818_s1 = inlined_call_operand.vmem [shape: bf16[2,16,128], index: 1, kind: input, shape index: {}]   ;;  %s819_s2 = inlined_call_operand.vmem [shape: f32[1,128], index: 2, kind: input, shape index: {}]   ;;  %s820_s3 = inlined_call_operand.vmem [shape: bf16[2,2,8,128], index: 3, kind: output, shape index: {0}]   ;;  %s821_s4 = inlined_call_operand.vmem [shape: f32[2,2,1,128], index: 4, kind: output, shape index: {1}]   ;;  %s822_s5 = inlined_call_operand.vmem [shape: f32[2,2,1,128], index: 5, kind: output, shape index: {2}]  }
   0x1   :  { %s745_s20 = smov 0   ;;  %s747_s21 = smov 0  }
   0x2   :  { %s749_s22 = smov 0  }
   0x3 LB: > { %s25_s23 = sadd.s32 1, %s699_s20  ;;  %s28_s24 = sadd.s32 1, %s703_s21  ;;  %s707_s22 = sphi %s749_s22, %s16_s22   ;;  %s703_s21 = sphi %s747_s21, %s826_s21   ;;  %s699_s20 = sphi %s745_s20, %s825_s20   ;;  %s695_s19 = sphi %s743_s19, %s824_s19   ;;  %s691_s18 = sphi %s741_s18, %s823_s18  }
   0x4   : > { %p26_p0 = scmp.ge.s32.totalorder %s25_s23, 2  ;;  %p590_p1 = scmp.ge.s32.totalorder %s707_s22, 1 }
   0x5   : > { %p210_p2 = scmp.lt.s32.totalorder %s707_s22, 5 }
   0x6   : > { %s828_s23 = smov (%p26_p0, %s25_s23), 0  ;;  %s830_s24 = smov (!%p26_p0, %s28_s24), %s703_s21 }
   0x7   : > { %p211_p3 = pnand %p590_p1, %p210_p2  ;;  %p30_p4 = scmp.ge.s32.totalorder %s830_s24, 2 }
   0x8   : > { %v667_v0 = vld [vmem:[%s818_s1 + $0x8] sm:$0xff] (!%p211_p3)   ;;  %v709_v1 = vmov (!%p211_p3), 0.0   ;;  %v668_v2 = vld [vmem:[%s818_s1] sm:$0xff] (!%p211_p3)   ;;  %vm710_vm0 = vmmov (!%p211_p3), 0   ;;  %p255_p5 = scmp.lt.s32.totalorder (!%p211_p3), %s695_s19, 1  ;;  %s596_s30 = sshll.u32 (!%p211_p3), %s691_s18, 2 }
   0x9   : > { %s832_s24 = smov (%p30_p4, %s830_s24), 0  ;;  %214 = sbr.rel (%p211_p3) target bundleno = 253 (0xfd), region = 32 }
   0xa   : > { %612 = vmatprep.subr.bf16.mxu0 (!%p211_p3), %v709_v1  ;;  %618 = vmatprep.subr.bf16.mxu1 (!%p211_p3), %v709_v1  ;;  %vm301_vm1 = vcmask (!%p211_p3), 130048   ;;  %p262_p6 = scmp.lt.s32.totalorder (!%p211_p3), %s691_s18, 1  ;;  %v605_v7 = vld [vmem:[%s819_s2] ss:$0 sm:$0xff] (!%p211_p3) }
   0xb   : > { %613 = vmatpush3.bf16.msra.mxu0 (!%p211_p3), %v667_v0  ;;  %614 = vmatprep.mubr.msk.bf16.mxu0 (!%p211_p3), %vm710_vm0, %v709_v1 }
   0xc   : > { %619 = vmatpush3.bf16.msra.mxu1 (!%p211_p3), %v668_v2  ;;  %620 = vmatprep.mubr.msk.bf16.mxu1 (!%p211_p3), %vm710_vm0, %v709_v1 }
  0x10   : > { %s834_s19 = smov (!%p255_p5, %s695_s19), 1  ;;  %s836_s18 = smov (!%p262_p6, %s691_s18), 1 }
  0x11   : > { %s624_s29 = smul.u32 12, %s834_s19  ;;  %s592_s10 = sshll.u32 %s834_s19, 1 }
  0x12   : > { %s785_s11 = sadd.s32 %s592_s10, %s836_s18 }
  0x13   : > { %s259_s8 = scalar_lea.vmem %s817_s0, %s624_s29  ;;  %s593_s14 = sshll.u32 %s785_s11, 2 }
  0x14   : > { %s284_s9 = scalar_lea.vmem %s259_s8, %s596_s30  ;;  %s267_s17 = scalar_lea.vmem %s820_s3, %s593_s14 }
  0x15   : > { %v598_v3 = vld [vmem:[%s284_s9 + $0x4] sm:$0xf]  ;;  %v285_v4 = vld [vmem:[%s284_s9] sm:$0xf]  ;;  %s274_s25 = scalar_lea.vmem %s821_s4, %s785_s11  ;;  %s281_s28 = scalar_lea.vmem %s822_s5, %s785_s11 }
  0x16   : > { %615 = vmatmul.mubr.msk.bf16.vlgmr.msra.gmra.mrb[0].mxu0 %vm301_vm1, %v598_v3  ;;  %621 = vmatmul.mubr.msk.bf16.vlgmr.msra.gmra.mrb[0].mxu1 %vm301_vm1, %v285_v4 }
  0xe9   : > { %v339_v5 = vpop.f32.mrb[0].mxu0  ;;  %v388_v6 = vpop.f32.mrb[0].mxu1 }
  0xea   : > { %v389_v8 = vadd.f32 %v388_v6, %v339_v5  ;;  %v616_v9 = vpop.f32.mrb[1].mxu0  ;;  %v622_v10 = vpop.f32.mrb[1].mxu1 }
  0xeb   : > { %v342_v11 = vpop.f32.mrb[2].mxu0  ;;  %v391_v12 = vpop.f32.mrb[2].mxu1 }
  0xec   : > { %v401_v13 = vadd.f32 %v605_v7, %v389_v8  ;;  %v617_v14 = vpop.f32.mrb[3].mxu0  ;;  %v623_v15 = vpop.f32.mrb[3].mxu1 }
  0xee   : > { %v402_v16 = vpack.c.bf16 %v401_v13, %v401_v13  ;;  %v404_v17 = vrot.slane %v401_v13, 4  ;;  %v411_v18 = vmul.f32 %v401_v13, %v401_v13 }
  0xf0   : > { %403 = vst [vmem:[%s267_s17] sm:$0xf] %v402_v16  ;;  %v405_v19 = vadd.f32 %v404_v17, %v401_v13  ;;  %v412_v20 = vrot.slane %v411_v18, 4 }
  0xf2   : > { %v406_v21 = vrot.slane %v405_v19, 2  ;;  %v413_v22 = vadd.f32 %v412_v20, %v411_v18 }
  0xf4   : > { %v407_v23 = vadd.f32 %v406_v21, %v405_v19  ;;  %v414_v24 = vrot.slane %v413_v22, 2 }
  0xf6   : > { %v408_v25 = vrot.slane %v407_v23, 1  ;;  %v415_v26 = vadd.f32 %v414_v24, %v413_v22 }
  0xf8   : > { %v409_v27 = vadd.f32 %v408_v25, %v407_v23  ;;  %v416_v28 = vrot.slane %v415_v26, 1 }
  0xfa   : > { %410 = vst [vmem:[%s274_s25] sm:$0x1] %v409_v27  ;;  %v417_v29 = vadd.f32 %v416_v28, %v415_v26 }
  0xfc   : > { %418 = vst [vmem:[%s281_s28] sm:$0x1] %v417_v29 }
  0xfd PF: > { %s16_s22 = sadd.s32 1, %s707_s22   ;;  %s823_s18 = smov %s699_s20 }
  0xfe   : > { %p13_p7 = scmp.ge.s32.totalorder %s16_s22, 6   ;;  %s824_s19 = smov %s703_s21 }
  0xff   : > { %s825_s20 = smov %s828_s23  ;;  %s826_s21 = smov %s832_s24 }
 0x100   :  { %15 = sbr.rel (!%p13_p7) target bundleno = 3 (0x3), region = 89 }

// kernel: model_forward.12
= control target key start
LH: loop header
LB: loop body
LE: loop exit
PB: predicated region body
PF: predicated region fallthrough
CT: control target
= control target key end

     0   :  { %s148_s0 = inlined_call_operand.vmem [shape: bf16[32,128], index: 0, kind: input, shape index: {}]   ;;  %s149_s1 = inlined_call_operand.vmem [shape: f32[1,128], index: 1, kind: input, shape index: {}]   ;;  %s150_s2 = inlined_call_operand.vmem [shape: f32[1,128], index: 2, kind: input, shape index: {}]   ;;  %s151_s3 = inlined_call_operand.vmem [shape: bf16[32,128], index: 3, kind: output, shape index: {}]  }
   0x1   :  { %v91_v0 = vld [vmem:[%s148_s0] sm:$0xff]   ;;  %v108_v4 = vld [vmem:[%s148_s0 + $0x8] sm:$0xff]  }
   0x2   :  { %v80_v1 = vld [vmem:[%s149_s1] ss:$0 sm:$0xff]  ;;  %v92_v2 = vunpack.c.l.bf16 %v91_v0  ;;  %v93_v3 = vunpack.c.h.bf16 %v91_v0  ;;  %v96_v6 = vunpack.c.l.bf16 %v108_v4  ;;  %v97_v7 = vunpack.c.h.bf16 %v108_v4 }
   0x3   :  { %v81_v5 = vld [vmem:[%s150_s2] ss:$0 sm:$0xff] }
   0x4   :  { %v29_v8 = vmul.f32 %v92_v2, %v80_v1  ;;  %v30_v9 = vmul.f32 %v93_v3, %v80_v1  ;;  %v31_v10 = vmul.f32 %v96_v6, %v80_v1  ;;  %v32_v11 = vmul.f32 %v97_v7, %v80_v1 }
   0x6   :  { %v40_v12 = vadd.f32 %v81_v5, %v29_v8  ;;  %v41_v13 = vadd.f32 %v81_v5, %v30_v9  ;;  %v42_v14 = vadd.f32 %v81_v5, %v31_v10  ;;  %v43_v15 = vadd.f32 %v81_v5, %v32_v11 }
   0x8   :  { %vm44_vm0 = vcmp.ge.f32.partialorder %v40_v12, 0.0  ;;  %vm45_vm1 = vcmp.ge.f32.partialorder %v41_v13, 0.0  ;;  %v48_v16 = vmul.f32 0.01, %v40_v12  ;;  %v49_v17 = vmul.f32 0.01, %v41_v13 }
   0x9   :  { %vm46_vm2 = vcmp.ge.f32.partialorder %v42_v14, 0.0  ;;  %vm47_vm3 = vcmp.ge.f32.partialorder %v43_v15, 0.0  ;;  %v50_v18 = vmul.f32 0.01, %v42_v14  ;;  %v51_v19 = vmul.f32 0.01, %v43_v15 }
   0xa   :  { %v52_v20 = vsel %vm44_vm0, %v40_v12, %v48_v16  ;;  %v53_v21 = vsel %vm45_vm1, %v41_v13, %v49_v17 }
   0xb   :  { %v101_v22 = vpack.c.bf16 %v53_v21, %v52_v20  ;;  %v54_v23 = vsel %vm46_vm2, %v42_v14, %v50_v18  ;;  %v55_v24 = vsel %vm47_vm3, %v43_v15, %v51_v19 }
   0xc   :  { %v106_v25 = vpack.c.bf16 %v55_v24, %v54_v23 }
   0xd   :  { %102 = vst [vmem:[%s151_s3] sm:$0xff] %v101_v22  }
   0xe   :  { %109 = vst [vmem:[%s151_s3 + $0x8] sm:$0xff] %v106_v25  }

// kernel: model_forward.13
= control target key start
LH: loop header
LB: loop body
LE: loop exit
PB: predicated region body
PF: predicated region fallthrough
CT: control target
= control target key end

     0   :  { %s2253_s18 = smov 0   ;;  %s2255_s19 = smov 0   ;;  %s2744_s0 = inlined_call_operand.vmem [shape: bf16[2,5,10,160], index: 0, kind: input, shape index: {}]   ;;  %s2745_s1 = inlined_call_operand.vmem [shape: bf16[9,160,128], index: 1, kind: input, shape index: {}]   ;;  %s2746_s2 = inlined_call_operand.vmem [shape: f32[1,128], index: 2, kind: input, shape index: {}]   ;;  %s2747_s3 = inlined_call_operand.vmem [shape: bf16[2,3,8,128], index: 3, kind: output, shape index: {0}]   ;;  %s2748_s4 = inlined_call_operand.vmem [shape: f32[2,3,1,128], index: 4, kind: output, shape index: {1}]   ;;  %s2749_s5 = inlined_call_operand.vmem [shape: f32[2,3,1,128], index: 5, kind: output, shape index: {2}]  }
   0x1   :  { %s2257_s20 = smov 0   ;;  %s2259_s21 = smov 0  }
   0x2   :  { %s2261_s22 = smov 0  }
   0x3 LB: > { %s25_s23 = sadd.s32 1, %s2212_s20  ;;  %s28_s24 = sadd.s32 1, %s2216_s21  ;;  %s2220_s22 = sphi %s2261_s22, %s16_s22   ;;  %s2216_s21 = sphi %s2259_s21, %s2753_s21   ;;  %s2212_s20 = sphi %s2257_s20, %s2752_s20   ;;  %s2208_s19 = sphi %s2255_s19, %s2751_s19   ;;  %s2204_s18 = sphi %s2253_s18, %s2750_s18  }
   0x4   : > { %p26_p0 = scmp.ge.s32.totalorder %s25_s23, 3  ;;  %p1735_p1 = scmp.ge.s32.totalorder %s2220_s22, 1 }
   0x5   : > { %p210_p2 = scmp.lt.s32.totalorder %s2220_s22, 7 }
   0x6   : > { %s2755_s23 = smov (%p26_p0, %s25_s23), 0  ;;  %s2757_s24 = smov (!%p26_p0, %s28_s24), %s2216_s21 }
   0x7   : > { %p211_p3 = pnand %p1735_p1, %p210_p2  ;;  %p30_p4 = scmp.ge.s32.totalorder %s2757_s24, 2 }
   0x8   : > { %v2074_v0 = vld [vmem:[%s2745_s1 + $0x50] sm:$0xff] (!%p211_p3)   ;;  %v2222_v1 = vmov (!%p211_p3), 0   ;;  %v2075_v2 = vld [vmem:[%s2745_s1] sm:$0xff] (!%p211_p3)   ;;  %v2076_v3 = vld [vmem:[%s2745_s1 + $0x58] sm:$0xff] (!%p211_p3)   ;;  %p255_p5 = scmp.lt.s32.totalorder (!%p211_p3), %s2208_s19, 1  ;;  %s2030_s29 = sshll.u32 (!%p211_p3), %s2204_s18, 4 }
   0x9   : > { %s2759_s24 = smov (%p30_p4, %s2757_s24), 0  ;;  %214 = sbr.rel (%p211_p3) target bundleno = 441 (0x1b9), region = 32 }
   0xa   : > { %416 = vmatprep.subr.bf16.mxu0 (!%p211_p3), %v2222_v1  ;;  %522 = vmatprep.subr.bf16.mxu1 (!%p211_p3), %v2222_v1  ;;  %v2077_v4 = vld [vmem:[%s2745_s1 + $0x8] sm:$0xff] (!%p211_p3)   ;;  %v2078_v5 = vld [vmem:[%s2745_s1 + $0x60] sm:$0xff] (!%p211_p3)   ;;  %v2079_v6 = vld [vmem:[%s2745_s1 + $0x10] sm:$0xff] (!%p211_p3)   ;;  %vm412_vm0 = vcmask (!%p211_p3), 261120   ;;  %p262_p6 = scmp.lt.s32.totalorder (!%p211_p3), %s2204_s18, 2 }
   0xb   : > { %417 = vmatpush1.bf16.msra.mxu0 (!%p211_p3), %v2074_v0  ;;  %523 = vmatpush1.bf16.msra.mxu1 (!%p211_p3), %v2075_v2  ;;  %v2080_v7 = vld [vmem:[%s2745_s1 + $0x68] sm:$0xff] (!%p211_p3)   ;;  %v2081_v8 = vld [vmem:[%s2745_s1 + $0x18] sm:$0xff] (!%p211_p3)   ;;  %v2082_v9 = vld [vmem:[%s2745_s1 + $0x70] sm:$0xff] (!%p211_p3)  }
   0xc   : > { %418 = vmatprep.subr.bf16.mxu0 (!%p211_p3), %v2222_v1  ;;  %524 = vmatprep.subr.bf16.mxu1 (!%p211_p3), %v2222_v1  ;;  %v2083_v10 = vld [vmem:[%s2745_s1 + $0x20] sm:$0xff] (!%p211_p3)   ;;  %v2084_v11 = vld [vmem:[%s2745_s1 + $0x78] sm:$0xff] (!%p211_p3)   ;;  %v2085_v12 = vld [vmem:[%s2745_s1 + $0x28] sm:$0xff] (!%p211_p3)  }
   0xd   : > { %v2086_v17 = vld [vmem:[%s2745_s1 + $0x80] sm:$0xff] (!%p211_p3)   ;;  %v2087_v18 = vld [vmem:[%s2745_s1 + $0x30] sm:$0xff] (!%p211_p3)   ;;  %v2088_v21 = vld [vmem:[%s2745_s1 + $0x88] sm:$0xff] (!%p211_p3)  }
   0xe   : > { %v2089_v24 = vld [vmem:[%s2745_s1 + $0x38] sm:$0xff] (!%p211_p3)   ;;  %v2090_v27 = vld [vmem:[%s2745_s1 + $0x90] sm:$0xff] (!%p211_p3)   ;;  %v2091_v28 = vld [vmem:[%s2745_s1 + $0x40] sm:$0xff] (!%p211_p3)  }
   0xf   : > { %419 = vmatpush1.bf16.msra.mxu0 (!%p211_p3), %v2076_v3  ;;  %525 = vmatpush1.bf16.msra.mxu1 (!%p211_p3), %v2077_v4  ;;  %v2092_v31 = vld [vmem:[%s2745_s1 + $0x98] sm:$0xff] (!%p211_p3)   ;;  %v2093_v32 = vld [vmem:[%s2745_s1 + $0x48] sm:$0xff] (!%p211_p3)   ;;  %v2098_v35 = vld [vmem:[%s2745_s1 + $0xa0] sm:$0xff] (!%p211_p3)  }
  0x10   : > { %s2761_s19 = smov (!%p255_p5, %s2208_s19), 1  ;;  %420 = vmatprep.subr.bf16.mxu0 %v2222_v1  ;;  %526 = vmatprep.subr.bf16.mxu1 %v2222_v1  ;;  %v2099_v36 = vld [vmem:[%s2745_s1 + $0xf0] sm:$0xff]   ;;  %v2100_v40 = vld [vmem:[%s2745_s1 + $0xa8] sm:$0xff]   ;;  %v2101_v42 = vld [vmem:[%s2745_s1 + $0xf8] sm:$0xff]   ;;  %s2763_s18 = smov (!%p262_p6, %s2204_s18), 2 }
  0x11   : > { %s2031_s14 = smul.u32 80, %s2761_s19  ;;  %v2102_v44 = vld [vmem:[%s2745_s1 + $0xb0] sm:$0xff]   ;;  %v2103_v45 = vld [vmem:[%s2745_s1 + $0x100] sm:$0xff]   ;;  %v2104_v46 = vld [vmem:[%s2745_s1 + $0xb8] sm:$0xff]  }
  0x12   : > { %v2105_v47 = vld [vmem:[%s2745_s1 + $0x108] sm:$0xff]   ;;  %v2106_v48 = vld [vmem:[%s2745_s1 + $0xc0] sm:$0xff]   ;;  %v2107_v49 = vld [vmem:[%s2745_s1 + $0x110] sm:$0xff]   ;;  %s2032_s13 = smul.u32 3, %s2761_s19 }
  0x13   : > { %421 = vmatpush1.bf16.msra.mxu0 %v2078_v5  ;;  %527 = vmatpush1.bf16.msra.mxu1 %v2079_v6  ;;  %s259_s28 = scalar_lea.vmem %s2744_s0, %s2031_s14  ;;  %v2108_v50 = vld [vmem:[%s2745_s1 + $0xc8] sm:$0xff]   ;;  %v2109_v51 = vld [vmem:[%s2745_s1 + $0x118] sm:$0xff]   ;;  %v2110_v52 = vld [vmem:[%s2745_s1 + $0xd0] sm:$0xff]  }
  0x14   : > { %422 = vmatprep.subr.bf16.mxu0 %v2222_v1  ;;  %528 = vmatprep.subr.bf16.mxu1 %v2222_v1  ;;  %s2332_s7 = scalar_lea.vmem %s259_s28, %s2030_s29  ;;  %v2111_v53 = vld [vmem:[%s2745_s1 + $0x120] sm:$0xff]   ;;  %v2112_v55 = vld [vmem:[%s2745_s1 + $0xd8] sm:$0xff]   ;;  %v2113_v56 = vld [vmem:[%s2745_s1 + $0x128] sm:$0xff]   ;;  %s265_s14 = sadd.s32 %s2032_s13, %s2763_s18 }
  0x15   : > { %v286_v13 = vld [vmem:[%s2332_s7] sm:$0xff]  ;;  %v2344_v14 = vld [vmem:[%s2332_s7 + $0x8] sm:$0x11]  ;;  %v2396_v39 = vld [vmem:[%s2332_s7 + $0x10] sm:$0xff]  ;;  %s1737_s17 = sshll.u32 %s265_s14, 2  ;;  %s274_s28 = scalar_lea.vmem %s2748_s4, %s265_s14 }
  0x16   : > { %v1761_v15 = vcombine.high %v286_v13, %v2344_v14  ;;  %v1774_v16 = vcombine.high %v286_v13, %v286_v13  ;;  %v1760_v23 = vcombine.low %v286_v13, %v2344_v14  ;;  %v1773_v34 = vcombine.low %v286_v13, %v286_v13  ;;  %v2391_v37 = vld [vmem:[%s2332_s7] sm:$0xee]  ;;  %v2451_v54 = vld [vmem:[%s2332_s7 + $0x18] sm:$0x11]  ;;  %v2115_v59 = vld [vmem:[%s2745_s1 + $0x130] sm:$0xff]   ;;  %s267_s27 = scalar_lea.vmem %s2747_s3, %s1737_s17  ;;  %s281_s6 = scalar_lea.vmem %s2749_s5, %s265_s14 }
  0x17   : > { %423 = vmatpush1.bf16.msra.mxu0 %v2080_v7  ;;  %529 = vmatpush1.bf16.msra.mxu1 %v2081_v8  ;;  %v1807_v38 = vcombine.high %v2391_v37, %v2344_v14  ;;  %v1842_v41 = vcombine.high %v2396_v39, %v2396_v39  ;;  %v1877_v57 = vcombine.high %v2396_v39, %v2451_v54  ;;  %v2114_v58 = vld [vmem:[%s2745_s1 + $0xe0] sm:$0xff]   ;;  %v2116_v61 = vld [vmem:[%s2745_s1 + $0xe8] sm:$0xff]   ;;  %v2477_v63 = vld [vmem:[%s2332_s7 + $0x10] sm:$0xee] }
  0x18   : > { %424 = vmatprep.subr.bf16.mxu0 %v2222_v1  ;;  %530 = vmatprep.subr.bf16.mxu1 %v2222_v1  ;;  %v345_v19 = vshrl.u32 %v1761_v15, 16  ;;  %v347_v20 = vshll.u32 %v1761_v15, 16  ;;  %v340_v26 = vshll.u32 %v1760_v23, 16  ;;  %v338_v29 = vshrl.u32 %v1760_v23, 16  ;;  %v2118_v0 = vld [vmem:[%s2745_s1 + $0x138] sm:$0xff]   ;;  %v2121_v6 = vld [vmem:[%s2745_s1 + $0x140] sm:$0xff]  }
  0x19   : > { %1785 = vmatprep.mubr.msk.bf16.mxu1 %vm412_vm0, %v1774_v16  ;;  %v590_v43 = vrot.slane %v1807_v38, 1  ;;  %v873_v60 = vshll.u32 %v1877_v57, 16  ;;  %v1806_v62 = vcombine.low %v2391_v37, %v2344_v14  ;;  %v871_v2 = vshrl.u32 %v1877_v57, 16  ;;  %v2123_v8 = vld [vmem:[%s2745_s1 + $0x190] sm:$0xff]   ;;  %v2127_v14 = vld [vmem:[%s2745_s1 + $0x1a0] sm:$0xff]   ;;  %v2128_v15 = vld [vmem:[%s2745_s1 + $0x158] sm:$0xff]  }
  0x1a   : > { %v349_v22 = vrot.slane %v347_v20, 1  ;;  %v342_v30 = vrot.slane %v340_v26, 1  ;;  %v1911_v5 = vcombine.high %v2477_v63, %v2451_v54  ;;  %v1841_v7 = vcombine.low %v2396_v39, %v2396_v39  ;;  %v2126_v13 = vld [vmem:[%s2745_s1 + $0x150] sm:$0xff]   ;;  %v2129_v16 = vld [vmem:[%s2745_s1 + $0x1a8] sm:$0xff]   ;;  %v2133_v20 = vld [vmem:[%s2745_s1 + $0x1b8] sm:$0xff]  }
  0x1b   : > { %425 = vmatpush1.bf16.msra.mxu0 %v2082_v9  ;;  %531 = vmatpush1.bf16.msra.mxu1 %v2083_v10  ;;  %v875_v3 = vrot.slane %v873_v60, 1  ;;  %v589_v4 = vrot.slane %v1806_v62, 1  ;;  %v1876_v23 = vcombine.low %v2396_v39, %v2451_v54  ;;  %v2555_v26 = vld [vmem:[%s2332_s7 + $0x28] sm:$0x11]  ;;  %v2142_v37 = vld [vmem:[%s2745_s1 + $0x1d8] sm:$0xff]   ;;  %v2159_v57 = vld [vmem:[%s2745_s1 + $0x260] sm:$0xff]  }
  0x1c   : > { %426 = vmatprep.subr.bf16.mxu0 %v2222_v1  ;;  %532 = vmatprep.subr.bf16.mxu1 %v2222_v1  ;;  %v350_v25 = vor.u32 %v349_v22, %v345_v19  ;;  %v343_v33 = vor.u32 %v342_v30, %v338_v29  ;;  %v1010_v10 = vrot.slane %v1911_v5, 1  ;;  %v2132_v19 = vld [vmem:[%s2745_s1 + $0x168] sm:$0xff]   ;;  %v2135_v22 = vld [vmem:[%s2745_s1 + $0x1c0] sm:$0xff]   ;;  %v2166_v5 = vld [vmem:[%s2745_s1 + $0x278] sm:$0xff]  }
  0x1d   : > { %v876_v9 = vor.u32 %v875_v3, %v871_v2  ;;  %v2138_v30 = vld [vmem:[%s2745_s1 + $0x180] sm:$0xff]   ;;  %v2161_v60 = vld [vmem:[%s2745_s1 + $0x268] sm:$0xff]  }
  0x1e   : > { %1772 = vmatprep.mubr.msk.bf16.mxu0 %vm412_vm0, %v350_v25  ;;  %v2552_v25 = vld [vmem:[%s2332_s7 + $0x20] sm:$0xff]  ;;  %v2164_v2 = vld [vmem:[%s2745_s1 + $0x228] sm:$0xff]  }
  0x1f   : > { %427 = vmatpush1.bf16.msra.mxu0 %v2084_v11  ;;  %533 = vmatpush1.bf16.msra.mxu1 %v2085_v12  ;;  %v2124_v11 = vld [vmem:[%s2745_s1 + $0x148] sm:$0xff]   ;;  %v2125_v12 = vld [vmem:[%s2745_s1 + $0x198] sm:$0xff]   ;;  %v1981_v29 = vcombine.high %v2552_v25, %v2555_v26 }
  0x20   : > { %428 = vmatprep.subr.bf16.mxu0 %v2222_v1  ;;  %534 = vmatprep.subr.bf16.mxu1 %v2222_v1 }
  0x21   : > { %v1291_v39 = vshrl.u32 %v1981_v29, 16 }
  0x23   : > { %429 = vmatpush1.bf16.msra.mxu0 %v2086_v17  ;;  %535 = vmatpush1.bf16.msra.mxu1 %v2087_v18  ;;  %v2130_v17 = vld [vmem:[%s2745_s1 + $0x160] sm:$0xff]   ;;  %v2131_v18 = vld [vmem:[%s2745_s1 + $0x1b0] sm:$0xff]  }
  0x24   : > { %430 = vmatprep.subr.bf16.mxu0 %v2222_v1  ;;  %536 = vmatprep.subr.bf16.mxu1 %v2222_v1 }
  0x27   : > { %431 = vmatpush1.bf16.msra.mxu0 %v2088_v21  ;;  %537 = vmatpush1.bf16.msra.mxu1 %v2089_v24  ;;  %v2134_v21 = vld [vmem:[%s2745_s1 + $0x170] sm:$0xff]   ;;  %v2136_v24 = vld [vmem:[%s2745_s1 + $0x178] sm:$0xff]  }
  0x28   : > { %432 = vmatprep.subr.bf16.mxu0 %v2222_v1  ;;  %538 = vmatprep.subr.bf16.mxu1 %v2222_v1 }
  0x2b   : > { %433 = vmatpush1.bf16.msra.mxu0 %v2090_v27  ;;  %539 = vmatpush1.bf16.msra.mxu1 %v2091_v28  ;;  %v2137_v27 = vld [vmem:[%s2745_s1 + $0x1c8] sm:$0xff]   ;;  %v866_v28 = vshll.u32 %v1876_v23, 16 }
  0x2c   : > { %434 = vmatprep.subr.bf16.mxu0 %v2222_v1  ;;  %540 = vmatprep.subr.bf16.mxu1 %v2222_v1 }
  0x2f   : > { %435 = vmatpush1.bf16.msra.mxu0 %v2092_v31  ;;  %541 = vmatpush1.bf16.msra.mxu1 %v2093_v32  ;;  %v2139_v31 = vld [vmem:[%s2745_s1 + $0x1d0] sm:$0xff]   ;;  %v864_v32 = vshrl.u32 %v1876_v23, 16 }
  0x30   : > { %655 = vmatprep.subr.bf16.mxu0 %v2222_v1  ;;  %791 = vmatprep.subr.bf16.mxu1 %v2222_v1 }
  0x32   : > { %449 = vmatmul.mubr.bf16.vlgmr.msra.gmra.mrb[0].mxu0 %v343_v33  ;;  %555 = vmatmul.mubr.bf16.vlgmr.msra.gmra.mrb[0].mxu1 %v1773_v34  ;;  %v868_v33 = vrot.slane %v866_v28, 1  ;;  %v1293_v34 = vshll.u32 %v1981_v29, 16 }
  0x33   : > { %656 = vmatpush1.bf16.msra.mxu0 %v2098_v35  ;;  %792 = vmatpush1.bf16.msra.mxu1 %v2099_v36  ;;  %v2140_v35 = vld [vmem:[%s2745_s1 + $0x188] sm:$0xff]   ;;  %v1910_v36 = vcombine.low %v2477_v63, %v2451_v54  ;;  %v2163_v63 = vld [vmem:[%s2745_s1 + $0x270] sm:$0xff]  }
  0x34   : > { %657 = vmatprep.subr.bf16.mxu0 %v2222_v1  ;;  %793 = vmatprep.subr.bf16.mxu1 %v2222_v1  ;;  %v869_v38 = vor.u32 %v868_v33, %v864_v32  ;;  %v2156_v54 = vld [vmem:[%s2745_s1 + $0x208] sm:$0xff]  }
  0x35   : > { %1853 = vmatprep.mubr.msk.bf16.mxu1 %vm412_vm0, %v1842_v41  ;;  %1818 = vmatprep.mubr.msk.bf16.mxu0 %vm412_vm0, %v590_v43  ;;  %v2145_v41 = vld [vmem:[%s2745_s1 + $0x1e0] sm:$0xff]   ;;  %v2147_v43 = vld [vmem:[%s2745_s1 + $0x230] sm:$0xff]  }
  0x37   : > { %658 = vmatpush1.bf16.msra.mxu0 %v2100_v40  ;;  %794 = vmatpush1.bf16.msra.mxu1 %v2101_v42  ;;  %v1295_v40 = vrot.slane %v1293_v34, 1  ;;  %v1009_v42 = vrot.slane %v1910_v36, 1 }
  0x38   : > { %659 = vmatprep.subr.bf16.mxu0 %v2222_v1  ;;  %795 = vmatprep.subr.bf16.mxu1 %v2222_v1 }
  0x3b   : > { %660 = vmatpush1.bf16.msra.mxu0 %v2102_v44  ;;  %796 = vmatpush1.bf16.msra.mxu1 %v2103_v45  ;;  %v1946_v44 = vcombine.high %v2552_v25, %v2552_v25  ;;  %v1296_v45 = vor.u32 %v1295_v40, %v1291_v39 }
  0x3c   : > { %661 = vmatprep.subr.bf16.mxu0 %v2222_v1  ;;  %797 = vmatprep.subr.bf16.mxu1 %v2222_v1 }
  0x3f   : > { %662 = vmatpush1.bf16.msra.mxu0 %v2104_v46  ;;  %798 = vmatpush1.bf16.msra.mxu1 %v2105_v47  ;;  %v2148_v46 = vld [vmem:[%s2745_s1 + $0x1e8] sm:$0xff]   ;;  %v2149_v47 = vld [vmem:[%s2745_s1 + $0x238] sm:$0xff]  }
  0x40   : > { %663 = vmatprep.subr.bf16.mxu0 %v2222_v1  ;;  %799 = vmatprep.subr.bf16.mxu1 %v2222_v1 }
  0x43   : > { %664 = vmatpush1.bf16.msra.mxu0 %v2106_v48  ;;  %800 = vmatpush1.bf16.msra.mxu1 %v2107_v49  ;;  %v2150_v48 = vld [vmem:[%s2745_s1 + $0x1f0] sm:$0xff]   ;;  %v2151_v49 = vld [vmem:[%s2745_s1 + $0x240] sm:$0xff]  }
  0x44   : > { %665 = vmatprep.subr.bf16.mxu0 %v2222_v1  ;;  %801 = vmatprep.subr.bf16.mxu1 %v2222_v1 }
  0x47   : > { %666 = vmatpush1.bf16.msra.mxu0 %v2108_v50  ;;  %802 = vmatpush1.bf16.msra.mxu1 %v2109_v51  ;;  %v2152_v50 = vld [vmem:[%s2745_s1 + $0x1f8] sm:$0xff]   ;;  %v2153_v51 = vld [vmem:[%s2745_s1 + $0x248] sm:$0xff]  }
  0x48   : > { %667 = vmatprep.subr.bf16.mxu0 %v2222_v1  ;;  %803 = vmatprep.subr.bf16.mxu1 %v2222_v1 }
  0x4b   : > { %668 = vmatpush1.bf16.msra.mxu0 %v2110_v52  ;;  %804 = vmatpush1.bf16.msra.mxu1 %v2111_v53  ;;  %v2154_v52 = vld [vmem:[%s2745_s1 + $0x200] sm:$0xff]   ;;  %v2155_v53 = vld [vmem:[%s2745_s1 + $0x250] sm:$0xff]  }
  0x4c   : > { %669 = vmatprep.subr.bf16.mxu0 %v2222_v1  ;;  %805 = vmatprep.subr.bf16.mxu1 %v2222_v1 }
  0x4f   : > { %670 = vmatpush1.bf16.msra.mxu0 %v2112_v55  ;;  %806 = vmatpush1.bf16.msra.mxu1 %v2113_v56  ;;  %v2157_v55 = vld [vmem:[%s2745_s1 + $0x258] sm:$0xff]   ;;  %v2158_v56 = vld [vmem:[%s2745_s1 + $0x210] sm:$0xff]  }
  0x50   : > { %671 = vmatprep.subr.bf16.mxu0 %v2222_v1  ;;  %807 = vmatprep.subr.bf16.mxu1 %v2222_v1 }
  0x53   : > { %672 = vmatpush1.bf16.msra.mxu0 %v2114_v58  ;;  %808 = vmatpush1.bf16.msra.mxu1 %v2115_v59  ;;  %v2160_v58 = vld [vmem:[%s2745_s1 + $0x218] sm:$0xff]   ;;  %v1980_v59 = vcombine.low %v2552_v25, %v2555_v26 }
  0x54   : > { %673 = vmatprep.subr.bf16.mxu0 %v2222_v1  ;;  %809 = vmatprep.subr.bf16.mxu1 %v2222_v1 }
  0x55   : > { %v1286_v62 = vshll.u32 %v1980_v59, 16  ;;  %v1284_v3 = vshrl.u32 %v1980_v59, 16 }
  0x57   : > { %674 = vmatpush1.bf16.msra.mxu0 %v2116_v61  ;;  %810 = vmatpush1.bf16.msra.mxu1 %v2118_v0  ;;  %v2162_v61 = vld [vmem:[%s2745_s1 + $0x220] sm:$0xff]  }
  0x58   : > { %941 = vmatprep.subr.bf16.mxu0 %v2222_v1  ;;  %1075 = vmatprep.subr.bf16.mxu1 %v2222_v1  ;;  %v1993_v0 = vld [vmem:[%s2332_s7 + $0x20] sm:$0xee] }
  0x5a   : > { %688 = vmatmul.mubr.bf16.vlgmr.msra.gmra.mrb[4].mxu0 %v589_v4  ;;  %824 = vmatmul.mubr.bf16.vlgmr.msra.gmra.mrb[4].mxu1 %v1841_v7  ;;  %v1288_v4 = vrot.slane %v1286_v62, 1  ;;  %v1945_v7 = vcombine.low %v2552_v25, %v2552_v25 }
  0x5b   : > { %942 = vmatpush1.bf16.msra.mxu0 %v2121_v6  ;;  %1076 = vmatpush1.bf16.msra.mxu1 %v2123_v8  ;;  %v2015_v6 = vcombine.high %v1993_v0, %v2555_v26  ;;  %v2169_v8 = vld [vmem:[%s2745_s1 + $0x280] sm:$0xff]  }
  0x5c   : > { %943 = vmatprep.subr.bf16.mxu0 %v2222_v1  ;;  %1077 = vmatprep.subr.bf16.mxu1 %v2222_v1 }
  0x5d   : > { %1888 = vmatprep.mubr.msk.bf16.mxu0 %vm412_vm0, %v876_v9  ;;  %1922 = vmatprep.mubr.msk.bf16.mxu1 %vm412_vm0, %v1010_v10  ;;  %v1289_v9 = vor.u32 %v1288_v4, %v1284_v3  ;;  %v1430_v10 = vrot.slane %v2015_v6, 1 }
  0x5f   : > { %944 = vmatpush1.bf16.msra.mxu0 %v2124_v11  ;;  %1078 = vmatpush1.bf16.msra.mxu1 %v2125_v12  ;;  %v2171_v11 = vld [vmem:[%s2745_s1 + $0x288] sm:$0xff]   ;;  %v2172_v12 = vld [vmem:[%s2745_s1 + $0x290] sm:$0xff]  }
  0x60   : > { %945 = vmatprep.subr.bf16.mxu0 %v2222_v1  ;;  %1079 = vmatprep.subr.bf16.mxu1 %v2222_v1 }
  0x63   : > { %946 = vmatpush1.bf16.msra.mxu0 %v2126_v13  ;;  %1080 = vmatpush1.bf16.msra.mxu1 %v2127_v14  ;;  %v2173_v13 = vld [vmem:[%s2745_s1 + $0x298] sm:$0xff]   ;;  %v2174_v14 = vld [vmem:[%s2745_s1 + $0x2a0] sm:$0xff]  }
  0x64   : > { %947 = vmatprep.subr.bf16.mxu0 %v2222_v1  ;;  %1081 = vmatprep.subr.bf16.mxu1 %v2222_v1 }
  0x67   : > { %948 = vmatpush1.bf16.msra.mxu0 %v2128_v15  ;;  %1082 = vmatpush1.bf16.msra.mxu1 %v2129_v16  ;;  %v2175_v15 = vld [vmem:[%s2745_s1 + $0x2a8] sm:$0xff]   ;;  %v2176_v16 = vld [vmem:[%s2745_s1 + $0x2b0] sm:$0xff]  }
  0x68   : > { %949 = vmatprep.subr.bf16.mxu0 %v2222_v1  ;;  %1083 = vmatprep.subr.bf16.mxu1 %v2222_v1 }
  0x6b   : > { %950 = vmatpush1.bf16.msra.mxu0 %v2130_v17  ;;  %1084 = vmatpush1.bf16.msra.mxu1 %v2131_v18  ;;  %v2177_v17 = vld [vmem:[%s2745_s1 + $0x2b8] sm:$0xff]   ;;  %v2178_v18 = vld [vmem:[%s2745_s1 + $0x2c0] sm:$0xff]  }
  0x6c   : > { %951 = vmatprep.subr.bf16.mxu0 %v2222_v1  ;;  %1085 = vmatprep.subr.bf16.mxu1 %v2222_v1 }
  0x6f   : > { %952 = vmatpush1.bf16.msra.mxu0 %v2132_v19  ;;  %1086 = vmatpush1.bf16.msra.mxu1 %v2133_v20  ;;  %v2014_v19 = vcombine.low %v1993_v0, %v2555_v26  ;;  %v2179_v20 = vld [vmem:[%s2745_s1 + $0x2c8] sm:$0xff]  }
  0x70   : > { %953 = vmatprep.subr.bf16.mxu0 %v2222_v1  ;;  %1087 = vmatprep.subr.bf16.mxu1 %v2222_v1 }
  0x73   : > { %954 = vmatpush1.bf16.msra.mxu0 %v2134_v21  ;;  %1088 = vmatpush1.bf16.msra.mxu1 %v2135_v22  ;;  %v1429_v21 = vrot.slane %v2014_v19, 1 }
  0x74   : > { %955 = vmatprep.subr.bf16.mxu0 %v2222_v1  ;;  %1089 = vmatprep.subr.bf16.mxu1 %v2222_v1 }
  0x77   : > { %956 = vmatpush1.bf16.msra.mxu0 %v2136_v24  ;;  %1090 = vmatpush1.bf16.msra.mxu1 %v2137_v27 }
  0x78   : > { %957 = vmatprep.subr.bf16.mxu0 %v2222_v1  ;;  %1091 = vmatprep.subr.bf16.mxu1 %v2222_v1 }
  0x7b   : > { %958 = vmatpush1.bf16.msra.mxu0 %v2138_v30  ;;  %1092 = vmatpush1.bf16.msra.mxu1 %v2139_v31 }
  0x7c   : > { %959 = vmatprep.subr.bf16.mxu0 %v2222_v1  ;;  %1093 = vmatprep.subr.bf16.mxu1 %v2222_v1 }
  0x7f   : > { %960 = vmatpush1.bf16.msra.mxu0 %v2140_v35  ;;  %1094 = vmatpush1.bf16.msra.mxu1 %v2142_v37 }
  0x80   : > { %1211 = vmatprep.subr.bf16.mxu0 %v2222_v1  ;;  %1361 = vmatprep.subr.bf16.mxu1 %v2222_v1 }
  0x82   : > { %974 = vmatmul.mubr.bf16.vlgmr.msra.gmra.mrb[8].mxu0 %v869_v38  ;;  %1108 = vmatmul.mubr.bf16.vlgmr.msra.gmra.mrb[8].mxu1 %v1009_v42 }
  0x83   : > { %1212 = vmatpush1.bf16.msra.mxu0 %v2145_v41  ;;  %1362 = vmatpush1.bf16.msra.mxu1 %v2147_v43 }
  0x84   : > { %1213 = vmatprep.subr.bf16.mxu0 %v2222_v1  ;;  %1363 = vmatprep.subr.bf16.mxu1 %v2222_v1 }
  0x85   : > { %1957 = vmatprep.mubr.msk.bf16.mxu0 %vm412_vm0, %v1946_v44  ;;  %1992 = vmatprep.mubr.msk.bf16.mxu1 %vm412_vm0, %v1296_v45 }
  0x87   : > { %1214 = vmatpush1.bf16.msra.mxu0 %v2148_v46  ;;  %1364 = vmatpush1.bf16.msra.mxu1 %v2149_v47 }
  0x88   : > { %1215 = vmatprep.subr.bf16.mxu0 %v2222_v1  ;;  %1365 = vmatprep.subr.bf16.mxu1 %v2222_v1 }
  0x8b   : > { %1216 = vmatpush1.bf16.msra.mxu0 %v2150_v48  ;;  %1366 = vmatpush1.bf16.msra.mxu1 %v2151_v49 }
  0x8c   : > { %1217 = vmatprep.subr.bf16.mxu0 %v2222_v1  ;;  %1367 = vmatprep.subr.bf16.mxu1 %v2222_v1 }
  0x8f   : > { %1218 = vmatpush1.bf16.msra.mxu0 %v2152_v50  ;;  %1368 = vmatpush1.bf16.msra.mxu1 %v2153_v51 }
  0x90   : > { %1219 = vmatprep.subr.bf16.mxu0 %v2222_v1  ;;  %1369 = vmatprep.subr.bf16.mxu1 %v2222_v1 }
  0x93   : > { %1220 = vmatpush1.bf16.msra.mxu0 %v2154_v52  ;;  %1370 = vmatpush1.bf16.msra.mxu1 %v2155_v53 }
  0x94   : > { %1221 = vmatprep.subr.bf16.mxu0 %v2222_v1  ;;  %1371 = vmatprep.subr.bf16.mxu1 %v2222_v1 }
  0x97   : > { %1222 = vmatpush1.bf16.msra.mxu0 %v2156_v54  ;;  %1372 = vmatpush1.bf16.msra.mxu1 %v2157_v55 }
  0x98   : > { %1223 = vmatprep.subr.bf16.mxu0 %v2222_v1  ;;  %1373 = vmatprep.subr.bf16.mxu1 %v2222_v1 }
  0x9b   : > { %1224 = vmatpush1.bf16.msra.mxu0 %v2158_v56  ;;  %1374 = vmatpush1.bf16.msra.mxu1 %v2159_v57 }
  0x9c   : > { %1225 = vmatprep.subr.bf16.mxu0 %v2222_v1  ;;  %1375 = vmatprep.subr.bf16.mxu1 %v2222_v1 }
  0x9f   : > { %1226 = vmatpush1.bf16.msra.mxu0 %v2160_v58  ;;  %1376 = vmatpush1.bf16.msra.mxu1 %v2161_v60 }
  0xa0   : > { %1227 = vmatprep.subr.bf16.mxu0 %v2222_v1  ;;  %1377 = vmatprep.subr.bf16.mxu1 %v2222_v1 }
  0xa3   : > { %1228 = vmatpush1.bf16.msra.mxu0 %v2162_v61  ;;  %1378 = vmatpush1.bf16.msra.mxu1 %v2163_v63  ;;  %v2027_v61 = vld [vmem:[%s2746_s2] ss:$0 sm:$0xff] }
  0xa4   : > { %1229 = vmatprep.subr.bf16.mxu0 %v2222_v1  ;;  %1379 = vmatprep.subr.bf16.mxu1 %v2222_v1 }
  0xa7   : > { %1230 = vmatpush1.bf16.msra.mxu0 %v2164_v2  ;;  %1380 = vmatpush1.bf16.msra.mxu1 %v2166_v5 }
  0xa8   : > { %1495 = vmatprep.subr.bf16.mxu0 %v2222_v1 }
  0xaa   : > { %1244 = vmatmul.mubr.bf16.vlgmr.msra.gmra.mrb[12].mxu0 %v1945_v7  ;;  %1394 = vmatmul.mubr.bf16.vlgmr.msra.gmra.mrb[12].mxu1 %v1289_v9 }
  0xab   : > { %1496 = vmatpush1.bf16.msra.mxu0 %v2169_v8  ;;  %2026 = vmatprep.mubr.msk.bf16.mxu0 %vm412_vm0, %v1430_v10 }
  0xac   : > { %1497 = vmatprep.subr.bf16.mxu0 %v2222_v1 }
  0xaf   : > { %1498 = vmatpush1.bf16.msra.mxu0 %v2171_v11 }
  0xb0   : > { %1499 = vmatprep.subr.bf16.mxu0 %v2222_v1 }
  0xb3   : > { %1500 = vmatpush1.bf16.msra.mxu0 %v2172_v12 }
  0xb4   : > { %1501 = vmatprep.subr.bf16.mxu0 %v2222_v1 }
  0xb7   : > { %1502 = vmatpush1.bf16.msra.mxu0 %v2173_v13 }
  0xb8   : > { %1503 = vmatprep.subr.bf16.mxu0 %v2222_v1 }
  0xbb   : > { %1504 = vmatpush1.bf16.msra.mxu0 %v2174_v14 }
  0xbc   : > { %1505 = vmatprep.subr.bf16.mxu0 %v2222_v1 }
  0xbf   : > { %1506 = vmatpush1.bf16.msra.mxu0 %v2175_v15 }
  0xc0   : > { %1507 = vmatprep.subr.bf16.mxu0 %v2222_v1 }
  0xc3   : > { %1508 = vmatpush1.bf16.msra.mxu0 %v2176_v16 }
  0xc4   : > { %1509 = vmatprep.subr.bf16.mxu0 %v2222_v1 }
  0xc7   : > { %1510 = vmatpush1.bf16.msra.mxu0 %v2177_v17 }
  0xc8   : > { %1511 = vmatprep.subr.bf16.mxu0 %v2222_v1 }
  0xcb   : > { %1512 = vmatpush1.bf16.msra.mxu0 %v2178_v18 }
  0xcc   : > { %1513 = vmatprep.subr.bf16.mxu0 %v2222_v1 }
  0xcf   : > { %1514 = vmatpush1.bf16.msra.mxu0 %v2179_v20 }
  0xd2   : > { %1528 = vmatmul.mubr.bf16.vlgmr.msra.gmra.mrb[16].mxu0 %v1429_v21 }
 0x105   : > { %v450_v22 = vpop.f32.mrb[0].mxu0  ;;  %v556_v24 = vpop.f32.mrb[0].mxu1 }
 0x106   : > { %v452_v23 = vpop.f32.mrb[1].mxu0  ;;  %v557_v25 = vadd.f32 %v556_v24, %v450_v22  ;;  %v558_v28 = vpop.f32.mrb[1].mxu1 }
 0x107   : > { %v453_v27 = vpop.f32.mrb[2].mxu0  ;;  %v559_v30 = vpop.f32.mrb[2].mxu1 }
 0x108   : > { %v454_v29 = vpop.f32.mrb[3].mxu0  ;;  %v560_v31 = vpop.f32.mrb[3].mxu1 }
 0x12d   : > { %v689_v26 = vpop.f32.mrb[4].mxu0  ;;  %v825_v34 = vpop.f32.mrb[4].mxu1 }
 0x12e   : > { %v695_v32 = vadd.f32 %v689_v26, %v557_v25  ;;  %v691_v33 = vpop.f32.mrb[5].mxu0  ;;  %v827_v36 = vpop.f32.mrb[5].mxu1 }
 0x12f   : > { %v692_v35 = vpop.f32.mrb[6].mxu0  ;;  %v828_v38 = vpop.f32.mrb[6].mxu1 }
 0x130   : > { %v831_v37 = vadd.f32 %v825_v34, %v695_v32  ;;  %v693_v1 = vpop.f32.mrb[7].mxu0  ;;  %v829_v39 = vpop.f32.mrb[7].mxu1 }
 0x155   : > { %v975_v40 = vpop.f32.mrb[8].mxu0  ;;  %v1109_v43 = vpop.f32.mrb[8].mxu1 }
 0x156   : > { %v981_v41 = vadd.f32 %v975_v40, %v831_v37  ;;  %v977_v42 = vpop.f32.mrb[9].mxu0  ;;  %v1111_v45 = vpop.f32.mrb[9].mxu1 }
 0x157   : > { %v978_v44 = vpop.f32.mrb[10].mxu0  ;;  %v1112_v48 = vpop.f32.mrb[10].mxu1 }
 0x158   : > { %v1115_v46 = vadd.f32 %v1109_v43, %v981_v41  ;;  %v979_v47 = vpop.f32.mrb[11].mxu0  ;;  %v1113_v49 = vpop.f32.mrb[11].mxu1 }
 0x17d   : > { %v1245_v50 = vpop.f32.mrb[12].mxu0  ;;  %v1395_v53 = vpop.f32.mrb[12].mxu1 }
 0x17e   : > { %v1251_v51 = vadd.f32 %v1245_v50, %v1115_v46  ;;  %v1247_v52 = vpop.f32.mrb[13].mxu0  ;;  %v1397_v55 = vpop.f32.mrb[13].mxu1 }
 0x17f   : > { %v1248_v54 = vpop.f32.mrb[14].mxu0  ;;  %v1398_v58 = vpop.f32.mrb[14].mxu1 }
 0x180   : > { %v1401_v56 = vadd.f32 %v1395_v53, %v1251_v51  ;;  %v1249_v57 = vpop.f32.mrb[15].mxu0  ;;  %v1399_v59 = vpop.f32.mrb[15].mxu1 }
 0x1a5   : > { %v1529_v60 = vpop.f32.mrb[16].mxu0 }
 0x1a6   : > { %v1535_v62 = vadd.f32 %v1529_v60, %v1401_v56  ;;  %v1531_v63 = vpop.f32.mrb[17].mxu0 }
 0x1a7   : > { %v1532_v0 = vpop.f32.mrb[18].mxu0 }
 0x1a8   : > { %v1543_v2 = vadd.f32 %v2027_v61, %v1535_v62  ;;  %v1533_v3 = vpop.f32.mrb[19].mxu0 }
 0x1aa   : > { %v1544_v4 = vpack.c.bf16 %v1543_v2, %v1543_v2  ;;  %v1546_v5 = vrot.slane %v1543_v2, 4  ;;  %v1553_v6 = vmul.f32 %v1543_v2, %v1543_v2 }
 0x1ac   : > { %1545 = vst [vmem:[%s267_s27] sm:$0xf] %v1544_v4  ;;  %v1547_v7 = vadd.f32 %v1546_v5, %v1543_v2  ;;  %v1554_v8 = vrot.slane %v1553_v6, 4 }
 0x1ae   : > { %v1548_v9 = vrot.slane %v1547_v7, 2  ;;  %v1555_v10 = vadd.f32 %v1554_v8, %v1553_v6 }
 0x1b0   : > { %v1549_v11 = vadd.f32 %v1548_v9, %v1547_v7  ;;  %v1556_v12 = vrot.slane %v1555_v10, 2 }
 0x1b2   : > { %v1550_v13 = vrot.slane %v1549_v11, 1  ;;  %v1557_v14 = vadd.f32 %v1556_v12, %v1555_v10 }
 0x1b4   : > { %v1551_v15 = vadd.f32 %v1550_v13, %v1549_v11  ;;  %v1558_v16 = vrot.slane %v1557_v14, 1 }
 0x1b6   : > { %1552 = vst [vmem:[%s274_s28] sm:$0x1] %v1551_v15  ;;  %v1559_v17 = vadd.f32 %v1558_v16, %v1557_v14 }
 0x1b8   : > { %1560 = vst [vmem:[%s281_s6] sm:$0x1] %v1559_v17 }
 0x1b9 PF: > { %s16_s22 = sadd.s32 1, %s2220_s22   ;;  %s2750_s18 = smov %s2212_s20 }
 0x1ba   : > { %p13_p7 = scmp.ge.s32.totalorder %s16_s22, 8   ;;  %s2751_s19 = smov %s2216_s21 }
 0x1bb   : > { %s2752_s20 = smov %s2755_s23  ;;  %s2753_s21 = smov %s2759_s24 }
 0x1bc   :  { %15 = sbr.rel (!%p13_p7) target bundleno = 3 (0x3), region = 97 }

// kernel: model_forward.15
= control target key start
LH: loop header
LB: loop body
LE: loop exit
PB: predicated region body
PF: predicated region fallthrough
CT: control target
= control target key end

     0   :  { %s928_s18 = smov 0   ;;  %s930_s19 = smov 0   ;;  %s1054_s0 = inlined_call_operand.vmem [shape: bf16[2,3,8,128], index: 0, kind: input, shape index: {}]   ;;  %s1055_s1 = inlined_call_operand.vmem [shape: bf16[2,128,128], index: 1, kind: input, shape index: {}]   ;;  %s1056_s2 = inlined_call_operand.vmem [shape: f32[1,128], index: 2, kind: input, shape index: {}]   ;;  %s1057_s3 = inlined_call_operand.vmem [shape: bf16[2,2,8,128], index: 3, kind: output, shape index: {0}]   ;;  %s1058_s4 = inlined_call_operand.vmem [shape: f32[2,2,1,128], index: 4, kind: output, shape index: {1}]   ;;  %s1059_s5 = inlined_call_operand.vmem [shape: f32[2,2,1,128], index: 5, kind: output, shape index: {2}]  }
   0x1   :  { %s932_s20 = smov 0   ;;  %s934_s21 = smov 0  }
   0x2   :  { %s936_s22 = smov 0  }
   0x3 LB: > { %s25_s23 = sadd.s32 1, %s886_s20  ;;  %s28_s24 = sadd.s32 1, %s890_s21  ;;  %s894_s22 = sphi %s936_s22, %s16_s22   ;;  %s890_s21 = sphi %s934_s21, %s1063_s21   ;;  %s886_s20 = sphi %s932_s20, %s1062_s20   ;;  %s882_s19 = sphi %s930_s19, %s1061_s19   ;;  %s878_s18 = sphi %s928_s18, %s1060_s18  }
   0x4   : > { %p26_p0 = scmp.ge.s32.totalorder %s25_s23, 2  ;;  %p695_p1 = scmp.ge.s32.totalorder %s894_s22, 1 }
   0x5   : > { %p210_p2 = scmp.lt.s32.totalorder %s894_s22, 5 }
   0x6   : > { %s1065_s23 = smov (%p26_p0, %s25_s23), 0  ;;  %s1067_s24 = smov (!%p26_p0, %s28_s24), %s890_s21 }
   0x7   : > { %p211_p3 = pnand %p695_p1, %p210_p2  ;;  %p30_p4 = scmp.ge.s32.totalorder %s1067_s24, 2 }
   0x8   : > { %v840_v0 = vld [vmem:[%s1055_s1 + $0x40] sm:$0xff] (!%p211_p3)   ;;  %v896_v1 = vmov (!%p211_p3), 0.0   ;;  %v842_v3 = vld [vmem:[%s1055_s1 + $0x48] sm:$0xff] (!%p211_p3)   ;;  %vm897_vm0 = vmmov (!%p211_p3), 0   ;;  %v844_v5 = vld [vmem:[%s1055_s1 + $0x50] sm:$0xff] (!%p211_p3)   ;;  %p255_p5 = scmp.lt.s32.totalorder (!%p211_p3), %s882_s19, 1 }
   0x9   : > { %s1069_s24 = smov (%p30_p4, %s1067_s24), 0  ;;  %214 = sbr.rel (%p211_p3) target bundleno = 274 (0x112), region = 32 }
   0xa   : > { %757 = vmatprep.subr.bf16.mxu0 (!%p211_p3), %v896_v1  ;;  %777 = vmatprep.subr.bf16.mxu1 (!%p211_p3), %v896_v1  ;;  %v841_v2 = vld [vmem:[%s1055_s1] sm:$0xff] (!%p211_p3)   ;;  %v843_v4 = vld [vmem:[%s1055_s1 + $0x8] sm:$0xff] (!%p211_p3)   ;;  %v845_v6 = vld [vmem:[%s1055_s1 + $0x10] sm:$0xff] (!%p211_p3)   ;;  %s701_s14 = sshll.u32 (!%p211_p3), %s878_s18, 2  ;;  %p262_p6 = scmp.lt.s32.totalorder (!%p211_p3), %s878_s18, 1 }
   0xb   : > { %758 = vmatpush3.bf16.msra.mxu0 (!%p211_p3), %v840_v0  ;;  %773 = vmatprep.mubr.msk.bf16.mxu0 (!%p211_p3), %vm897_vm0, %v896_v1  ;;  %v846_v7 = vld [vmem:[%s1055_s1 + $0x58] sm:$0xff] (!%p211_p3)   ;;  %v848_v9 = vld [vmem:[%s1055_s1 + $0x60] sm:$0xff] (!%p211_p3)   ;;  %v850_v11 = vld [vmem:[%s1055_s1 + $0x68] sm:$0xff] (!%p211_p3)  }
   0xc   : > { %778 = vmatpush3.bf16.msra.mxu1 (!%p211_p3), %v841_v2  ;;  %759 = vmatprep.subr.bf16.mxu0 (!%p211_p3), %v896_v1  ;;  %v847_v8 = vld [vmem:[%s1055_s1 + $0x18] sm:$0xff] (!%p211_p3)   ;;  %v849_v10 = vld [vmem:[%s1055_s1 + $0x20] sm:$0xff] (!%p211_p3)   ;;  %v851_v12 = vld [vmem:[%s1055_s1 + $0x28] sm:$0xff] (!%p211_p3)  }
   0xd   : > { %779 = vmatprep.subr.bf16.mxu1 (!%p211_p3), %v896_v1  ;;  %793 = vmatprep.mubr.msk.bf16.mxu1 (!%p211_p3), %vm897_vm0, %v896_v1  ;;  %v852_v13 = vld [vmem:[%s1055_s1 + $0x70] sm:$0xff] (!%p211_p3)   ;;  %v854_v15 = vld [vmem:[%s1055_s1 + $0x78] sm:$0xff] (!%p211_p3)   ;;  %v736_v21 = vld [vmem:[%s1056_s2] ss:$0 sm:$0xff] (!%p211_p3) }
   0xe   : > { %v853_v14 = vld [vmem:[%s1055_s1 + $0x30] sm:$0xff] (!%p211_p3)   ;;  %v855_v16 = vld [vmem:[%s1055_s1 + $0x38] sm:$0xff] (!%p211_p3)  }
   0xf   : > { %760 = vmatpush3.bf16.msra.mxu0 (!%p211_p3), %v842_v3 }
  0x10   : > { %780 = vmatpush3.bf16.msra.mxu1 %v843_v4  ;;  %761 = vmatprep.subr.bf16.mxu0 %v896_v1  ;;  %s1071_s19 = smov (!%p255_p5, %s882_s19), 1  ;;  %s1073_s18 = smov (!%p262_p6, %s878_s18), 1 }
  0x11   : > { %781 = vmatprep.subr.bf16.mxu1 %v896_v1  ;;  %s797_s6 = smul.u32 12, %s1071_s19  ;;  %s697_s27 = sshll.u32 %s1071_s19, 1 }
  0x12   : > { %s1022_s28 = sadd.s32 %s697_s27, %s1073_s18 }
  0x13   : > { %762 = vmatpush3.bf16.msra.mxu0 %v844_v5  ;;  %s259_s13 = scalar_lea.vmem %s1054_s0, %s797_s6  ;;  %s698_s6 = sshll.u32 %s1022_s28, 2 }
  0x14   : > { %782 = vmatpush3.bf16.msra.mxu1 %v845_v6  ;;  %763 = vmatprep.subr.bf16.mxu0 %v896_v1  ;;  %s284_s26 = scalar_lea.vmem %s259_s13, %s701_s14  ;;  %s267_s7 = scalar_lea.vmem %s1057_s3, %s698_s6 }
  0x15   : > { %783 = vmatprep.subr.bf16.mxu1 %v896_v1  ;;  %v703_v17 = vld [vmem:[%s284_s26 + $0x4] sm:$0xf]  ;;  %v285_v18 = vld [vmem:[%s284_s26] sm:$0xf]  ;;  %s274_s10 = scalar_lea.vmem %s1058_s4, %s1022_s28  ;;  %s281_s13 = scalar_lea.vmem %s1059_s5, %s1022_s28 }
  0x17   : > { %764 = vmatpush3.bf16.msra.mxu0 %v846_v7 }
  0x18   : > { %784 = vmatpush3.bf16.msra.mxu1 %v847_v8  ;;  %765 = vmatprep.subr.bf16.mxu0 %v896_v1 }
  0x19   : > { %785 = vmatprep.subr.bf16.mxu1 %v896_v1 }
  0x1b   : > { %766 = vmatpush3.bf16.msra.mxu0 %v848_v9 }
  0x1c   : > { %786 = vmatpush3.bf16.msra.mxu1 %v849_v10  ;;  %767 = vmatprep.subr.bf16.mxu0 %v896_v1 }
  0x1d   : > { %787 = vmatprep.subr.bf16.mxu1 %v896_v1 }
  0x1f   : > { %768 = vmatpush3.bf16.msra.mxu0 %v850_v11 }
  0x20   : > { %788 = vmatpush3.bf16.msra.mxu1 %v851_v12  ;;  %769 = vmatprep.subr.bf16.mxu0 %v896_v1 }
  0x21   : > { %789 = vmatprep.subr.bf16.mxu1 %v896_v1 }
  0x23   : > { %770 = vmatpush3.bf16.msra.mxu0 %v852_v13 }
  0x24   : > { %790 = vmatpush3.bf16.msra.mxu1 %v853_v14  ;;  %771 = vmatprep.subr.bf16.mxu0 %v896_v1 }
  0x25   : > { %791 = vmatprep.subr.bf16.mxu1 %v896_v1 }
  0x27   : > { %772 = vmatpush3.bf16.msra.mxu0 %v854_v15 }
  0x28   : > { %792 = vmatpush3.bf16.msra.mxu1 %v855_v16 }
  0x2a   : > { %774 = vmatmul.mubr.bf16.vlgmr.msra.gmra.mrb[0].mxu0 %v703_v17 }
  0x2b   : > { %794 = vmatmul.mubr.bf16.vlgmr.msra.gmra.mrb[0].mxu1 %v285_v18 }
  0xfd   : > { %v405_v19 = vpop.f32.mrb[0].mxu0 }
  0xfe   : > { %v493_v20 = vpop.f32.mrb[0].mxu1  ;;  %v775_v22 = vpop.f32.mrb[1].mxu0 }
  0xff   : > { %v494_v23 = vadd.f32 %v493_v20, %v405_v19  ;;  %v795_v24 = vpop.f32.mrb[1].mxu1  ;;  %v408_v25 = vpop.f32.mrb[2].mxu0 }
 0x100   : > { %v496_v26 = vpop.f32.mrb[2].mxu1  ;;  %v776_v27 = vpop.f32.mrb[3].mxu0 }
 0x101   : > { %v506_v28 = vadd.f32 %v736_v21, %v494_v23  ;;  %v796_v29 = vpop.f32.mrb[3].mxu1 }
 0x103   : > { %v507_v30 = vpack.c.bf16 %v506_v28, %v506_v28  ;;  %v509_v31 = vrot.slane %v506_v28, 4  ;;  %v516_v32 = vmul.f32 %v506_v28, %v506_v28 }
 0x105   : > { %508 = vst [vmem:[%s267_s7] sm:$0xf] %v507_v30  ;;  %v510_v33 = vadd.f32 %v509_v31, %v506_v28  ;;  %v517_v34 = vrot.slane %v516_v32, 4 }
 0x107   : > { %v511_v35 = vrot.slane %v510_v33, 2  ;;  %v518_v36 = vadd.f32 %v517_v34, %v516_v32 }
 0x109   : > { %v512_v37 = vadd.f32 %v511_v35, %v510_v33  ;;  %v519_v38 = vrot.slane %v518_v36, 2 }
 0x10b   : > { %v513_v39 = vrot.slane %v512_v37, 1  ;;  %v520_v40 = vadd.f32 %v519_v38, %v518_v36 }
 0x10d   : > { %v514_v41 = vadd.f32 %v513_v39, %v512_v37  ;;  %v521_v42 = vrot.slane %v520_v40, 1 }
 0x10f   : > { %515 = vst [vmem:[%s274_s10] sm:$0x1] %v514_v41  ;;  %v522_v43 = vadd.f32 %v521_v42, %v520_v40 }
 0x111   : > { %523 = vst [vmem:[%s281_s13] sm:$0x1] %v522_v43 }
 0x112 PF: > { %s16_s22 = sadd.s32 1, %s894_s22   ;;  %s1060_s18 = smov %s886_s20 }
 0x113   : > { %p13_p7 = scmp.ge.s32.totalorder %s16_s22, 6   ;;  %s1061_s19 = smov %s890_s21 }
 0x114   : > { %s1062_s20 = smov %s1065_s23  ;;  %s1063_s21 = smov %s1069_s24 }
 0x115   :  { %15 = sbr.rel (!%p13_p7) target bundleno = 3 (0x3), region = 89 }

// kernel: tile.88
= control target key start
LH: loop header
LB: loop body
LE: loop exit
PB: predicated region body
PF: predicated region fallthrough
CT: control target
= control target key end

     0   :  { %s22_s0 = inlined_call_operand.vmem [shape: f32[2], index: 0, kind: input, shape index: {}]   ;;  %s23_s1 = inlined_call_operand.vmem [shape: f32[8,2], index: 1, kind: output, shape index: {}]  }
   0x1   :  { %v4_v0 = vld [vmem:[%s22_s0] ss:$0 sm:$0xff] }
   0x2   :  { %5 = vst [vmem:[%s23_s1] sm:$0xff] %v4_v0 }

// kernel: tile.89
= control target key start
LH: loop header
LB: loop body
LE: loop exit
PB: predicated region body
PF: predicated region fallthrough
CT: control target
= control target key end

     0   :  { %s67_s10 = smov 14   ;;  %s68_s11 = smov 10   ;;  %vm3_vm0 = vcmask 15360   ;;  %vm9_vm1 = vcmask 130160   ;;  %vm15_vm2 = vcmask 113760   ;;  %vm21_vm3 = vcmask 97360   ;;  %s111_s0 = inlined_call_operand.vmem [shape: f32[8,2], index: 0, kind: input, shape index: {}]   ;;  %s112_s1 = inlined_call_operand.vmem [shape: f32[1,16], index: 1, kind: output, shape index: {}]  }
   0x1   :  { %v53_v0 = vld [vmem:[%s111_s0 + $0x7] sm:$0x1]   ;;  %v55_v1 = vld [vmem:[%s111_s0 + $0x5] sm:$0x1]   ;;  %v54_v2 = vld [vmem:[%s111_s0 + $0x6] sm:$0x1]  }
   0x2   :  { %7 = vrot.lane.b32.xlu0 %v53_v0, %s67_s10  ;;  %19 = vrot.lane.b32.xlu1 %v55_v1, %s68_s11  ;;  %v56_v3 = vld [vmem:[%s111_s0 + $0x4] sm:$0x1]   ;;  %v2_v4 = vld [vmem:[%s111_s0] sm:$0x1]   ;;  %s69_s18 = smov 12   ;;  %s70_s19 = smov 8  }
   0x3   :  { %4 = vst.msk [vmem:[#allocation0] sm:$0x1] %vm3_vm0, %v2_v4   ;;  %v57_v5 = vld [vmem:[%s111_s0 + $0x3] sm:$0x1]   ;;  %v58_v6 = vld [vmem:[%s111_s0 + $0x2] sm:$0x1]  }
   0x4   :  { %s71_s24 = smov 6   ;;  %s72_s25 = smov 4   ;;  %v59_v7 = vld [vmem:[%s111_s0 + $0x1] sm:$0x1]   ;;  %vm27_vm4 = vcmask 80960   ;;  %vm33_vm5 = vcmask 64560  }
   0x5   :  { %s73_s0 = smov 2   ;;  %vm39_vm6 = vcmask 48160   ;;  %vm45_vm7 = vcmask 31760  }
   0x6   :  { %13 = vrot.lane.b32.xlu0 %v54_v2, %s69_s18  ;;  %25 = vrot.lane.b32.xlu1 %v56_v3, %s70_s19 }
   0xa   :  { %31 = vrot.lane.b32.xlu0 %v57_v5, %s71_s24  ;;  %37 = vrot.lane.b32.xlu1 %v58_v6, %s72_s25 }
   0xe   :  { %43 = vrot.lane.b32.xlu0 %v59_v7, %s73_s0 }
  0x74   :  { %v8_v8 = vpop.permute.xlu0 %7   ;;  %v20_v9 = vpop.permute.xlu1 %19  }
  0x75   :  { %10 = vst.msk [vmem:[#allocation0] sm:$0x1] %vm9_vm1, %v8_v8  }
  0x78   :  { %v14_v10 = vpop.permute.xlu0 %13   ;;  %v26_v11 = vpop.permute.xlu1 %25  }
  0x79   :  { %16 = vst.msk [vmem:[#allocation0] sm:$0x1] %vm15_vm2, %v14_v10  }
  0x7a   :  { %22 = vst.msk [vmem:[#allocation0] sm:$0x1] %vm21_vm3, %v20_v9  }
  0x7b   :  { %28 = vst.msk [vmem:[#allocation0] sm:$0x1] %vm27_vm4, %v26_v11  }
  0x7c   :  { %v32_v12 = vpop.permute.xlu0 %31   ;;  %v38_v13 = vpop.permute.xlu1 %37  }
  0x7d   :  { %34 = vst.msk [vmem:[#allocation0] sm:$0x1] %vm33_vm5, %v32_v12  }
  0x7e   :  { %40 = vst.msk [vmem:[#allocation0] sm:$0x1] %vm39_vm6, %v38_v13  }
  0x80   :  { %v44_v14 = vpop.permute.xlu0 %43  }
  0x81   :  { %46 = vst.msk [vmem:[#allocation0] sm:$0x1] %vm45_vm7, %v44_v14  }
  0x88   :  { %v50_v15 = vld [vmem:[#allocation0] sm:$0x1] }
  0x89   :  { %52 = vst [vmem:[%s112_s1] sm:$0x1] %v50_v15 }

// kernel: model_forward.17
= control target key start
LH: loop header
LB: loop body
LE: loop exit
PB: predicated region body
PF: predicated region fallthrough
CT: control target
= control target key end

     0   :  { %11 = vsyncpa [#allocation3], 0  ;;  %s2999_s0 = inlined_call_operand.vmem [shape: bf16[2,7,10,160], index: 0, kind: input, shape index: {}]   ;;  %s3000_s1 = inlined_call_operand.vmem [shape: bf16[9,160,16], index: 1, kind: input, shape index: {}]   ;;  %s3001_s2 = inlined_call_operand.vmem [shape: f32[1,16], index: 2, kind: input, shape index: {}]   ;;  %s3002_s3 = inlined_call_operand.vmem [shape: f32[2,5,8,16], index: 3, kind: output, shape index: {0}]   ;;  %s3003_s4 = inlined_call_operand.hbm [shape: f32[2,5,1,16], index: 4, kind: output, shape index: {1}]   ;;  %s3004_s5 = inlined_call_operand.hbm [shape: f32[2,5,1,16], index: 5, kind: output, shape index: {2}]  }
   0x1   :  { %13 = vsyncpa [#allocation3 + $0x1], 0 }
   0x2   :  { %14 = vsyncpa [#allocation5], 0 }
   0x3   :  { %16 = vsyncpa [#allocation5 + $0x1], 0  ;;  %s2389_s18 = smov 0   ;;  %s2391_s19 = smov 0  }
   0x4   :  { %s2393_s20 = smov 0   ;;  %s2395_s21 = smov 0  }
   0x5   :  { %s2397_s22 = smov 0   ;;  %s2399_s23 = smov 0  }
   0x6   :  { %s2401_s24 = smov 0   ;;  %s2403_s25 = smov 0  }
   0x7 LB: > { %s1737_s26 = sadd.s32 4294967295, %s2354_s25   ;;  %s1738_s27 = sadd.s32 4294967294, %s2354_s25   ;;  %s2354_s25 = sphi %s2403_s25, %s22_s25   ;;  %s2350_s24 = sphi %s2401_s24, %s3015_s24   ;;  %s2346_s23 = sphi %s2399_s23, %s3014_s23   ;;  %s2342_s22 = sphi %s2397_s22, %s3013_s22   ;;  %s2338_s21 = sphi %s2395_s21, %s3012_s21   ;;  %s2334_s20 = sphi %s2393_s20, %s3011_s20   ;;  %s2330_s19 = sphi %s2391_s19, %s3010_s19   ;;  %s2326_s18 = sphi %s2389_s18, %s3009_s18  }
   0x8   : > { %s31_s28 = sadd.s32 1, %s2346_s23  ;;  %s34_s29 = sadd.s32 1, %s2350_s24 }
   0x9   : > { %p32_p0 = scmp.ge.s32.totalorder %s31_s28, 5  ;;  %p149_p1 = scmp.ne.s32.totalorder %s2334_s20, %s2330_s19 }
   0xa   : > { %p150_p2 = scmp.eq.s32.totalorder %s1737_s26, 9  ;;  %p155_p5 = scmp.ne.s32.totalorder %s2330_s19, %s2326_s18 }
   0xb   : > { %s3017_s28 = smov (%p32_p0, %s31_s28), 0  ;;  %s3019_s29 = smov (!%p32_p0, %s34_s29), %s2350_s24 }
   0xc   : > { %s135_s30 = ssub.s32 %s2346_s23, %s3017_s28  ;;  %p2440_p3 = por %p150_p2, %p149_p1 }
   0xd   : > { %p36_p4 = scmp.ge.s32.totalorder %s3019_s29, 2  ;;  %p156_p6 = scmp.eq.s32.totalorder %s1738_s27, 9 }
   0xe   : > { %p1741_p7 = scmp.ge.s32.totalorder %s2354_s25, 1  ;;  %p216_p9 = scmp.lt.s32.totalorder %s2354_s25, 11 }
   0xf   : > { %s3021_s29 = smov (%p36_p4, %s3019_s29), 0  ;;  %p2449_p8 = por %p156_p6, %p155_p5 }
  0x10   : > { %s134_s8 = ssub.s32 %s2350_s24, %s3021_s29  ;;  %s139_s9 = sadd.s32 1, %s2334_s20 }
  0x11   : > { %s136_s10 = sor.u32 %s135_s30, %s134_s8  ;;  %p217_p10 = pnand %p1741_p7, %p216_p9 }
  0x12   : > { %p137_p11 = scmp.eq.s32.totalorder %s136_s10, 0  ;;  %v2120_v0 = vld [vmem:[%s3000_s1 + $0x50] sm:$0xff] (!%p217_p10)   ;;  %v2356_v1 = vmov (!%p217_p10), 0   ;;  %v2121_v2 = vld [vmem:[%s3000_s1] sm:$0xff] (!%p217_p10)   ;;  %v2122_v3 = vld [vmem:[%s3000_s1 + $0x58] sm:$0xff] (!%p217_p10)   ;;  %p255_p12 = scmp.lt.s32.totalorder (!%p217_p10), %s2342_s22, 1 }
  0x13   : > { %220 = sbr.rel (%p217_p10) target bundleno = 486 (0x1e6), region = 32  ;;  %402 = vmatprep.subr.bf16.mxu0 (!%p217_p10), %v2356_v1  ;;  %508 = vmatprep.subr.bf16.mxu1 (!%p217_p10), %v2356_v1  ;;  %v2123_v4 = vld [vmem:[%s3000_s1 + $0x8] sm:$0xff] (!%p217_p10)   ;;  %v2124_v5 = vld [vmem:[%s3000_s1 + $0x60] sm:$0xff] (!%p217_p10)   ;;  %v2125_v6 = vld [vmem:[%s3000_s1 + $0x10] sm:$0xff] (!%p217_p10)   ;;  %s2038_s12 = sshll.u32 (!%p217_p10), %s2338_s21, 4  ;;  %vm398_vm0 = vcmask (!%p217_p10), 261120  }
  0x14   : > { %s2458_s11 = scalar_select %p137_p11, %s2334_s20, %s139_s9  }
  0x15   : > { %403 = vmatpush1.bf16.msra.mxu0 (!%p217_p10), %v2120_v0  ;;  %509 = vmatpush1.bf16.msra.mxu1 (!%p217_p10), %v2121_v2  ;;  %v2126_v7 = vld [vmem:[%s3000_s1 + $0x68] sm:$0xff] (!%p217_p10)   ;;  %v2127_v8 = vld [vmem:[%s3000_s1 + $0x18] sm:$0xff] (!%p217_p10)   ;;  %v2128_v9 = vld [vmem:[%s3000_s1 + $0x70] sm:$0xff] (!%p217_p10)   ;;  %p262_p13 = scmp.lt.s32.totalorder (!%p217_p10), %s2338_s21, 4  ;;  %vm1530_vm1 = vcmask (!%p217_p10), 130048   ;;  %vm1539_vm2 = vcmask (!%p217_p10), 122880  }
  0x16   : > { %404 = vmatprep.subr.bf16.mxu0 (!%p217_p10), %v2356_v1  ;;  %510 = vmatprep.subr.bf16.mxu1 (!%p217_p10), %v2356_v1  ;;  %v2129_v10 = vld [vmem:[%s3000_s1 + $0x20] sm:$0xff] (!%p217_p10)   ;;  %v2130_v11 = vld [vmem:[%s3000_s1 + $0x78] sm:$0xff] (!%p217_p10)   ;;  %v2131_v12 = vld [vmem:[%s3000_s1 + $0x28] sm:$0xff] (!%p217_p10)   ;;  %s2357_s26 = smov (!%p217_p10), [#allocation2]  }
  0x17   : > { %v2132_v17 = vld [vmem:[%s3000_s1 + $0x80] sm:$0xff] (!%p217_p10)   ;;  %v2133_v18 = vld [vmem:[%s3000_s1 + $0x30] sm:$0xff] (!%p217_p10)   ;;  %v2134_v21 = vld [vmem:[%s3000_s1 + $0x88] sm:$0xff] (!%p217_p10)  }
  0x18   : > { %v2135_v24 = vld [vmem:[%s3000_s1 + $0x38] sm:$0xff] (!%p217_p10)   ;;  %v2136_v27 = vld [vmem:[%s3000_s1 + $0x90] sm:$0xff] (!%p217_p10)   ;;  %v2137_v28 = vld [vmem:[%s3000_s1 + $0x40] sm:$0xff] (!%p217_p10)  }
  0x19   : > { %405 = vmatpush1.bf16.msra.mxu0 (!%p217_p10), %v2122_v3  ;;  %511 = vmatpush1.bf16.msra.mxu1 (!%p217_p10), %v2123_v4  ;;  %v2138_v31 = vld [vmem:[%s3000_s1 + $0x98] sm:$0xff] (!%p217_p10)   ;;  %v2139_v32 = vld [vmem:[%s3000_s1 + $0x48] sm:$0xff] (!%p217_p10)   ;;  %v2144_v35 = vld [vmem:[%s3000_s1 + $0xa0] sm:$0xff] (!%p217_p10)  }
  0x1a   : > { %s2481_s9 = scalar_select %p255_p12, %s2342_s22, 1  ;;  %406 = vmatprep.subr.bf16.mxu0 %v2356_v1  ;;  %512 = vmatprep.subr.bf16.mxu1 %v2356_v1  ;;  %v2145_v36 = vld [vmem:[%s3000_s1 + $0xf0] sm:$0xff]   ;;  %v2146_v40 = vld [vmem:[%s3000_s1 + $0xa8] sm:$0xff]   ;;  %v2147_v42 = vld [vmem:[%s3000_s1 + $0xf8] sm:$0xff]  }
  0x1b   : > { %v2148_v44 = vld [vmem:[%s3000_s1 + $0xb0] sm:$0xff]   ;;  %v2149_v45 = vld [vmem:[%s3000_s1 + $0x100] sm:$0xff]   ;;  %v2150_v46 = vld [vmem:[%s3000_s1 + $0xb8] sm:$0xff]   ;;  %s263_s14 = scalar_select %p262_p13, %s2338_s21, 4 }
  0x1c   : > { %s2039_s15 = smul.u32 112, %s2481_s9  ;;  %v2151_v47 = vld [vmem:[%s3000_s1 + $0x108] sm:$0xff]   ;;  %v2152_v48 = vld [vmem:[%s3000_s1 + $0xc0] sm:$0xff]   ;;  %v2153_v49 = vld [vmem:[%s3000_s1 + $0x110] sm:$0xff]  }
  0x1d   : > { %407 = vmatpush1.bf16.msra.mxu0 %v2124_v5  ;;  %513 = vmatpush1.bf16.msra.mxu1 %v2125_v6  ;;  %v2154_v50 = vld [vmem:[%s3000_s1 + $0xc8] sm:$0xff]   ;;  %v2155_v51 = vld [vmem:[%s3000_s1 + $0x118] sm:$0xff]   ;;  %v2156_v52 = vld [vmem:[%s3000_s1 + $0xd0] sm:$0xff]   ;;  %s2040_s13 = smul.u32 5, %s2481_s9 }
  0x1e   : > { %408 = vmatprep.subr.bf16.mxu0 %v2356_v1  ;;  %514 = vmatprep.subr.bf16.mxu1 %v2356_v1  ;;  %s259_s10 = scalar_lea.vmem %s2999_s0, %s2039_s15  ;;  %v2157_v53 = vld [vmem:[%s3000_s1 + $0x120] sm:$0xff]   ;;  %v2158_v55 = vld [vmem:[%s3000_s1 + $0xd8] sm:$0xff]   ;;  %v2159_v56 = vld [vmem:[%s3000_s1 + $0x128] sm:$0xff]   ;;  %s2041_s9 = smul.u32 5, %s2342_s22 }
  0x1f   : > { %s2509_s16 = scalar_lea.vmem %s259_s10, %s2038_s12  ;;  %v2160_v58 = vld [vmem:[%s3000_s1 + $0xe0] sm:$0xff]   ;;  %v2161_v59 = vld [vmem:[%s3000_s1 + $0x130] sm:$0xff]   ;;  %v2162_v61 = vld [vmem:[%s3000_s1 + $0xe8] sm:$0xff]   ;;  %s2902_s10 = sand.u32 1, %s2330_s19  }
  0x20   : > { %v272_v13 = vld [vmem:[%s2509_s16] sm:$0xff]  ;;  %v2521_v14 = vld [vmem:[%s2509_s16 + $0x8] sm:$0x11]  ;;  %v2573_v39 = vld [vmem:[%s2509_s16 + $0x10] sm:$0xff]  ;;  %s1576_s12 = sadd.s32 %s2338_s21, %s2041_s9  ;;  %s3005_s22 = scalar_lea.vmem [#allocation4], %s2902_s10 }
  0x21   : > { %409 = vmatpush1.bf16.msra.mxu0 %v2126_v7  ;;  %515 = vmatpush1.bf16.msra.mxu1 %v2127_v8  ;;  %v1767_v15 = vcombine.high %v272_v13, %v2521_v14  ;;  %v1780_v16 = vcombine.high %v272_v13, %v272_v13  ;;  %v1766_v23 = vcombine.low %v272_v13, %v2521_v14  ;;  %v2568_v37 = vld [vmem:[%s2509_s16] sm:$0xee]  ;;  %v2628_v54 = vld [vmem:[%s2509_s16 + $0x18] sm:$0x11]  ;;  %v2654_v63 = vld [vmem:[%s2509_s16 + $0x10] sm:$0xee] }
  0x22   : > { %410 = vmatprep.subr.bf16.mxu0 %v2356_v1  ;;  %516 = vmatprep.subr.bf16.mxu1 %v2356_v1  ;;  %v1779_v34 = vcombine.low %v272_v13, %v272_v13  ;;  %v1813_v38 = vcombine.high %v2568_v37, %v2521_v14  ;;  %v1848_v41 = vcombine.high %v2573_v39, %v2573_v39  ;;  %v2164_v0 = vld [vmem:[%s3000_s1 + $0x138] sm:$0xff]   ;;  %v2167_v6 = vld [vmem:[%s3000_s1 + $0x140] sm:$0xff]   ;;  %v2169_v8 = vld [vmem:[%s3000_s1 + $0x190] sm:$0xff]   ;;  %s1559_s9 = scalar_lea.sflag [#allocation3], %s2902_s10  ;;  %s2232_s15 = sshll.u32 %s2357_s26, 4  ;;  %s2233_s15 = int_to_ptr.vmem [resolvable:$false] %s2232_s15 }
  0x23   : > { %v331_v19 = vshrl.u32 %v1767_v15, 16  ;;  %v333_v20 = vshll.u32 %v1767_v15, 16  ;;  %1791 = vmatprep.mubr.msk.bf16.mxu1 %vm398_vm0, %v1780_v16  ;;  %v326_v26 = vshll.u32 %v1766_v23, 16  ;;  %v324_v29 = vshrl.u32 %v1766_v23, 16  ;;  %v2172_v13 = vld [vmem:[%s3000_s1 + $0x150] sm:$0xff]   ;;  %v2174_v15 = vld [vmem:[%s3000_s1 + $0x158] sm:$0xff]  }
  0x24   : > { %v576_v43 = vrot.slane %v1813_v38, 1  ;;  %v1883_v57 = vcombine.high %v2573_v39, %v2628_v54  ;;  %v1812_v62 = vcombine.low %v2568_v37, %v2521_v14  ;;  %v1917_v5 = vcombine.high %v2654_v63, %v2628_v54  ;;  %v2173_v14 = vld [vmem:[%s3000_s1 + $0x1a0] sm:$0xff]   ;;  %v2175_v16 = vld [vmem:[%s3000_s1 + $0x1a8] sm:$0xff]   ;;  %v2188_v37 = vld [vmem:[%s3000_s1 + $0x1d8] sm:$0xff]  }
  0x25   : > { %411 = vmatpush1.bf16.msra.mxu0 %v2128_v9  ;;  %517 = vmatpush1.bf16.msra.mxu1 %v2129_v10  ;;  %v335_v22 = vrot.slane %v333_v20, 1  ;;  %v328_v30 = vrot.slane %v326_v26, 1  ;;  %v1847_v7 = vcombine.low %v2573_v39, %v2573_v39  ;;  %v2179_v20 = vld [vmem:[%s3000_s1 + $0x1b8] sm:$0xff]   ;;  %v1882_v23 = vcombine.low %v2573_v39, %v2628_v54  ;;  %v2732_v26 = vld [vmem:[%s2509_s16 + $0x28] sm:$0x11] }
  0x26   : > { %412 = vmatprep.subr.bf16.mxu0 %v2356_v1  ;;  %518 = vmatprep.subr.bf16.mxu1 %v2356_v1  ;;  %v859_v60 = vshll.u32 %v1883_v57, 16  ;;  %v857_v2 = vshrl.u32 %v1883_v57, 16  ;;  %v575_v4 = vrot.slane %v1812_v62, 1  ;;  %v996_v10 = vrot.slane %v1917_v5, 1  ;;  %v2205_v57 = vld [vmem:[%s3000_s1 + $0x260] sm:$0xff]   ;;  %v2212_v5 = vld [vmem:[%s3000_s1 + $0x278] sm:$0xff]  }
  0x27   : > { %v336_v25 = vor.u32 %v335_v22, %v331_v19  ;;  %v329_v33 = vor.u32 %v328_v30, %v324_v29  ;;  %v2178_v19 = vld [vmem:[%s3000_s1 + $0x168] sm:$0xff]   ;;  %v2181_v22 = vld [vmem:[%s3000_s1 + $0x1c0] sm:$0xff]  }
  0x28   : > { %v861_v3 = vrot.slane %v859_v60, 1  ;;  %v2184_v30 = vld [vmem:[%s3000_s1 + $0x180] sm:$0xff]   ;;  %v2207_v60 = vld [vmem:[%s3000_s1 + $0x268] sm:$0xff]  }
  0x29   : > { %413 = vmatpush1.bf16.msra.mxu0 %v2130_v11  ;;  %519 = vmatpush1.bf16.msra.mxu1 %v2131_v12  ;;  %v2170_v11 = vld [vmem:[%s3000_s1 + $0x148] sm:$0xff]   ;;  %v2171_v12 = vld [vmem:[%s3000_s1 + $0x198] sm:$0xff]  }
  0x2a   : > { %414 = vmatprep.subr.bf16.mxu0 %v2356_v1  ;;  %520 = vmatprep.subr.bf16.mxu1 %v2356_v1  ;;  %v862_v9 = vor.u32 %v861_v3, %v857_v2  ;;  %v2210_v2 = vld [vmem:[%s3000_s1 + $0x228] sm:$0xff]  }
  0x2b   : > { %1778 = vmatprep.mubr.msk.bf16.mxu0 %vm398_vm0, %v336_v25  ;;  %v2729_v25 = vld [vmem:[%s2509_s16 + $0x20] sm:$0xff] }
  0x2c   : > { %v1987_v29 = vcombine.high %v2729_v25, %v2732_v26 }
  0x2d   : > { %415 = vmatpush1.bf16.msra.mxu0 %v2132_v17  ;;  %521 = vmatpush1.bf16.msra.mxu1 %v2133_v18  ;;  %v2176_v17 = vld [vmem:[%s3000_s1 + $0x160] sm:$0xff]   ;;  %v2177_v18 = vld [vmem:[%s3000_s1 + $0x1b0] sm:$0xff]  }
  0x2e   : > { %416 = vmatprep.subr.bf16.mxu0 %v2356_v1  ;;  %522 = vmatprep.subr.bf16.mxu1 %v2356_v1  ;;  %v1277_v39 = vshrl.u32 %v1987_v29, 16 }
  0x31   : > { %417 = vmatpush1.bf16.msra.mxu0 %v2134_v21  ;;  %523 = vmatpush1.bf16.msra.mxu1 %v2135_v24  ;;  %v2180_v21 = vld [vmem:[%s3000_s1 + $0x170] sm:$0xff]   ;;  %v2182_v24 = vld [vmem:[%s3000_s1 + $0x178] sm:$0xff]  }
  0x32   : > { %418 = vmatprep.subr.bf16.mxu0 %v2356_v1  ;;  %524 = vmatprep.subr.bf16.mxu1 %v2356_v1 }
  0x35   : > { %419 = vmatpush1.bf16.msra.mxu0 %v2136_v27  ;;  %525 = vmatpush1.bf16.msra.mxu1 %v2137_v28  ;;  %v2183_v27 = vld [vmem:[%s3000_s1 + $0x1c8] sm:$0xff]   ;;  %v852_v28 = vshll.u32 %v1882_v23, 16 }
  0x36   : > { %420 = vmatprep.subr.bf16.mxu0 %v2356_v1  ;;  %526 = vmatprep.subr.bf16.mxu1 %v2356_v1 }
  0x39   : > { %421 = vmatpush1.bf16.msra.mxu0 %v2138_v31  ;;  %527 = vmatpush1.bf16.msra.mxu1 %v2139_v32  ;;  %v2185_v31 = vld [vmem:[%s3000_s1 + $0x1d0] sm:$0xff]   ;;  %v850_v32 = vshrl.u32 %v1882_v23, 16 }
  0x3a   : > { %641 = vmatprep.subr.bf16.mxu0 %v2356_v1  ;;  %777 = vmatprep.subr.bf16.mxu1 %v2356_v1 }
  0x3c   : > { %435 = vmatmul.mubr.bf16.vlgmr.msra.gmra.mrb[0].mxu0 %v329_v33  ;;  %541 = vmatmul.mubr.bf16.vlgmr.msra.gmra.mrb[0].mxu1 %v1779_v34  ;;  %v854_v33 = vrot.slane %v852_v28, 1  ;;  %v1279_v34 = vshll.u32 %v1987_v29, 16 }
  0x3d   : > { %642 = vmatpush1.bf16.msra.mxu0 %v2144_v35  ;;  %778 = vmatpush1.bf16.msra.mxu1 %v2145_v36  ;;  %v2186_v35 = vld [vmem:[%s3000_s1 + $0x188] sm:$0xff]   ;;  %v1916_v36 = vcombine.low %v2654_v63, %v2628_v54  ;;  %v2209_v63 = vld [vmem:[%s3000_s1 + $0x270] sm:$0xff]  }
  0x3e   : > { %643 = vmatprep.subr.bf16.mxu0 %v2356_v1  ;;  %779 = vmatprep.subr.bf16.mxu1 %v2356_v1  ;;  %v855_v38 = vor.u32 %v854_v33, %v850_v32  ;;  %v2202_v54 = vld [vmem:[%s3000_s1 + $0x208] sm:$0xff]  }
  0x3f   : > { %1859 = vmatprep.mubr.msk.bf16.mxu1 %vm398_vm0, %v1848_v41  ;;  %1824 = vmatprep.mubr.msk.bf16.mxu0 %vm398_vm0, %v576_v43  ;;  %v2191_v41 = vld [vmem:[%s3000_s1 + $0x1e0] sm:$0xff]   ;;  %v2193_v43 = vld [vmem:[%s3000_s1 + $0x230] sm:$0xff]  }
  0x41   : > { %644 = vmatpush1.bf16.msra.mxu0 %v2146_v40  ;;  %780 = vmatpush1.bf16.msra.mxu1 %v2147_v42  ;;  %v1281_v40 = vrot.slane %v1279_v34, 1  ;;  %v995_v42 = vrot.slane %v1916_v36, 1 }
  0x42   : > { %645 = vmatprep.subr.bf16.mxu0 %v2356_v1  ;;  %781 = vmatprep.subr.bf16.mxu1 %v2356_v1 }
  0x45   : > { %646 = vmatpush1.bf16.msra.mxu0 %v2148_v44  ;;  %782 = vmatpush1.bf16.msra.mxu1 %v2149_v45  ;;  %v1952_v44 = vcombine.high %v2729_v25, %v2729_v25  ;;  %v1282_v45 = vor.u32 %v1281_v40, %v1277_v39 }
  0x46   : > { %647 = vmatprep.subr.bf16.mxu0 %v2356_v1  ;;  %783 = vmatprep.subr.bf16.mxu1 %v2356_v1 }
  0x49   : > { %648 = vmatpush1.bf16.msra.mxu0 %v2150_v46  ;;  %784 = vmatpush1.bf16.msra.mxu1 %v2151_v47  ;;  %v2194_v46 = vld [vmem:[%s3000_s1 + $0x1e8] sm:$0xff]   ;;  %v2195_v47 = vld [vmem:[%s3000_s1 + $0x238] sm:$0xff]  }
  0x4a   : > { %649 = vmatprep.subr.bf16.mxu0 %v2356_v1  ;;  %785 = vmatprep.subr.bf16.mxu1 %v2356_v1 }
  0x4d   : > { %650 = vmatpush1.bf16.msra.mxu0 %v2152_v48  ;;  %786 = vmatpush1.bf16.msra.mxu1 %v2153_v49  ;;  %v2196_v48 = vld [vmem:[%s3000_s1 + $0x1f0] sm:$0xff]   ;;  %v2197_v49 = vld [vmem:[%s3000_s1 + $0x240] sm:$0xff]  }
  0x4e   : > { %651 = vmatprep.subr.bf16.mxu0 %v2356_v1  ;;  %787 = vmatprep.subr.bf16.mxu1 %v2356_v1 }
  0x51   : > { %652 = vmatpush1.bf16.msra.mxu0 %v2154_v50  ;;  %788 = vmatpush1.bf16.msra.mxu1 %v2155_v51  ;;  %v2198_v50 = vld [vmem:[%s3000_s1 + $0x1f8] sm:$0xff]   ;;  %v2199_v51 = vld [vmem:[%s3000_s1 + $0x248] sm:$0xff]  }
  0x52   : > { %653 = vmatprep.subr.bf16.mxu0 %v2356_v1  ;;  %789 = vmatprep.subr.bf16.mxu1 %v2356_v1 }
  0x55   : > { %654 = vmatpush1.bf16.msra.mxu0 %v2156_v52  ;;  %790 = vmatpush1.bf16.msra.mxu1 %v2157_v53  ;;  %v2200_v52 = vld [vmem:[%s3000_s1 + $0x200] sm:$0xff]   ;;  %v2201_v53 = vld [vmem:[%s3000_s1 + $0x250] sm:$0xff]  }
  0x56   : > { %655 = vmatprep.subr.bf16.mxu0 %v2356_v1  ;;  %791 = vmatprep.subr.bf16.mxu1 %v2356_v1 }
  0x59   : > { %656 = vmatpush1.bf16.msra.mxu0 %v2158_v55  ;;  %792 = vmatpush1.bf16.msra.mxu1 %v2159_v56  ;;  %v2203_v55 = vld [vmem:[%s3000_s1 + $0x258] sm:$0xff]   ;;  %v2204_v56 = vld [vmem:[%s3000_s1 + $0x210] sm:$0xff]  }
  0x5a   : > { %657 = vmatprep.subr.bf16.mxu0 %v2356_v1  ;;  %793 = vmatprep.subr.bf16.mxu1 %v2356_v1 }
  0x5d   : > { %658 = vmatpush1.bf16.msra.mxu0 %v2160_v58  ;;  %794 = vmatpush1.bf16.msra.mxu1 %v2161_v59  ;;  %v2206_v58 = vld [vmem:[%s3000_s1 + $0x218] sm:$0xff]   ;;  %v1986_v59 = vcombine.low %v2729_v25, %v2732_v26 }
  0x5e   : > { %659 = vmatprep.subr.bf16.mxu0 %v2356_v1  ;;  %795 = vmatprep.subr.bf16.mxu1 %v2356_v1 }
  0x5f   : > { %v1272_v62 = vshll.u32 %v1986_v59, 16  ;;  %v1270_v3 = vshrl.u32 %v1986_v59, 16 }
  0x61   : > { %660 = vmatpush1.bf16.msra.mxu0 %v2162_v61  ;;  %796 = vmatpush1.bf16.msra.mxu1 %v2164_v0  ;;  %v2208_v61 = vld [vmem:[%s3000_s1 + $0x220] sm:$0xff]  }
  0x62   : > { %927 = vmatprep.subr.bf16.mxu0 %v2356_v1  ;;  %1061 = vmatprep.subr.bf16.mxu1 %v2356_v1  ;;  %v1999_v0 = vld [vmem:[%s2509_s16 + $0x20] sm:$0xee]  ;;  %s265_s16 = sadd.s32 %s2040_s13, %s263_s14  ;;  %s2034_s13 = sshll.u32 %s1576_s12, 4 }
  0x63   : > { %s1743_s17 = sshll.u32 %s265_s16, 3  ;;  %s248_s14 = scalar_lea.vmem [#allocation2], %s2902_s10 }
  0x64   : > { %674 = vmatmul.mubr.bf16.vlgmr.msra.gmra.mrb[4].mxu0 %v575_v4  ;;  %810 = vmatmul.mubr.bf16.vlgmr.msra.gmra.mrb[4].mxu1 %v1847_v7  ;;  %v1274_v4 = vrot.slane %v1272_v62, 1  ;;  %v1951_v7 = vcombine.low %v2729_v25, %v2729_v25  ;;  %s267_s8 = scalar_lea.vmem %s3002_s3, %s1743_s17  ;;  %s1580_s16 = sshll.u32 %s248_s14, 4  ;;  %s2914_s16 = int_to_ptr.vmem [resolvable:$true] %s1580_s16 }
  0x65   : > { %928 = vmatpush1.bf16.msra.mxu0 %v2167_v6  ;;  %1062 = vmatpush1.bf16.msra.mxu1 %v2169_v8  ;;  %v2021_v6 = vcombine.high %v1999_v0, %v2732_v26  ;;  %v2215_v8 = vld [vmem:[%s3000_s1 + $0x280] sm:$0xff]   ;;  %s1595_s17 = sshll.u32 %s3005_s22, 4  ;;  %s2912_s27 = scalar_lea.hbm %s3003_s4, %s2034_s13  ;;  %s2922_s17 = int_to_ptr.vmem [resolvable:$true] %s1595_s17 }
  0x66   : > { %929 = vmatprep.subr.bf16.mxu0 %v2356_v1  ;;  %1063 = vmatprep.subr.bf16.mxu1 %v2356_v1  ;;  %s2228_s12 = scalar_lea.vmem %s2914_s16, 16  ;;  %s2234_s22 = scalar_lea.vmem %s2233_s15, 32 }
  0x67   : > { %1894 = vmatprep.mubr.msk.bf16.mxu0 %vm398_vm0, %v862_v9  ;;  %1928 = vmatprep.mubr.msk.bf16.mxu1 %vm398_vm0, %v996_v10  ;;  %v1275_v9 = vor.u32 %v1274_v4, %v1270_v3  ;;  %v1416_v10 = vrot.slane %v2021_v6, 1  ;;  %p2229_p0 = scmp.ne.s32.totalorder %s2914_s16, %s2228_s12  ;;  %p2235_p4 = scmp.lt.s32.totalorder %s2914_s16, %s2233_s15 }
  0x68   : > { %p2236_p5 = scmp.lt.s32.totalorder %s2234_s22, %s2228_s12 }
  0x69   : > { %930 = vmatpush1.bf16.msra.mxu0 %v2170_v11  ;;  %1064 = vmatpush1.bf16.msra.mxu1 %v2171_v12  ;;  %v2217_v11 = vld [vmem:[%s3000_s1 + $0x288] sm:$0xff]   ;;  %v2218_v12 = vld [vmem:[%s3000_s1 + $0x290] sm:$0xff]   ;;  %p2230_p1 = pnand %p2229_p0, %p2440_p3 }
  0x6a   : > { %931 = vmatprep.subr.bf16.mxu0 %v2356_v1  ;;  %1065 = vmatprep.subr.bf16.mxu1 %v2356_v1  ;;  %p2237_p6 = por %p2236_p5, %p2235_p4 }
  0x6b   : > { %p2231_p2 = pneg %p2230_p1 }
  0x6d   : > { %932 = vmatpush1.bf16.msra.mxu0 %v2172_v13  ;;  %1066 = vmatpush1.bf16.msra.mxu1 %v2173_v14  ;;  %v2219_v13 = vld [vmem:[%s3000_s1 + $0x298] sm:$0xff]   ;;  %v2220_v14 = vld [vmem:[%s3000_s1 + $0x2a0] sm:$0xff]   ;;  %p2238_p7 = pnand %p2237_p6, %p2231_p2 }
  0x6e   : > { %933 = vmatprep.subr.bf16.mxu0 %v2356_v1  ;;  %1067 = vmatprep.subr.bf16.mxu1 %v2356_v1 }
  0x71   : > { %934 = vmatpush1.bf16.msra.mxu0 %v2174_v15  ;;  %1068 = vmatpush1.bf16.msra.mxu1 %v2175_v16  ;;  %v2221_v15 = vld [vmem:[%s3000_s1 + $0x2a8] sm:$0xff]   ;;  %v2222_v16 = vld [vmem:[%s3000_s1 + $0x2b0] sm:$0xff]  }
  0x72   : > { %935 = vmatprep.subr.bf16.mxu0 %v2356_v1  ;;  %1069 = vmatprep.subr.bf16.mxu1 %v2356_v1 }
  0x75   : > { %936 = vmatpush1.bf16.msra.mxu0 %v2176_v17  ;;  %1070 = vmatpush1.bf16.msra.mxu1 %v2177_v18  ;;  %v2223_v17 = vld [vmem:[%s3000_s1 + $0x2b8] sm:$0xff]   ;;  %v2224_v18 = vld [vmem:[%s3000_s1 + $0x2c0] sm:$0xff]  }
  0x76   : > { %937 = vmatprep.subr.bf16.mxu0 %v2356_v1  ;;  %1071 = vmatprep.subr.bf16.mxu1 %v2356_v1 }
  0x79   : > { %938 = vmatpush1.bf16.msra.mxu0 %v2178_v19  ;;  %1072 = vmatpush1.bf16.msra.mxu1 %v2179_v20  ;;  %v2020_v19 = vcombine.low %v1999_v0, %v2732_v26  ;;  %v2225_v20 = vld [vmem:[%s3000_s1 + $0x2c8] sm:$0xff]  }
  0x7a   : > { %939 = vmatprep.subr.bf16.mxu0 %v2356_v1  ;;  %1073 = vmatprep.subr.bf16.mxu1 %v2356_v1 }
  0x7d   : > { %940 = vmatpush1.bf16.msra.mxu0 %v2180_v21  ;;  %1074 = vmatpush1.bf16.msra.mxu1 %v2181_v22  ;;  %v1415_v21 = vrot.slane %v2020_v19, 1 }
  0x7e   : > { %941 = vmatprep.subr.bf16.mxu0 %v2356_v1  ;;  %1075 = vmatprep.subr.bf16.mxu1 %v2356_v1 }
  0x81   : > { %942 = vmatpush1.bf16.msra.mxu0 %v2182_v24  ;;  %1076 = vmatpush1.bf16.msra.mxu1 %v2183_v27 }
  0x82   : > { %943 = vmatprep.subr.bf16.mxu0 %v2356_v1  ;;  %1077 = vmatprep.subr.bf16.mxu1 %v2356_v1 }
  0x85   : > { %944 = vmatpush1.bf16.msra.mxu0 %v2184_v30  ;;  %1078 = vmatpush1.bf16.msra.mxu1 %v2185_v31 }
  0x86   : > { %945 = vmatprep.subr.bf16.mxu0 %v2356_v1  ;;  %1079 = vmatprep.subr.bf16.mxu1 %v2356_v1 }
  0x89   : > { %946 = vmatpush1.bf16.msra.mxu0 %v2186_v35  ;;  %1080 = vmatpush1.bf16.msra.mxu1 %v2188_v37 }
  0x8a   : > { %1197 = vmatprep.subr.bf16.mxu0 %v2356_v1  ;;  %1347 = vmatprep.subr.bf16.mxu1 %v2356_v1 }
  0x8c   : > { %960 = vmatmul.mubr.bf16.vlgmr.msra.gmra.mrb[8].mxu0 %v855_v38  ;;  %1094 = vmatmul.mubr.bf16.vlgmr.msra.gmra.mrb[8].mxu1 %v995_v42 }
  0x8d   : > { %1198 = vmatpush1.bf16.msra.mxu0 %v2191_v41  ;;  %1348 = vmatpush1.bf16.msra.mxu1 %v2193_v43 }
  0x8e   : > { %1199 = vmatprep.subr.bf16.mxu0 %v2356_v1  ;;  %1349 = vmatprep.subr.bf16.mxu1 %v2356_v1 }
  0x8f   : > { %1963 = vmatprep.mubr.msk.bf16.mxu0 %vm398_vm0, %v1952_v44  ;;  %1998 = vmatprep.mubr.msk.bf16.mxu1 %vm398_vm0, %v1282_v45 }
  0x91   : > { %1200 = vmatpush1.bf16.msra.mxu0 %v2194_v46  ;;  %1350 = vmatpush1.bf16.msra.mxu1 %v2195_v47 }
  0x92   : > { %1201 = vmatprep.subr.bf16.mxu0 %v2356_v1  ;;  %1351 = vmatprep.subr.bf16.mxu1 %v2356_v1 }
  0x95   : > { %1202 = vmatpush1.bf16.msra.mxu0 %v2196_v48  ;;  %1352 = vmatpush1.bf16.msra.mxu1 %v2197_v49 }
  0x96   : > { %1203 = vmatprep.subr.bf16.mxu0 %v2356_v1  ;;  %1353 = vmatprep.subr.bf16.mxu1 %v2356_v1 }
  0x99   : > { %1204 = vmatpush1.bf16.msra.mxu0 %v2198_v50  ;;  %1354 = vmatpush1.bf16.msra.mxu1 %v2199_v51 }
  0x9a   : > { %1205 = vmatprep.subr.bf16.mxu0 %v2356_v1  ;;  %1355 = vmatprep.subr.bf16.mxu1 %v2356_v1 }
  0x9d   : > { %1206 = vmatpush1.bf16.msra.mxu0 %v2200_v52  ;;  %1356 = vmatpush1.bf16.msra.mxu1 %v2201_v53 }
  0x9e   : > { %1207 = vmatprep.subr.bf16.mxu0 %v2356_v1  ;;  %1357 = vmatprep.subr.bf16.mxu1 %v2356_v1 }
  0xa1   : > { %1208 = vmatpush1.bf16.msra.mxu0 %v2202_v54  ;;  %1358 = vmatpush1.bf16.msra.mxu1 %v2203_v55 }
  0xa2   : > { %1209 = vmatprep.subr.bf16.mxu0 %v2356_v1  ;;  %1359 = vmatprep.subr.bf16.mxu1 %v2356_v1 }
  0xa5   : > { %1210 = vmatpush1.bf16.msra.mxu0 %v2204_v56  ;;  %1360 = vmatpush1.bf16.msra.mxu1 %v2205_v57 }
  0xa6   : > { %1211 = vmatprep.subr.bf16.mxu0 %v2356_v1  ;;  %1361 = vmatprep.subr.bf16.mxu1 %v2356_v1 }
  0xa9   : > { %1212 = vmatpush1.bf16.msra.mxu0 %v2206_v58  ;;  %1362 = vmatpush1.bf16.msra.mxu1 %v2207_v60 }
  0xaa   : > { %1213 = vmatprep.subr.bf16.mxu0 %v2356_v1  ;;  %1363 = vmatprep.subr.bf16.mxu1 %v2356_v1 }
  0xad   : > { %1214 = vmatpush1.bf16.msra.mxu0 %v2208_v61  ;;  %1364 = vmatpush1.bf16.msra.mxu1 %v2209_v63  ;;  %v2033_v61 = vld [vmem:[%s3001_s2] ss:$0 sm:$0xff] }
  0xae   : > { %1215 = vmatprep.subr.bf16.mxu0 %v2356_v1  ;;  %1365 = vmatprep.subr.bf16.mxu1 %v2356_v1 }
  0xb1   : > { %1216 = vmatpush1.bf16.msra.mxu0 %v2210_v2  ;;  %1366 = vmatpush1.bf16.msra.mxu1 %v2212_v5 }
  0xb2   : > { %1481 = vmatprep.subr.bf16.mxu0 %v2356_v1 }
  0xb4   : > { %1230 = vmatmul.mubr.bf16.vlgmr.msra.gmra.mrb[12].mxu0 %v1951_v7  ;;  %1380 = vmatmul.mubr.bf16.vlgmr.msra.gmra.mrb[12].mxu1 %v1275_v9 }
  0xb5   : > { %1482 = vmatpush1.bf16.msra.mxu0 %v2215_v8  ;;  %2032 = vmatprep.mubr.msk.bf16.mxu0 %vm398_vm0, %v1416_v10 }
  0xb6   : > { %1483 = vmatprep.subr.bf16.mxu0 %v2356_v1 }
  0xb9   : > { %1484 = vmatpush1.bf16.msra.mxu0 %v2217_v11 }
  0xba   : > { %1485 = vmatprep.subr.bf16.mxu0 %v2356_v1 }
  0xbd   : > { %1486 = vmatpush1.bf16.msra.mxu0 %v2218_v12 }
  0xbe   : > { %1487 = vmatprep.subr.bf16.mxu0 %v2356_v1 }
  0xc1   : > { %1488 = vmatpush1.bf16.msra.mxu0 %v2219_v13 }
  0xc2   : > { %1489 = vmatprep.subr.bf16.mxu0 %v2356_v1 }
  0xc5   : > { %1490 = vmatpush1.bf16.msra.mxu0 %v2220_v14 }
  0xc6   : > { %1491 = vmatprep.subr.bf16.mxu0 %v2356_v1 }
  0xc9   : > { %1492 = vmatpush1.bf16.msra.mxu0 %v2221_v15 }
  0xca   : > { %1493 = vmatprep.subr.bf16.mxu0 %v2356_v1 }
  0xcd   : > { %1494 = vmatpush1.bf16.msra.mxu0 %v2222_v16 }
  0xce   : > { %1495 = vmatprep.subr.bf16.mxu0 %v2356_v1 }
  0xd1   : > { %1496 = vmatpush1.bf16.msra.mxu0 %v2223_v17 }
  0xd2   : > { %1497 = vmatprep.subr.bf16.mxu0 %v2356_v1 }
  0xd5   : > { %1498 = vmatpush1.bf16.msra.mxu0 %v2224_v18 }
  0xd6   : > { %1499 = vmatprep.subr.bf16.mxu0 %v2356_v1 }
  0xd9   : > { %1500 = vmatpush1.bf16.msra.mxu0 %v2225_v20 }
  0xdc   : > { %1514 = vmatmul.mubr.bf16.vlgmr.msra.gmra.mrb[16].mxu0 %v1415_v21 }
 0x10f   : > { %v436_v22 = vpop.f32.mrb[0].mxu0  ;;  %v542_v24 = vpop.f32.mrb[0].mxu1 }
 0x110   : > { %v438_v23 = vpop.f32.mrb[1].mxu0  ;;  %v543_v25 = vadd.f32 %v542_v24, %v436_v22  ;;  %v544_v28 = vpop.f32.mrb[1].mxu1 }
 0x111   : > { %v439_v27 = vpop.f32.mrb[2].mxu0  ;;  %v545_v30 = vpop.f32.mrb[2].mxu1 }
 0x112   : > { %v440_v29 = vpop.f32.mrb[3].mxu0  ;;  %v546_v31 = vpop.f32.mrb[3].mxu1 }
 0x137   : > { %v675_v26 = vpop.f32.mrb[4].mxu0  ;;  %v811_v34 = vpop.f32.mrb[4].mxu1 }
 0x138   : > { %v681_v32 = vadd.f32 %v675_v26, %v543_v25  ;;  %v677_v33 = vpop.f32.mrb[5].mxu0  ;;  %v813_v36 = vpop.f32.mrb[5].mxu1 }
 0x139   : > { %v678_v35 = vpop.f32.mrb[6].mxu0  ;;  %v814_v38 = vpop.f32.mrb[6].mxu1 }
 0x13a   : > { %v817_v37 = vadd.f32 %v811_v34, %v681_v32  ;;  %v679_v1 = vpop.f32.mrb[7].mxu0  ;;  %v815_v39 = vpop.f32.mrb[7].mxu1 }
 0x15f   : > { %v961_v40 = vpop.f32.mrb[8].mxu0  ;;  %v1095_v43 = vpop.f32.mrb[8].mxu1 }
 0x160   : > { %v967_v41 = vadd.f32 %v961_v40, %v817_v37  ;;  %v963_v42 = vpop.f32.mrb[9].mxu0  ;;  %v1097_v45 = vpop.f32.mrb[9].mxu1 }
 0x161   : > { %v964_v44 = vpop.f32.mrb[10].mxu0  ;;  %v1098_v48 = vpop.f32.mrb[10].mxu1 }
 0x162   : > { %v1101_v46 = vadd.f32 %v1095_v43, %v967_v41  ;;  %v965_v47 = vpop.f32.mrb[11].mxu0  ;;  %v1099_v49 = vpop.f32.mrb[11].mxu1 }
 0x187   : > { %v1231_v50 = vpop.f32.mrb[12].mxu0  ;;  %v1381_v53 = vpop.f32.mrb[12].mxu1 }
 0x188   : > { %v1237_v51 = vadd.f32 %v1231_v50, %v1101_v46  ;;  %v1233_v52 = vpop.f32.mrb[13].mxu0  ;;  %v1383_v55 = vpop.f32.mrb[13].mxu1 }
 0x189   : > { %v1234_v54 = vpop.f32.mrb[14].mxu0  ;;  %v1384_v58 = vpop.f32.mrb[14].mxu1 }
 0x18a   : > { %v1387_v56 = vadd.f32 %v1381_v53, %v1237_v51  ;;  %v1235_v57 = vpop.f32.mrb[15].mxu0  ;;  %v1385_v59 = vpop.f32.mrb[15].mxu1 }
 0x1af   : > { %v1515_v60 = vpop.f32.mrb[16].mxu0 }
 0x1b0   : > { %v1521_v62 = vadd.f32 %v1515_v60, %v1387_v56  ;;  %v1517_v63 = vpop.f32.mrb[17].mxu0 }
 0x1b1   : > { %v1518_v0 = vpop.f32.mrb[18].mxu0 }
 0x1b2   : > { %v1529_v2 = vadd.f32 %v2033_v61, %v1521_v62  ;;  %v1519_v3 = vpop.f32.mrb[19].mxu0 }
 0x1b4   : > { %1531 = vst.msk [vmem:[%s267_s8] sm:$0xff] %vm1530_vm1, %v1529_v2  ;;  %v1532_v4 = vsel %vm1530_vm1, %v1529_v2, 0.0  ;;  %v1541_v5 = vmul.f32 %v1529_v2, %v1529_v2  ;;  %s2920_s8 = scalar_lea.hbm %s3004_s5, %s2034_s13 }
 0x1b5   : > { %v1533_v6 = vrot.slane %v1532_v4, 4 }
 0x1b6   : > { %v1542_v7 = vsel %vm1530_vm1, %v1541_v5, 0.0 }
 0x1b7   : > { %v1534_v8 = vadd.f32 %v1533_v6, %v1532_v4  ;;  %v1543_v9 = vrot.slane %v1542_v7, 4 }
 0x1b9   : > { %v1535_v10 = vrot.slane %v1534_v8, 2  ;;  %v1544_v11 = vadd.f32 %v1543_v9, %v1542_v7 }
 0x1bb   : > { %v1536_v12 = vadd.f32 %v1535_v10, %v1534_v8  ;;  %v1545_v13 = vrot.slane %v1544_v11, 2 }
 0x1bd   : > { %v1537_v14 = vrot.slane %v1536_v12, 1  ;;  %v1546_v15 = vadd.f32 %v1545_v13, %v1544_v11 }
 0x1bf   : > { %v1538_v16 = vadd.f32 %v1537_v14, %v1536_v12  ;;  %v1547_v17 = vrot.slane %v1546_v15, 1 }
 0x1c1   : > { %1540 = vst.msk [vmem:[%s248_s14] sm:$0x1] %vm1539_vm2, %v1538_v16  ;;  %v1548_v18 = vadd.f32 %v1547_v17, %v1546_v15 }
 0x1c2   : > { %2241 = shalt.err (!%p2238_p7)
}
 0x1c3   : > { %s2242_s13 = scalar_lea.hbm %s2912_s27, 16  ;;  %s2246_s30 = scalar_lea.hbm %s3003_s4, 160 }
 0x1c4   : > { %p2243_p9 = scmp.ne.s32.totalorder %s2912_s27, %s2242_s13  ;;  %p2247_p12 = scmp.lt.u32.totalorder %s2912_s27, %s3003_s4 }
 0x1c5   : > { %p2248_p13 = scmp.lt.u32.totalorder %s2246_s30, %s2242_s13  ;;  %p2250_p1 = scmp.lt.u32.totalorder %s2242_s13, %s2912_s27 }
 0x1c6   : > { %p2244_p10 = pnand %p2243_p9, %p2440_p3 }
 0x1c7   : > { %p2249_p0 = por %p2248_p13, %p2247_p12 }
 0x1c8   : > { %p2245_p11 = pneg %p2244_p10 }
 0x1c9   : > { %p2251_p2 = por %p2250_p1, %p2249_p0 }
 0x1cb   : > { %p2252_p4 = pnand %p2251_p2, %p2245_p11 }
 0x1cd   : > { %2255 = shalt.err (!%p2252_p4)
}
 0x1ce   : > { %2043 = dma.vmem_to_hbm [thread:$0]  (%p2440_p3), %s2914_s16, 16, %s2912_s27, %s1559_s9  }
 0x1cf   : > { %s3008_s22 = scalar_lea.vmem [#allocation4], %s2902_s10  ;;  %s1563_s12 = scalar_lea.sflag [#allocation5], %s2902_s10 }
 0x1d0   : > { %1549 = vst.msk [vmem:[%s3008_s22] sm:$0x1] %vm1539_vm2, %v1548_v18  ;;  %s2256_s14 = scalar_lea.vmem %s2922_s17, 16  ;;  %s2358_s13 = smov [#allocation4]  }
 0x1d1   : > { %p2257_p5 = scmp.ne.s32.totalorder %s2922_s17, %s2256_s14  ;;  %s2260_s21 = sshll.u32 %s2358_s13, 4  ;;  %s2261_s21 = int_to_ptr.vmem [resolvable:$false] %s2260_s21 }
 0x1d2   : > { %s2262_s30 = scalar_lea.vmem %s2261_s21, 32  ;;  %p2263_p9 = scmp.lt.s32.totalorder %s2922_s17, %s2261_s21 }
 0x1d3   : > { %p2258_p6 = pnand %p2257_p5, %p2440_p3  ;;  %p2264_p10 = scmp.lt.s32.totalorder %s2262_s30, %s2256_s14 }
 0x1d5   : > { %p2259_p7 = pneg %p2258_p6  ;;  %p2265_p11 = por %p2264_p10, %p2263_p9 }
 0x1d7   : > { %p2266_p12 = pnand %p2265_p11, %p2259_p7 }
 0x1d9   : > { %2269 = shalt.err (!%p2266_p12)
}
 0x1da   : > { %s2270_s10 = scalar_lea.hbm %s2920_s8, 16  ;;  %s2274_s9 = scalar_lea.hbm %s3004_s5, 160 }
 0x1db   : > { %p2271_p13 = scmp.ne.s32.totalorder %s2920_s8, %s2270_s10  ;;  %p2275_p2 = scmp.lt.u32.totalorder %s2920_s8, %s3004_s5 }
 0x1dc   : > { %p2276_p4 = scmp.lt.u32.totalorder %s2274_s9, %s2270_s10  ;;  %p2278_p6 = scmp.lt.u32.totalorder %s2270_s10, %s2920_s8 }
 0x1dd   : > { %p2272_p0 = pnand %p2271_p13, %p2440_p3 }
 0x1de   : > { %p2277_p5 = por %p2276_p4, %p2275_p2 }
 0x1df   : > { %p2273_p1 = pneg %p2272_p0 }
 0x1e0   : > { %p2279_p7 = por %p2278_p6, %p2277_p5 }
 0x1e2   : > { %p2280_p9 = pnand %p2279_p7, %p2273_p1 }
 0x1e4   : > { %2283 = shalt.err (!%p2280_p9)
}
 0x1e5   : > { %2044 = dma.vmem_to_hbm [thread:$0]  (%p2440_p3), %s2922_s17, 16, %s2920_s8, %s1563_s12  }
 0x1e6 PF: > { %p2054_p10 = scmp.ge.s32.totalorder %s2354_s25, 2  ;;  %s1618_s22 = sand.u32 1, %s2326_s18  }
 0x1e7   : > { %s1619_s14 = scalar_lea.sflag [#allocation3], %s1618_s22 }
 0x1e8   : > { %p2048_p11 = pnand %p2054_p10, %p2449_p8 }
 0x1ea   : > { %2317 = dma.done.wait (!%p2048_p11), %s1619_s14, 16  }
 0x1eb   : > { %2319 = vsyncadd (!%p2048_p11), %s1619_s14, 4294967280  ;;  %s1627_s13 = scalar_lea.sflag [#allocation5], %s1618_s22 }
 0x1ec   : > { %2321 = dma.done.wait (!%p2048_p11), %s1627_s13, 16  }
 0x1ed   : > { %2323 = vsyncadd (!%p2048_p11), %s1627_s13, 4294967280  ;;  %s22_s25 = sadd.s32 1, %s2354_s25   ;;  %s3009_s18 = smov %s2330_s19 }
 0x1ee   : > { %p19_p12 = scmp.ge.s32.totalorder %s22_s25, 12   ;;  %s3010_s19 = smov %s2334_s20 }
 0x1ef   : > { %s3011_s20 = smov %s2458_s11  ;;  %s3012_s21 = smov %s2346_s23 }
 0x1f0   : > { %s3013_s22 = smov %s2350_s24  ;;  %s3014_s23 = smov %s3017_s28 }
 0x1f1   : > { %s3015_s24 = smov %s3021_s29  ;;  %21 = sbr.rel (!%p19_p12) target bundleno = 7 (0x7), region = 107 }
 0x1f8   :  { %1631 = vsyncpa [#allocation3], 1 }
 0x1f9   :  { %1633 = vsyncpa [#allocation3 + $0x1], 1 }
 0x1fa   :  { %1634 = vsyncpa [#allocation5], 1 }
 0x1fb   :  { %1636 = vsyncpa [#allocation5 + $0x1], 1 }

</bundles_post_ra>
